<compile_context>
chip_gen: v7x
topology: tpu7x:2x2x1
jax: 0.10.0
libtpu: 0.0.40
codegen_flags: <defaults>
</compile_context>

<pallas_src>
import sys

import jax
import jax.numpy as jnp
from jax.experimental import pallas as pl
from jax.experimental.pallas import tpu as pltpu

# ---- static layout constants ------------------------------------------------
C1_OUT_P = 8              # conv1 out-channels padded 6 -> 8 (one f32 sublane tile)
K1_P     = 80             # conv1 im2col K padded 3*5*5=75 -> 80
SUB      = 8              # pooled 14x14 grid -> 2x2 parity cells, each padded to 8x8
CELL     = SUB * SUB      # 64 lanes per (row-parity, col-parity) cell
BLK_B    = 4 * CELL       # 256 lanes per batch element (4 parity cells)
REL_W    = 5 * SUB        # 40 lanes per conv2 patch window (5 rows of 8)
C2_IN_P  = 8              # conv2 in-channels padded 6 -> 8
K2       = 25 * C2_IN_P   # 200 = conv2 im2col K (5x5 taps x 8 padded channels)
NFEAT    = 16 * REL_W     # 640 fc1 input features (16 channels x 40 pixel slots)


# ----------------------------- fused Pallas kernel ----------------------------

def _net_kernel(rhs1_ref, w1_ref, b1_ref, w2_ref, b2_ref,
                w3_ref, b3_ref, w4_ref, b4_ref, w5_ref, b5_ref,
                o_ref, rhs2_scr, fcin_scr):
    B = o_ref.shape[0]
    nb = B * BLK_B                          # lanes per conv1 pool-quadrant block

    # ---------------- conv1: ONE MXU matmul over all 4 pool quadrants ----------
    acc1 = jnp.dot(w1_ref[...], rhs1_ref[...],
                   preferred_element_type=jnp.float32)            # [8, 4*nb] f32
    # 2x2 max-pool == max over the 4 quadrant blocks (128-aligned lane slices);
    # bias + ReLU hoisted after the max (identical math, 4x fewer VPU ops).
    m1 = jnp.maximum(jnp.maximum(acc1[:, 0 * nb:1 * nb], acc1[:, 1 * nb:2 * nb]),
                     jnp.maximum(acc1[:, 2 * nb:3 * nb], acc1[:, 3 * nb:4 * nb]))
    p1 = jnp.maximum(m1 + b1_ref[...], 0.0)                       # [8, nb] f32
    # p1 lane layout (per batch element, 256 lanes):
    #   rh*128 + rw*64 + hh*8 + hw   with pooled pixel (ph, pw) = (2*hh+rh, 2*hw+rw)

    # ------------- in-kernel im2col for conv2 (incl. its pool quadrants) -------
    # Thanks to the parity-split layout every (tap ki,kj; quadrant dh,dw; batch b)
    # patch is a contiguous 40-lane window of p1; stores are 8-row aligned.
    for ki in range(5):
        for kj in range(5):
            g = ki * 5 + kj
            for dh in range(2):
                for dw in range(2):
                    q = dh * 2 + dw
                    rh, sh = (dh + ki) % 2, (dh + ki) // 2
                    rw, sw = (dw + kj) % 2, (dw + kj) // 2
                    off = rh * 128 + rw * 64 + sh * 8 + sw
                    for b in range(B):
                        src = b * BLK_B + off
                        dst = (b * 4 + q) * REL_W
                        rhs2_scr[g * 8:(g + 1) * 8, dst:dst + REL_W] = (
                            p1[:, src:src + REL_W])

    # ---------------- conv2: ONE MXU matmul, then pool + bias + ReLU -----------
    acc2 = jnp.dot(w2_ref[...], rhs2_scr[...].astype(jnp.bfloat16),
                   preferred_element_type=jnp.float32)            # [16, B*4*REL_W]
    for b in range(B):
        blk = acc2[:, b * 4 * REL_W:(b + 1) * 4 * REL_W]          # [16, 4*REL_W]
        m2 = jnp.maximum(
            jnp.maximum(blk[:, 0 * REL_W:1 * REL_W], blk[:, 1 * REL_W:2 * REL_W]),
            jnp.maximum(blk[:, 2 * REL_W:3 * REL_W], blk[:, 3 * REL_W:4 * REL_W]))
        p2 = jnp.maximum(m2 + b2_ref[...], 0.0)                   # [16, REL_W] f32
        # flatten (channel, pixel slot) into the fc1 feature lanes
        for c in range(16):
            fcin_scr[b:b + 1, c * REL_W:(c + 1) * REL_W] = p2[c:c + 1, :]

    # ---------------- fc1 -> ReLU -> fc2 -> ReLU -> fc3 ------------------------
    h = jnp.dot(fcin_scr[...].astype(jnp.bfloat16), w3_ref[...],
                preferred_element_type=jnp.float32)               # [B, 120]
    h = jnp.maximum(h + b3_ref[...], 0.0).astype(jnp.bfloat16)
    h = jnp.dot(h, w4_ref[...], preferred_element_type=jnp.float32)   # [B, 84]
    h = jnp.maximum(h + b4_ref[...], 0.0).astype(jnp.bfloat16)
    o_ref[...] = (jnp.dot(h, w5_ref[...], preferred_element_type=jnp.float32)
                  + b5_ref[...])                                  # [B, 1]


# ------------------------------ pallas_call wrapper ---------------------------

def _full_spec(shape):
    n = len(shape)
    return pl.BlockSpec(shape, lambda i, _n=n: (0,) * _n)


def net_pallas(kp, rhs1, B):
    args = (rhs1, kp["w1"], kp["b1"], kp["w2"], kp["b2"],
            kp["w3"], kp["b3"], kp["w4"], kp["b4"], kp["w5"], kp["b5"])
    return pl.pallas_call(
        _net_kernel,
        out_shape=jax.ShapeDtypeStruct((B, 1), jnp.float32),
        grid=(1,),
        in_specs=[_full_spec(a.shape) for a in args],
        out_specs=_full_spec((B, 1)),
        scratch_shapes=[pltpu.VMEM((K2, B * 4 * REL_W), jnp.float32),
                        pltpu.VMEM((B, NFEAT), jnp.float32)],
        compiler_params=pltpu.CompilerParams(
            dimension_semantics=("arbitrary",)),
    )(*args)


# ------------------------------------ params ----------------------------------

def init_params(key):
    """Deterministic synthetic params in the PyTorch nn.Module layouts."""
    def uni(k, shape, fan_in):
        bound = 1.0 / jnp.sqrt(jnp.float32(fan_in))
        return jax.random.uniform(k, shape, jnp.float32, -bound, bound)

    ks = jax.random.split(key, 10)
    return {
        "conv1_w": uni(ks[0], (6, 3, 5, 5), 3 * 5 * 5),
        "conv1_b": uni(ks[1], (6,), 3 * 5 * 5),
        "conv2_w": uni(ks[2], (16, 6, 5, 5), 6 * 5 * 5),
        "conv2_b": uni(ks[3], (16,), 6 * 5 * 5),
        "fc1_w": uni(ks[4], (120, 400), 400),   # torch layout [out, in]
        "fc1_b": uni(ks[5], (120,), 400),
        "fc2_w": uni(ks[6], (84, 120), 120),
        "fc2_b": uni(ks[7], (84,), 120),
        "fc3_w": uni(ks[8], (1, 84), 84),
        "fc3_b": uni(ks[9], (1,), 84),
    }


def prepare_params(params):
    """One-time repack of the PyTorch-layout params into the kernel layouts."""
    f32, bf16 = jnp.float32, jnp.bfloat16

    # conv1: [6,3,5,5] -> [8, 80]; rows = out-channels padded to 8,
    # cols = (ci, ki, kj) torch-flatten order padded 75 -> 80.
    w1 = jnp.zeros((C1_OUT_P, K1_P), f32).at[:6, :75].set(
        params["conv1_w"].reshape(6, 75)).astype(bf16)
    b1 = jnp.zeros((C1_OUT_P, 1), f32).at[:6, 0].set(params["conv1_b"])

    # conv2: [16,6,5,5] -> [16, 200]; column = (ki*5+kj)*8 + ci (ci padded 6 -> 8)
    # to match the in-kernel im2col scratch row layout.
    w2 = jnp.pad(params["conv2_w"].transpose(0, 2, 3, 1),         # [16,5,5,6]
                 ((0, 0), (0, 0), (0, 0), (0, C2_IN_P - 6))
                 ).reshape(16, K2).astype(bf16)
    b2 = params["conv2_b"].reshape(16, 1).astype(f32)

    # fc1: torch input index c*25 + i*5 + j  ->  kernel feature index c*40 + i*8 + j
    # (pixel slots padded 5 -> 8 per row; the pad/junk slots get zero weight).
    w3 = jnp.pad(params["fc1_w"].reshape(120, 16, 5, 5),
                 ((0, 0), (0, 0), (0, 0), (0, SUB - 5)))          # [120,16,5,8]
    w3 = w3.reshape(120, NFEAT).T.astype(bf16)                    # [640, 120]
    b3 = params["fc1_b"].reshape(1, 120).astype(f32)

    w4 = params["fc2_w"].T.astype(bf16)                           # [120, 84]
    b4 = params["fc2_b"].reshape(1, 84).astype(f32)
    w5 = params["fc3_w"].T.astype(bf16)                           # [84, 1]
    b5 = params["fc3_b"].reshape(1, 1).astype(f32)
    return dict(w1=w1, b1=b1, w2=w2, b2=b2, w3=w3, b3=b3,
                w4=w4, b4=b4, w5=w5, b5=b5)


# ------------------------------------ forward ---------------------------------

@jax.jit
def net_forward(kp, x):
    """x: [B, 3, 32, 32] NCHW f32 -> [B, 1] f32 (same semantics as the torch Net)."""
    B = x.shape[0]
    assert x.shape[1:] == (3, 32, 32)

    # conv1 im2col / pool-quadrant / parity-split packing of the raw input (XLA).
    xb = x.astype(jnp.bfloat16)
    # 25 shifted views of the 28x28 conv1 output grid.
    taps = jnp.stack([xb[:, :, ki:ki + 28, kj:kj + 28]
                      for ki in range(5) for kj in range(5)], axis=2)  # [B,3,25,28,28]
    # conv1 output row index: oh = 4*hh + 2*rh + dh   (hh: half of pooled row,
    # rh: pooled-row parity, dh: pool-quadrant row offset); columns likewise.
    t = taps.reshape(B, 3, 25, 7, 2, 2, 7, 2, 2)        # [B,ci,kk,hh,rh,dh,hw,rw,dw]
    t = jnp.pad(t, ((0, 0), (0, 0), (0, 0), (0, 1), (0, 0), (0, 0),
                    (0, 1), (0, 0), (0, 0)))            # pad hh,hw 7 -> 8
    t = t.transpose(1, 2, 5, 8, 0, 4, 7, 3, 6)          # [ci,kk,dh,dw,b,rh,rw,hh,hw]
    rhs1 = t.reshape(75, 4 * B * BLK_B)                 # [75, 4*B*256]
    rhs1 = jnp.pad(rhs1, ((0, K1_P - 75), (0, 0)))      # K 75 -> 80 (zero rows)

    return net_pallas(kp, rhs1, B)


# ------------------------------ pure-JAX reference ----------------------------

def net_reference(params, x):
    """f32 reference with the exact PyTorch Net semantics."""
    def conv(a, w, b):
        y = jax.lax.conv_general_dilated(
            a, w, window_strides=(1, 1), padding="VALID",
            dimension_numbers=("NCHW", "OIHW", "NCHW"))
        return y + b[None, :, None, None]

    def pool(a):
        return jax.lax.reduce_window(a, -jnp.inf, jax.lax.max,
                                     (1, 1, 2, 2), (1, 1, 2, 2), "VALID")

    a = pool(jax.nn.relu(conv(x, params["conv1_w"], params["conv1_b"])))
    a = pool(jax.nn.relu(conv(a, params["conv2_w"], params["conv2_b"])))
    a = a.reshape(a.shape[0], -1)
    a = jax.nn.relu(a @ params["fc1_w"].T + params["fc1_b"])
    a = jax.nn.relu(a @ params["fc2_w"].T + params["fc2_b"])
    return a @ params["fc3_w"].T + params["fc3_b"]


if __name__ == "__main__":
    key = jax.random.PRNGKey(0)
    k_param, k_x = jax.random.split(key)
    params = init_params(k_param)
    kparams = prepare_params(params)            # one-time weight repack
    # Input shape implied by the 16*5*5 flatten: [B, 3, 32, 32]; small batch B=2.
    x = jax.random.normal(k_x, (2, 3, 32, 32), dtype=jnp.float32)

    out = net_forward(kparams, x)
    jax.block_until_ready(out)
    assert out.shape == (2, 1), out.shape

    # Soft numerical check against a pure-JAX f32 reference (bf16 matmul operands
    # give ~1e-2 relative deviation); diagnostics go to stderr only.
    ref = net_reference(params, x)
    err = float(jnp.max(jnp.abs(out - ref)))
    scale = float(jnp.max(jnp.abs(ref)))
    if not err <= 0.05 + 0.05 * scale:
        print("WARNING: kernel/reference mismatch: max|diff|=%.4f (ref scale %.4f)"
              % (err, scale), file=sys.stderr)

    print("KERNEL_OK")
</pallas_src>

<mosaic_0001>
module attributes {stable_mosaic.version = 11 : i64} {
  func.func @_net_kernel(%arg0: i32, %arg1: memref<80x2048xbf16, #tpu.memory_space<vmem>>, %arg2: memref<8x80xbf16, #tpu.memory_space<vmem>>, %arg3: memref<8x1xf32, #tpu.memory_space<vmem>>, %arg4: memref<16x200xbf16, #tpu.memory_space<vmem>>, %arg5: memref<16x1xf32, #tpu.memory_space<vmem>>, %arg6: memref<640x120xbf16, #tpu.memory_space<vmem>>, %arg7: memref<1x120xf32, #tpu.memory_space<vmem>>, %arg8: memref<120x84xbf16, #tpu.memory_space<vmem>>, %arg9: memref<1x84xf32, #tpu.memory_space<vmem>>, %arg10: memref<84x1xbf16, #tpu.memory_space<vmem>>, %arg11: memref<1x1xf32, #tpu.memory_space<vmem>>, %arg12: memref<2x1xf32, #tpu.memory_space<vmem>>, %arg13: memref<200x320xf32, #tpu.memory_space<vmem>>, %arg14: memref<2x640xf32, #tpu.memory_space<vmem>>) attributes {dimension_semantics = [#tpu.dimension_semantics<arbitrary>], iteration_bounds = array<i64: 1>, scalar_prefetch = 0 : i64, scratch_operands = 2 : i64, tpu.core_type = #tpu.core_type<tc>, window_params = [{pipeline_mode = #tpu.pipeline_mode<synchronous>, transform_indices = @transform_0, window_bounds = array<i64: 80, 2048>}, {pipeline_mode = #tpu.pipeline_mode<synchronous>, transform_indices = @transform_1, window_bounds = array<i64: 8, 80>}, {pipeline_mode = #tpu.pipeline_mode<synchronous>, transform_indices = @transform_2, window_bounds = array<i64: 8, 1>}, {pipeline_mode = #tpu.pipeline_mode<synchronous>, transform_indices = @transform_3, window_bounds = array<i64: 16, 200>}, {pipeline_mode = #tpu.pipeline_mode<synchronous>, transform_indices = @transform_4, window_bounds = array<i64: 16, 1>}, {pipeline_mode = #tpu.pipeline_mode<synchronous>, transform_indices = @transform_5, window_bounds = array<i64: 640, 120>}, {pipeline_mode = #tpu.pipeline_mode<synchronous>, transform_indices = @transform_6, window_bounds = array<i64: 1, 120>}, {pipeline_mode = #tpu.pipeline_mode<synchronous>, transform_indices = @transform_7, window_bounds = array<i64: 120, 84>}, {pipeline_mode = #tpu.pipeline_mode<synchronous>, transform_indices = @transform_8, window_bounds = array<i64: 1, 84>}, {pipeline_mode = #tpu.pipeline_mode<synchronous>, transform_indices = @transform_9, window_bounds = array<i64: 84, 1>}, {pipeline_mode = #tpu.pipeline_mode<synchronous>, transform_indices = @transform_10, window_bounds = array<i64: 1, 1>}, {pipeline_mode = #tpu.pipeline_mode<synchronous>, transform_indices = @transform_11, window_bounds = array<i64: 2, 1>}]} {
    %c0 = arith.constant 0 : index
    %c0_0 = arith.constant 0 : index
    %0 = vector.load %arg2[%c0, %c0_0] : memref<8x80xbf16, #tpu.memory_space<vmem>>, vector<8x80xbf16>
    %c0_1 = arith.constant 0 : index
    %c0_2 = arith.constant 0 : index
    %1 = vector.load %arg1[%c0_1, %c0_2] : memref<80x2048xbf16, #tpu.memory_space<vmem>>, vector<80x2048xbf16>
    %cst = arith.constant dense<0.000000e+00> : vector<8x2048xf32>
    %2 = tpu.matmul %0, %1, %cst {dimension_numbers = #tpu.dot_dimension_numbers<[1], [0], [0], [1], [0, 0, 1, 1], [], []>} : vector<8x80xbf16>, vector<80x2048xbf16>, vector<8x2048xf32> -> vector<8x2048xf32>
    %3 = vector.extract_strided_slice %2 {offsets = [0, 0], sizes = [8, 512], strides = [1, 1]} : vector<8x2048xf32> to vector<8x512xf32>
    %4 = vector.extract_strided_slice %2 {offsets = [0, 512], sizes = [8, 512], strides = [1, 1]} : vector<8x2048xf32> to vector<8x512xf32>
    %5 = arith.maximumf %3, %4 : vector<8x512xf32>
    %6 = vector.extract_strided_slice %2 {offsets = [0, 1024], sizes = [8, 512], strides = [1, 1]} : vector<8x2048xf32> to vector<8x512xf32>
    %7 = vector.extract_strided_slice %2 {offsets = [0, 1536], sizes = [8, 512], strides = [1, 1]} : vector<8x2048xf32> to vector<8x512xf32>
    %8 = arith.maximumf %6, %7 : vector<8x512xf32>
    %9 = arith.maximumf %5, %8 : vector<8x512xf32>
    %c0_3 = arith.constant 0 : index
    %c0_4 = arith.constant 0 : index
    %10 = vector.load %arg3[%c0_3, %c0_4] : memref<8x1xf32, #tpu.memory_space<vmem>>, vector<8x1xf32>
    %11 = vector.broadcast %10 : vector<8x1xf32> to vector<8x512xf32>
    %12 = arith.addf %9, %11 : vector<8x512xf32>
    %cst_5 = arith.constant 0.000000e+00 : f32
    %13 = vector.broadcast %cst_5 : f32 to vector<8x512xf32>
    %14 = arith.maximumf %12, %13 : vector<8x512xf32>
    %15 = vector.extract_strided_slice %14 {offsets = [0, 0], sizes = [8, 40], strides = [1, 1]} : vector<8x512xf32> to vector<8x40xf32>
    %c0_6 = arith.constant 0 : index
    %c0_7 = arith.constant 0 : index
    %16 = vector.load %arg13[%c0_6, %c0_7] : memref<200x320xf32, #tpu.memory_space<vmem>>, vector<8x40xf32>
    tpu.vector_store %arg13[%c0_6, %c0_7], %15 {strides = array<i32>} : memref<200x320xf32, #tpu.memory_space<vmem>>, vector<8x40xf32>,
    %17 = vector.extract_strided_slice %14 {offsets = [0, 256], sizes = [8, 40], strides = [1, 1]} : vector<8x512xf32> to vector<8x40xf32>
    %c0_8 = arith.constant 0 : index
    %c160 = arith.constant 160 : index
    %18 = vector.load %arg13[%c0_8, %c160] : memref<200x320xf32, #tpu.memory_space<vmem>>, vector<8x40xf32>
    tpu.vector_store %arg13[%c0_8, %c160], %17 {strides = array<i32>} : memref<200x320xf32, #tpu.memory_space<vmem>>, vector<8x40xf32>,
    %19 = vector.extract_strided_slice %14 {offsets = [0, 64], sizes = [8, 40], strides = [1, 1]} : vector<8x512xf32> to vector<8x40xf32>
    %c0_9 = arith.constant 0 : index
    %c40 = arith.constant 40 : index
    %20 = vector.load %arg13[%c0_9, %c40] : memref<200x320xf32, #tpu.memory_space<vmem>>, vector<8x40xf32>
    tpu.vector_store %arg13[%c0_9, %c40], %19 {strides = array<i32>} : memref<200x320xf32, #tpu.memory_space<vmem>>, vector<8x40xf32>,
    %21 = vector.extract_strided_slice %14 {offsets = [0, 320], sizes = [8, 40], strides = [1, 1]} : vector<8x512xf32> to vector<8x40xf32>
    %c0_10 = arith.constant 0 : index
    %c200 = arith.constant 200 : index
    %22 = vector.load %arg13[%c0_10, %c200] : memref<200x320xf32, #tpu.memory_space<vmem>>, vector<8x40xf32>
    tpu.vector_store %arg13[%c0_10, %c200], %21 {strides = array<i32>} : memref<200x320xf32, #tpu.memory_space<vmem>>, vector<8x40xf32>,
    %23 = vector.extract_strided_slice %14 {offsets = [0, 128], sizes = [8, 40], strides = [1, 1]} : vector<8x512xf32> to vector<8x40xf32>
    %c0_11 = arith.constant 0 : index
    %c80 = arith.constant 80 : index
    %24 = vector.load %arg13[%c0_11, %c80] : memref<200x320xf32, #tpu.memory_space<vmem>>, vector<8x40xf32>
    tpu.vector_store %arg13[%c0_11, %c80], %23 {strides = array<i32>} : memref<200x320xf32, #tpu.memory_space<vmem>>, vector<8x40xf32>,
    %25 = vector.extract_strided_slice %14 {offsets = [0, 384], sizes = [8, 40], strides = [1, 1]} : vector<8x512xf32> to vector<8x40xf32>
    %c0_12 = arith.constant 0 : index
    %c240 = arith.constant 240 : index
    %26 = vector.load %arg13[%c0_12, %c240] : memref<200x320xf32, #tpu.memory_space<vmem>>, vector<8x40xf32>
    tpu.vector_store %arg13[%c0_12, %c240], %25 {strides = array<i32>} : memref<200x320xf32, #tpu.memory_space<vmem>>, vector<8x40xf32>,
    %27 = vector.extract_strided_slice %14 {offsets = [0, 192], sizes = [8, 40], strides = [1, 1]} : vector<8x512xf32> to vector<8x40xf32>
    %c0_13 = arith.constant 0 : index
    %c120 = arith.constant 120 : index
    %28 = vector.load %arg13[%c0_13, %c120] : memref<200x320xf32, #tpu.memory_space<vmem>>, vector<8x40xf32>
    tpu.vector_store %arg13[%c0_13, %c120], %27 {strides = array<i32>} : memref<200x320xf32, #tpu.memory_space<vmem>>, vector<8x40xf32>,
    %29 = vector.extract_strided_slice %14 {offsets = [0, 448], sizes = [8, 40], strides = [1, 1]} : vector<8x512xf32> to vector<8x40xf32>
    %c0_14 = arith.constant 0 : index
    %c280 = arith.constant 280 : index
    %30 = vector.load %arg13[%c0_14, %c280] : memref<200x320xf32, #tpu.memory_space<vmem>>, vector<8x40xf32>
    tpu.vector_store %arg13[%c0_14, %c280], %29 {strides = array<i32>} : memref<200x320xf32, #tpu.memory_space<vmem>>, vector<8x40xf32>,
    %31 = vector.extract_strided_slice %14 {offsets = [0, 64], sizes = [8, 40], strides = [1, 1]} : vector<8x512xf32> to vector<8x40xf32>
    %c8 = arith.constant 8 : index
    %c0_15 = arith.constant 0 : index
    %32 = vector.load %arg13[%c8, %c0_15] : memref<200x320xf32, #tpu.memory_space<vmem>>, vector<8x40xf32>
    tpu.vector_store %arg13[%c8, %c0_15], %31 {strides = array<i32>} : memref<200x320xf32, #tpu.memory_space<vmem>>, vector<8x40xf32>,
    %33 = vector.extract_strided_slice %14 {offsets = [0, 320], sizes = [8, 40], strides = [1, 1]} : vector<8x512xf32> to vector<8x40xf32>
    %c8_16 = arith.constant 8 : index
    %c160_17 = arith.constant 160 : index
    %34 = vector.load %arg13[%c8_16, %c160_17] : memref<200x320xf32, #tpu.memory_space<vmem>>, vector<8x40xf32>
    tpu.vector_store %arg13[%c8_16, %c160_17], %33 {strides = array<i32>} : memref<200x320xf32, #tpu.memory_space<vmem>>, vector<8x40xf32>,
    %35 = vector.extract_strided_slice %14 {offsets = [0, 1], sizes = [8, 40], strides = [1, 1]} : vector<8x512xf32> to vector<8x40xf32>
    %c8_18 = arith.constant 8 : index
    %c40_19 = arith.constant 40 : index
    %36 = vector.load %arg13[%c8_18, %c40_19] : memref<200x320xf32, #tpu.memory_space<vmem>>, vector<8x40xf32>
    tpu.vector_store %arg13[%c8_18, %c40_19], %35 {strides = array<i32>} : memref<200x320xf32, #tpu.memory_space<vmem>>, vector<8x40xf32>,
    %37 = vector.extract_strided_slice %14 {offsets = [0, 257], sizes = [8, 40], strides = [1, 1]} : vector<8x512xf32> to vector<8x40xf32>
    %c8_20 = arith.constant 8 : index
    %c200_21 = arith.constant 200 : index
    %38 = vector.load %arg13[%c8_20, %c200_21] : memref<200x320xf32, #tpu.memory_space<vmem>>, vector<8x40xf32>
    tpu.vector_store %arg13[%c8_20, %c200_21], %37 {strides = array<i32>} : memref<200x320xf32, #tpu.memory_space<vmem>>, vector<8x40xf32>,
    %39 = vector.extract_strided_slice %14 {offsets = [0, 192], sizes = [8, 40], strides = [1, 1]} : vector<8x512xf32> to vector<8x40xf32>
    %c8_22 = arith.constant 8 : index
    %c80_23 = arith.constant 80 : index
    %40 = vector.load %arg13[%c8_22, %c80_23] : memref<200x320xf32, #tpu.memory_space<vmem>>, vector<8x40xf32>
    tpu.vector_store %arg13[%c8_22, %c80_23], %39 {strides = array<i32>} : memref<200x320xf32, #tpu.memory_space<vmem>>, vector<8x40xf32>,
    %41 = vector.extract_strided_slice %14 {offsets = [0, 448], sizes = [8, 40], strides = [1, 1]} : vector<8x512xf32> to vector<8x40xf32>
    %c8_24 = arith.constant 8 : index
    %c240_25 = arith.constant 240 : index
    %42 = vector.load %arg13[%c8_24, %c240_25] : memref<200x320xf32, #tpu.memory_space<vmem>>, vector<8x40xf32>
    tpu.vector_store %arg13[%c8_24, %c240_25], %41 {strides = array<i32>} : memref<200x320xf32, #tpu.memory_space<vmem>>, vector<8x40xf32>,
    %43 = vector.extract_strided_slice %14 {offsets = [0, 129], sizes = [8, 40], strides = [1, 1]} : vector<8x512xf32> to vector<8x40xf32>
    %c8_26 = arith.constant 8 : index
    %c120_27 = arith.constant 120 : index
    %44 = vector.load %arg13[%c8_26, %c120_27] : memref<200x320xf32, #tpu.memory_space<vmem>>, vector<8x40xf32>
    tpu.vector_store %arg13[%c8_26, %c120_27], %43 {strides = array<i32>} : memref<200x320xf32, #tpu.memory_space<vmem>>, vector<8x40xf32>,
    %45 = vector.extract_strided_slice %14 {offsets = [0, 385], sizes = [8, 40], strides = [1, 1]} : vector<8x512xf32> to vector<8x40xf32>
    %c8_28 = arith.constant 8 : index
    %c280_29 = arith.constant 280 : index
    %46 = vector.load %arg13[%c8_28, %c280_29] : memref<200x320xf32, #tpu.memory_space<vmem>>, vector<8x40xf32>
    tpu.vector_store %arg13[%c8_28, %c280_29], %45 {strides = array<i32>} : memref<200x320xf32, #tpu.memory_space<vmem>>, vector<8x40xf32>,
    %47 = vector.extract_strided_slice %14 {offsets = [0, 1], sizes = [8, 40], strides = [1, 1]} : vector<8x512xf32> to vector<8x40xf32>
    %c16 = arith.constant 16 : index
    %c0_30 = arith.constant 0 : index
    %48 = vector.load %arg13[%c16, %c0_30] : memref<200x320xf32, #tpu.memory_space<vmem>>, vector<8x40xf32>
    tpu.vector_store %arg13[%c16, %c0_30], %47 {strides = array<i32>} : memref<200x320xf32, #tpu.memory_space<vmem>>, vector<8x40xf32>,
    %49 = vector.extract_strided_slice %14 {offsets = [0, 257], sizes = [8, 40], strides = [1, 1]} : vector<8x512xf32> to vector<8x40xf32>
    %c16_31 = arith.constant 16 : index
    %c160_32 = arith.constant 160 : index
    %50 = vector.load %arg13[%c16_31, %c160_32] : memref<200x320xf32, #tpu.memory_space<vmem>>, vector<8x40xf32>
    tpu.vector_store %arg13[%c16_31, %c160_32], %49 {strides = array<i32>} : memref<200x320xf32, #tpu.memory_space<vmem>>, vector<8x40xf32>,
    %51 = vector.extract_strided_slice %14 {offsets = [0, 65], sizes = [8, 40], strides = [1, 1]} : vector<8x512xf32> to vector<8x40xf32>
    %c16_33 = arith.constant 16 : index
    %c40_34 = arith.constant 40 : index
    %52 = vector.load %arg13[%c16_33, %c40_34] : memref<200x320xf32, #tpu.memory_space<vmem>>, vector<8x40xf32>
    tpu.vector_store %arg13[%c16_33, %c40_34], %51 {strides = array<i32>} : memref<200x320xf32, #tpu.memory_space<vmem>>, vector<8x40xf32>,
    %53 = vector.extract_strided_slice %14 {offsets = [0, 321], sizes = [8, 40], strides = [1, 1]} : vector<8x512xf32> to vector<8x40xf32>
    %c16_35 = arith.constant 16 : index
    %c200_36 = arith.constant 200 : index
    %54 = vector.load %arg13[%c16_35, %c200_36] : memref<200x320xf32, #tpu.memory_space<vmem>>, vector<8x40xf32>
    tpu.vector_store %arg13[%c16_35, %c200_36], %53 {strides = array<i32>} : memref<200x320xf32, #tpu.memory_space<vmem>>, vector<8x40xf32>,
    %55 = vector.extract_strided_slice %14 {offsets = [0, 129], sizes = [8, 40], strides = [1, 1]} : vector<8x512xf32> to vector<8x40xf32>
    %c16_37 = arith.constant 16 : index
    %c80_38 = arith.constant 80 : index
    %56 = vector.load %arg13[%c16_37, %c80_38] : memref<200x320xf32, #tpu.memory_space<vmem>>, vector<8x40xf32>
    tpu.vector_store %arg13[%c16_37, %c80_38], %55 {strides = array<i32>} : memref<200x320xf32, #tpu.memory_space<vmem>>, vector<8x40xf32>,
    %57 = vector.extract_strided_slice %14 {offsets = [0, 385], sizes = [8, 40], strides = [1, 1]} : vector<8x512xf32> to vector<8x40xf32>
    %c16_39 = arith.constant 16 : index
    %c240_40 = arith.constant 240 : index
    %58 = vector.load %arg13[%c16_39, %c240_40] : memref<200x320xf32, #tpu.memory_space<vmem>>, vector<8x40xf32>
    tpu.vector_store %arg13[%c16_39, %c240_40], %57 {strides = array<i32>} : memref<200x320xf32, #tpu.memory_space<vmem>>, vector<8x40xf32>,
    %59 = vector.extract_strided_slice %14 {offsets = [0, 193], sizes = [8, 40], strides = [1, 1]} : vector<8x512xf32> to vector<8x40xf32>
    %c16_41 = arith.constant 16 : index
    %c120_42 = arith.constant 120 : index
    %60 = vector.load %arg13[%c16_41, %c120_42] : memref<200x320xf32, #tpu.memory_space<vmem>>, vector<8x40xf32>
    tpu.vector_store %arg13[%c16_41, %c120_42], %59 {strides = array<i32>} : memref<200x320xf32, #tpu.memory_space<vmem>>, vector<8x40xf32>,
    %61 = vector.extract_strided_slice %14 {offsets = [0, 449], sizes = [8, 40], strides = [1, 1]} : vector<8x512xf32> to vector<8x40xf32>
    %c16_43 = arith.constant 16 : index
    %c280_44 = arith.constant 280 : index
    %62 = vector.load %arg13[%c16_43, %c280_44] : memref<200x320xf32, #tpu.memory_space<vmem>>, vector<8x40xf32>
    tpu.vector_store %arg13[%c16_43, %c280_44], %61 {strides = array<i32>} : memref<200x320xf32, #tpu.memory_space<vmem>>, vector<8x40xf32>,
    %63 = vector.extract_strided_slice %14 {offsets = [0, 65], sizes = [8, 40], strides = [1, 1]} : vector<8x512xf32> to vector<8x40xf32>
    %c24 = arith.constant 24 : index
    %c0_45 = arith.constant 0 : index
    %64 = vector.load %arg13[%c24, %c0_45] : memref<200x320xf32, #tpu.memory_space<vmem>>, vector<8x40xf32>
    tpu.vector_store %arg13[%c24, %c0_45], %63 {strides = array<i32>} : memref<200x320xf32, #tpu.memory_space<vmem>>, vector<8x40xf32>,
    %65 = vector.extract_strided_slice %14 {offsets = [0, 321], sizes = [8, 40], strides = [1, 1]} : vector<8x512xf32> to vector<8x40xf32>
    %c24_46 = arith.constant 24 : index
    %c160_47 = arith.constant 160 : index
    %66 = vector.load %arg13[%c24_46, %c160_47] : memref<200x320xf32, #tpu.memory_space<vmem>>, vector<8x40xf32>
    tpu.vector_store %arg13[%c24_46, %c160_47], %65 {strides = array<i32>} : memref<200x320xf32, #tpu.memory_space<vmem>>, vector<8x40xf32>,
    %67 = vector.extract_strided_slice %14 {offsets = [0, 2], sizes = [8, 40], strides = [1, 1]} : vector<8x512xf32> to vector<8x40xf32>
    %c24_48 = arith.constant 24 : index
    %c40_49 = arith.constant 40 : index
    %68 = vector.load %arg13[%c24_48, %c40_49] : memref<200x320xf32, #tpu.memory_space<vmem>>, vector<8x40xf32>
    tpu.vector_store %arg13[%c24_48, %c40_49], %67 {strides = array<i32>} : memref<200x320xf32, #tpu.memory_space<vmem>>, vector<8x40xf32>,
    %69 = vector.extract_strided_slice %14 {offsets = [0, 258], sizes = [8, 40], strides = [1, 1]} : vector<8x512xf32> to vector<8x40xf32>
    %c24_50 = arith.constant 24 : index
    %c200_51 = arith.constant 200 : index
    %70 = vector.load %arg13[%c24_50, %c200_51] : memref<200x320xf32, #tpu.memory_space<vmem>>, vector<8x40xf32>
    tpu.vector_store %arg13[%c24_50, %c200_51], %69 {strides = array<i32>} : memref<200x320xf32, #tpu.memory_space<vmem>>, vector<8x40xf32>,
    %71 = vector.extract_strided_slice %14 {offsets = [0, 193], sizes = [8, 40], strides = [1, 1]} : vector<8x512xf32> to vector<8x40xf32>
    %c24_52 = arith.constant 24 : index
    %c80_53 = arith.constant 80 : index
    %72 = vector.load %arg13[%c24_52, %c80_53] : memref<200x320xf32, #tpu.memory_space<vmem>>, vector<8x40xf32>
    tpu.vector_store %arg13[%c24_52, %c80_53], %71 {strides = array<i32>} : memref<200x320xf32, #tpu.memory_space<vmem>>, vector<8x40xf32>,
    %73 = vector.extract_strided_slice %14 {offsets = [0, 449], sizes = [8, 40], strides = [1, 1]} : vector<8x512xf32> to vector<8x40xf32>
    %c24_54 = arith.constant 24 : index
    %c240_55 = arith.constant 240 : index
    %74 = vector.load %arg13[%c24_54, %c240_55] : memref<200x320xf32, #tpu.memory_space<vmem>>, vector<8x40xf32>
    tpu.vector_store %arg13[%c24_54, %c240_55], %73 {strides = array<i32>} : memref<200x320xf32, #tpu.memory_space<vmem>>, vector<8x40xf32>,
    %75 = vector.extract_strided_slice %14 {offsets = [0, 130], sizes = [8, 40], strides = [1, 1]} : vector<8x512xf32> to vector<8x40xf32>
    %c24_56 = arith.constant 24 : index
    %c120_57 = arith.constant 120 : index
    %76 = vector.load %arg13[%c24_56, %c120_57] : memref<200x320xf32, #tpu.memory_space<vmem>>, vector<8x40xf32>
    tpu.vector_store %arg13[%c24_56, %c120_57], %75 {strides = array<i32>} : memref<200x320xf32, #tpu.memory_space<vmem>>, vector<8x40xf32>,
    %77 = vector.extract_strided_slice %14 {offsets = [0, 386], sizes = [8, 40], strides = [1, 1]} : vector<8x512xf32> to vector<8x40xf32>
    %c24_58 = arith.constant 24 : index
    %c280_59 = arith.constant 280 : index
    %78 = vector.load %arg13[%c24_58, %c280_59] : memref<200x320xf32, #tpu.memory_space<vmem>>, vector<8x40xf32>
    tpu.vector_store %arg13[%c24_58, %c280_59], %77 {strides = array<i32>} : memref<200x320xf32, #tpu.memory_space<vmem>>, vector<8x40xf32>,
    %79 = vector.extract_strided_slice %14 {offsets = [0, 2], sizes = [8, 40], strides = [1, 1]} : vector<8x512xf32> to vector<8x40xf32>
    %c32 = arith.constant 32 : index
    %c0_60 = arith.constant 0 : index
    %80 = vector.load %arg13[%c32, %c0_60] : memref<200x320xf32, #tpu.memory_space<vmem>>, vector<8x40xf32>
    tpu.vector_store %arg13[%c32, %c0_60], %79 {strides = array<i32>} : memref<200x320xf32, #tpu.memory_space<vmem>>, vector<8x40xf32>,
    %81 = vector.extract_strided_slice %14 {offsets = [0, 258], sizes = [8, 40], strides = [1, 1]} : vector<8x512xf32> to vector<8x40xf32>
    %c32_61 = arith.constant 32 : index
    %c160_62 = arith.constant 160 : index
    %82 = vector.load %arg13[%c32_61, %c160_62] : memref<200x320xf32, #tpu.memory_space<vmem>>, vector<8x40xf32>
    tpu.vector_store %arg13[%c32_61, %c160_62], %81 {strides = array<i32>} : memref<200x320xf32, #tpu.memory_space<vmem>>, vector<8x40xf32>,
    %83 = vector.extract_strided_slice %14 {offsets = [0, 66], sizes = [8, 40], strides = [1, 1]} : vector<8x512xf32> to vector<8x40xf32>
    %c32_63 = arith.constant 32 : index
    %c40_64 = arith.constant 40 : index
    %84 = vector.load %arg13[%c32_63, %c40_64] : memref<200x320xf32, #tpu.memory_space<vmem>>, vector<8x40xf32>
    tpu.vector_store %arg13[%c32_63, %c40_64], %83 {strides = array<i32>} : memref<200x320xf32, #tpu.memory_space<vmem>>, vector<8x40xf32>,
    %85 = vector.extract_strided_slice %14 {offsets = [0, 322], sizes = [8, 40], strides = [1, 1]} : vector<8x512xf32> to vector<8x40xf32>
    %c32_65 = arith.constant 32 : index
    %c200_66 = arith.constant 200 : index
    %86 = vector.load %arg13[%c32_65, %c200_66] : memref<200x320xf32, #tpu.memory_space<vmem>>, vector<8x40xf32>
    tpu.vector_store %arg13[%c32_65, %c200_66], %85 {strides = array<i32>} : memref<200x320xf32, #tpu.memory_space<vmem>>, vector<8x40xf32>,
    %87 = vector.extract_strided_slice %14 {offsets = [0, 130], sizes = [8, 40], strides = [1, 1]} : vector<8x512xf32> to vector<8x40xf32>
    %c32_67 = arith.constant 32 : index
    %c80_68 = arith.constant 80 : index
    %88 = vector.load %arg13[%c32_67, %c80_68] : memref<200x320xf32, #tpu.memory_space<vmem>>, vector<8x40xf32>
    tpu.vector_store %arg13[%c32_67, %c80_68], %87 {strides = array<i32>} : memref<200x320xf32, #tpu.memory_space<vmem>>, vector<8x40xf32>,
    %89 = vector.extract_strided_slice %14 {offsets = [0, 386], sizes = [8, 40], strides = [1, 1]} : vector<8x512xf32> to vector<8x40xf32>
    %c32_69 = arith.constant 32 : index
    %c240_70 = arith.constant 240 : index
    %90 = vector.load %arg13[%c32_69, %c240_70] : memref<200x320xf32, #tpu.memory_space<vmem>>, vector<8x40xf32>
    tpu.vector_store %arg13[%c32_69, %c240_70], %89 {strides = array<i32>} : memref<200x320xf32, #tpu.memory_space<vmem>>, vector<8x40xf32>,
    %91 = vector.extract_strided_slice %14 {offsets = [0, 194], sizes = [8, 40], strides = [1, 1]} : vector<8x512xf32> to vector<8x40xf32>
    %c32_71 = arith.constant 32 : index
    %c120_72 = arith.constant 120 : index
    %92 = vector.load %arg13[%c32_71, %c120_72] : memref<200x320xf32, #tpu.memory_space<vmem>>, vector<8x40xf32>
    tpu.vector_store %arg13[%c32_71, %c120_72], %91 {strides = array<i32>} : memref<200x320xf32, #tpu.memory_space<vmem>>, vector<8x40xf32>,
    %93 = vector.extract_strided_slice %14 {offsets = [0, 450], sizes = [8, 40], strides = [1, 1]} : vector<8x512xf32> to vector<8x40xf32>
    %c32_73 = arith.constant 32 : index
    %c280_74 = arith.constant 280 : index
    %94 = vector.load %arg13[%c32_73, %c280_74] : memref<200x320xf32, #tpu.memory_space<vmem>>, vector<8x40xf32>
    tpu.vector_store %arg13[%c32_73, %c280_74], %93 {strides = array<i32>} : memref<200x320xf32, #tpu.memory_space<vmem>>, vector<8x40xf32>,
    %95 = vector.extract_strided_slice %14 {offsets = [0, 128], sizes = [8, 40], strides = [1, 1]} : vector<8x512xf32> to vector<8x40xf32>
    %c40_75 = arith.constant 40 : index
    %c0_76 = arith.constant 0 : index
    %96 = vector.load %arg13[%c40_75, %c0_76] : memref<200x320xf32, #tpu.memory_space<vmem>>, vector<8x40xf32>
    tpu.vector_store %arg13[%c40_75, %c0_76], %95 {strides = array<i32>} : memref<200x320xf32, #tpu.memory_space<vmem>>, vector<8x40xf32>,
    %97 = vector.extract_strided_slice %14 {offsets = [0, 384], sizes = [8, 40], strides = [1, 1]} : vector<8x512xf32> to vector<8x40xf32>
    %c40_77 = arith.constant 40 : index
    %c160_78 = arith.constant 160 : index
    %98 = vector.load %arg13[%c40_77, %c160_78] : memref<200x320xf32, #tpu.memory_space<vmem>>, vector<8x40xf32>
    tpu.vector_store %arg13[%c40_77, %c160_78], %97 {strides = array<i32>} : memref<200x320xf32, #tpu.memory_space<vmem>>, vector<8x40xf32>,
    %99 = vector.extract_strided_slice %14 {offsets = [0, 192], sizes = [8, 40], strides = [1, 1]} : vector<8x512xf32> to vector<8x40xf32>
    %c40_79 = arith.constant 40 : index
    %c40_80 = arith.constant 40 : index
    %100 = vector.load %arg13[%c40_79, %c40_80] : memref<200x320xf32, #tpu.memory_space<vmem>>, vector<8x40xf32>
    tpu.vector_store %arg13[%c40_79, %c40_80], %99 {strides = array<i32>} : memref<200x320xf32, #tpu.memory_space<vmem>>, vector<8x40xf32>,
    %101 = vector.extract_strided_slice %14 {offsets = [0, 448], sizes = [8, 40], strides = [1, 1]} : vector<8x512xf32> to vector<8x40xf32>
    %c40_81 = arith.constant 40 : index
    %c200_82 = arith.constant 200 : index
    %102 = vector.load %arg13[%c40_81, %c200_82] : memref<200x320xf32, #tpu.memory_space<vmem>>, vector<8x40xf32>
    tpu.vector_store %arg13[%c40_81, %c200_82], %101 {strides = array<i32>} : memref<200x320xf32, #tpu.memory_space<vmem>>, vector<8x40xf32>,
    %103 = vector.extract_strided_slice %14 {offsets = [0, 8], sizes = [8, 40], strides = [1, 1]} : vector<8x512xf32> to vector<8x40xf32>
    %c40_83 = arith.constant 40 : index
    %c80_84 = arith.constant 80 : index
    %104 = vector.load %arg13[%c40_83, %c80_84] : memref<200x320xf32, #tpu.memory_space<vmem>>, vector<8x40xf32>
    tpu.vector_store %arg13[%c40_83, %c80_84], %103 {strides = array<i32>} : memref<200x320xf32, #tpu.memory_space<vmem>>, vector<8x40xf32>,
    %105 = vector.extract_strided_slice %14 {offsets = [0, 264], sizes = [8, 40], strides = [1, 1]} : vector<8x512xf32> to vector<8x40xf32>
    %c40_85 = arith.constant 40 : index
    %c240_86 = arith.constant 240 : index
    %106 = vector.load %arg13[%c40_85, %c240_86] : memref<200x320xf32, #tpu.memory_space<vmem>>, vector<8x40xf32>
    tpu.vector_store %arg13[%c40_85, %c240_86], %105 {strides = array<i32>} : memref<200x320xf32, #tpu.memory_space<vmem>>, vector<8x40xf32>,
    %107 = vector.extract_strided_slice %14 {offsets = [0, 72], sizes = [8, 40], strides = [1, 1]} : vector<8x512xf32> to vector<8x40xf32>
    %c40_87 = arith.constant 40 : index
    %c120_88 = arith.constant 120 : index
    %108 = vector.load %arg13[%c40_87, %c120_88] : memref<200x320xf32, #tpu.memory_space<vmem>>, vector<8x40xf32>
    tpu.vector_store %arg13[%c40_87, %c120_88], %107 {strides = array<i32>} : memref<200x320xf32, #tpu.memory_space<vmem>>, vector<8x40xf32>,
    %109 = vector.extract_strided_slice %14 {offsets = [0, 328], sizes = [8, 40], strides = [1, 1]} : vector<8x512xf32> to vector<8x40xf32>
    %c40_89 = arith.constant 40 : index
    %c280_90 = arith.constant 280 : index
    %110 = vector.load %arg13[%c40_89, %c280_90] : memref<200x320xf32, #tpu.memory_space<vmem>>, vector<8x40xf32>
    tpu.vector_store %arg13[%c40_89, %c280_90], %109 {strides = array<i32>} : memref<200x320xf32, #tpu.memory_space<vmem>>, vector<8x40xf32>,
    %111 = vector.extract_strided_slice %14 {offsets = [0, 192], sizes = [8, 40], strides = [1, 1]} : vector<8x512xf32> to vector<8x40xf32>
    %c48 = arith.constant 48 : index
    %c0_91 = arith.constant 0 : index
    %112 = vector.load %arg13[%c48, %c0_91] : memref<200x320xf32, #tpu.memory_space<vmem>>, vector<8x40xf32>
    tpu.vector_store %arg13[%c48, %c0_91], %111 {strides = array<i32>} : memref<200x320xf32, #tpu.memory_space<vmem>>, vector<8x40xf32>,
    %113 = vector.extract_strided_slice %14 {offsets = [0, 448], sizes = [8, 40], strides = [1, 1]} : vector<8x512xf32> to vector<8x40xf32>
    %c48_92 = arith.constant 48 : index
    %c160_93 = arith.constant 160 : index
    %114 = vector.load %arg13[%c48_92, %c160_93] : memref<200x320xf32, #tpu.memory_space<vmem>>, vector<8x40xf32>
    tpu.vector_store %arg13[%c48_92, %c160_93], %113 {strides = array<i32>} : memref<200x320xf32, #tpu.memory_space<vmem>>, vector<8x40xf32>,
    %115 = vector.extract_strided_slice %14 {offsets = [0, 129], sizes = [8, 40], strides = [1, 1]} : vector<8x512xf32> to vector<8x40xf32>
    %c48_94 = arith.constant 48 : index
    %c40_95 = arith.constant 40 : index
    %116 = vector.load %arg13[%c48_94, %c40_95] : memref<200x320xf32, #tpu.memory_space<vmem>>, vector<8x40xf32>
    tpu.vector_store %arg13[%c48_94, %c40_95], %115 {strides = array<i32>} : memref<200x320xf32, #tpu.memory_space<vmem>>, vector<8x40xf32>,
    %117 = vector.extract_strided_slice %14 {offsets = [0, 385], sizes = [8, 40], strides = [1, 1]} : vector<8x512xf32> to vector<8x40xf32>
    %c48_96 = arith.constant 48 : index
    %c200_97 = arith.constant 200 : index
    %118 = vector.load %arg13[%c48_96, %c200_97] : memref<200x320xf32, #tpu.memory_space<vmem>>, vector<8x40xf32>
    tpu.vector_store %arg13[%c48_96, %c200_97], %117 {strides = array<i32>} : memref<200x320xf32, #tpu.memory_space<vmem>>, vector<8x40xf32>,
    %119 = vector.extract_strided_slice %14 {offsets = [0, 72], sizes = [8, 40], strides = [1, 1]} : vector<8x512xf32> to vector<8x40xf32>
    %c48_98 = arith.constant 48 : index
    %c80_99 = arith.constant 80 : index
    %120 = vector.load %arg13[%c48_98, %c80_99] : memref<200x320xf32, #tpu.memory_space<vmem>>, vector<8x40xf32>
    tpu.vector_store %arg13[%c48_98, %c80_99], %119 {strides = array<i32>} : memref<200x320xf32, #tpu.memory_space<vmem>>, vector<8x40xf32>,
    %121 = vector.extract_strided_slice %14 {offsets = [0, 328], sizes = [8, 40], strides = [1, 1]} : vector<8x512xf32> to vector<8x40xf32>
    %c48_100 = arith.constant 48 : index
    %c240_101 = arith.constant 240 : index
    %122 = vector.load %arg13[%c48_100, %c240_101] : memref<200x320xf32, #tpu.memory_space<vmem>>, vector<8x40xf32>
    tpu.vector_store %arg13[%c48_100, %c240_101], %121 {strides = array<i32>} : memref<200x320xf32, #tpu.memory_space<vmem>>, vector<8x40xf32>,
    %123 = vector.extract_strided_slice %14 {offsets = [0, 9], sizes = [8, 40], strides = [1, 1]} : vector<8x512xf32> to vector<8x40xf32>
    %c48_102 = arith.constant 48 : index
    %c120_103 = arith.constant 120 : index
    %124 = vector.load %arg13[%c48_102, %c120_103] : memref<200x320xf32, #tpu.memory_space<vmem>>, vector<8x40xf32>
    tpu.vector_store %arg13[%c48_102, %c120_103], %123 {strides = array<i32>} : memref<200x320xf32, #tpu.memory_space<vmem>>, vector<8x40xf32>,
    %125 = vector.extract_strided_slice %14 {offsets = [0, 265], sizes = [8, 40], strides = [1, 1]} : vector<8x512xf32> to vector<8x40xf32>
    %c48_104 = arith.constant 48 : index
    %c280_105 = arith.constant 280 : index
    %126 = vector.load %arg13[%c48_104, %c280_105] : memref<200x320xf32, #tpu.memory_space<vmem>>, vector<8x40xf32>
    tpu.vector_store %arg13[%c48_104, %c280_105], %125 {strides = array<i32>} : memref<200x320xf32, #tpu.memory_space<vmem>>, vector<8x40xf32>,
    %127 = vector.extract_strided_slice %14 {offsets = [0, 129], sizes = [8, 40], strides = [1, 1]} : vector<8x512xf32> to vector<8x40xf32>
    %c56 = arith.constant 56 : index
    %c0_106 = arith.constant 0 : index
    %128 = vector.load %arg13[%c56, %c0_106] : memref<200x320xf32, #tpu.memory_space<vmem>>, vector<8x40xf32>
    tpu.vector_store %arg13[%c56, %c0_106], %127 {strides = array<i32>} : memref<200x320xf32, #tpu.memory_space<vmem>>, vector<8x40xf32>,
    %129 = vector.extract_strided_slice %14 {offsets = [0, 385], sizes = [8, 40], strides = [1, 1]} : vector<8x512xf32> to vector<8x40xf32>
    %c56_107 = arith.constant 56 : index
    %c160_108 = arith.constant 160 : index
    %130 = vector.load %arg13[%c56_107, %c160_108] : memref<200x320xf32, #tpu.memory_space<vmem>>, vector<8x40xf32>
    tpu.vector_store %arg13[%c56_107, %c160_108], %129 {strides = array<i32>} : memref<200x320xf32, #tpu.memory_space<vmem>>, vector<8x40xf32>,
    %131 = vector.extract_strided_slice %14 {offsets = [0, 193], sizes = [8, 40], strides = [1, 1]} : vector<8x512xf32> to vector<8x40xf32>
    %c56_109 = arith.constant 56 : index
    %c40_110 = arith.constant 40 : index
    %132 = vector.load %arg13[%c56_109, %c40_110] : memref<200x320xf32, #tpu.memory_space<vmem>>, vector<8x40xf32>
    tpu.vector_store %arg13[%c56_109, %c40_110], %131 {strides = array<i32>} : memref<200x320xf32, #tpu.memory_space<vmem>>, vector<8x40xf32>,
    %133 = vector.extract_strided_slice %14 {offsets = [0, 449], sizes = [8, 40], strides = [1, 1]} : vector<8x512xf32> to vector<8x40xf32>
    %c56_111 = arith.constant 56 : index
    %c200_112 = arith.constant 200 : index
    %134 = vector.load %arg13[%c56_111, %c200_112] : memref<200x320xf32, #tpu.memory_space<vmem>>, vector<8x40xf32>
    tpu.vector_store %arg13[%c56_111, %c200_112], %133 {strides = array<i32>} : memref<200x320xf32, #tpu.memory_space<vmem>>, vector<8x40xf32>,
    %135 = vector.extract_strided_slice %14 {offsets = [0, 9], sizes = [8, 40], strides = [1, 1]} : vector<8x512xf32> to vector<8x40xf32>
    %c56_113 = arith.constant 56 : index
    %c80_114 = arith.constant 80 : index
    %136 = vector.load %arg13[%c56_113, %c80_114] : memref<200x320xf32, #tpu.memory_space<vmem>>, vector<8x40xf32>
    tpu.vector_store %arg13[%c56_113, %c80_114], %135 {strides = array<i32>} : memref<200x320xf32, #tpu.memory_space<vmem>>, vector<8x40xf32>,
    %137 = vector.extract_strided_slice %14 {offsets = [0, 265], sizes = [8, 40], strides = [1, 1]} : vector<8x512xf32> to vector<8x40xf32>
    %c56_115 = arith.constant 56 : index
    %c240_116 = arith.constant 240 : index
    %138 = vector.load %arg13[%c56_115, %c240_116] : memref<200x320xf32, #tpu.memory_space<vmem>>, vector<8x40xf32>
    tpu.vector_store %arg13[%c56_115, %c240_116], %137 {strides = array<i32>} : memref<200x320xf32, #tpu.memory_space<vmem>>, vector<8x40xf32>,
    %139 = vector.extract_strided_slice %14 {offsets = [0, 73], sizes = [8, 40], strides = [1, 1]} : vector<8x512xf32> to vector<8x40xf32>
    %c56_117 = arith.constant 56 : index
    %c120_118 = arith.constant 120 : index
    %140 = vector.load %arg13[%c56_117, %c120_118] : memref<200x320xf32, #tpu.memory_space<vmem>>, vector<8x40xf32>
    tpu.vector_store %arg13[%c56_117, %c120_118], %139 {strides = array<i32>} : memref<200x320xf32, #tpu.memory_space<vmem>>, vector<8x40xf32>,
    %141 = vector.extract_strided_slice %14 {offsets = [0, 329], sizes = [8, 40], strides = [1, 1]} : vector<8x512xf32> to vector<8x40xf32>
    %c56_119 = arith.constant 56 : index
    %c280_120 = arith.constant 280 : index
    %142 = vector.load %arg13[%c56_119, %c280_120] : memref<200x320xf32, #tpu.memory_space<vmem>>, vector<8x40xf32>
    tpu.vector_store %arg13[%c56_119, %c280_120], %141 {strides = array<i32>} : memref<200x320xf32, #tpu.memory_space<vmem>>, vector<8x40xf32>,
    %143 = vector.extract_strided_slice %14 {offsets = [0, 193], sizes = [8, 40], strides = [1, 1]} : vector<8x512xf32> to vector<8x40xf32>
    %c64 = arith.constant 64 : index
    %c0_121 = arith.constant 0 : index
    %144 = vector.load %arg13[%c64, %c0_121] : memref<200x320xf32, #tpu.memory_space<vmem>>, vector<8x40xf32>
    tpu.vector_store %arg13[%c64, %c0_121], %143 {strides = array<i32>} : memref<200x320xf32, #tpu.memory_space<vmem>>, vector<8x40xf32>,
    %145 = vector.extract_strided_slice %14 {offsets = [0, 449], sizes = [8, 40], strides = [1, 1]} : vector<8x512xf32> to vector<8x40xf32>
    %c64_122 = arith.constant 64 : index
    %c160_123 = arith.constant 160 : index
    %146 = vector.load %arg13[%c64_122, %c160_123] : memref<200x320xf32, #tpu.memory_space<vmem>>, vector<8x40xf32>
    tpu.vector_store %arg13[%c64_122, %c160_123], %145 {strides = array<i32>} : memref<200x320xf32, #tpu.memory_space<vmem>>, vector<8x40xf32>,
    %147 = vector.extract_strided_slice %14 {offsets = [0, 130], sizes = [8, 40], strides = [1, 1]} : vector<8x512xf32> to vector<8x40xf32>
    %c64_124 = arith.constant 64 : index
    %c40_125 = arith.constant 40 : index
    %148 = vector.load %arg13[%c64_124, %c40_125] : memref<200x320xf32, #tpu.memory_space<vmem>>, vector<8x40xf32>
    tpu.vector_store %arg13[%c64_124, %c40_125], %147 {strides = array<i32>} : memref<200x320xf32, #tpu.memory_space<vmem>>, vector<8x40xf32>,
    %149 = vector.extract_strided_slice %14 {offsets = [0, 386], sizes = [8, 40], strides = [1, 1]} : vector<8x512xf32> to vector<8x40xf32>
    %c64_126 = arith.constant 64 : index
    %c200_127 = arith.constant 200 : index
    %150 = vector.load %arg13[%c64_126, %c200_127] : memref<200x320xf32, #tpu.memory_space<vmem>>, vector<8x40xf32>
    tpu.vector_store %arg13[%c64_126, %c200_127], %149 {strides = array<i32>} : memref<200x320xf32, #tpu.memory_space<vmem>>, vector<8x40xf32>,
    %151 = vector.extract_strided_slice %14 {offsets = [0, 73], sizes = [8, 40], strides = [1, 1]} : vector<8x512xf32> to vector<8x40xf32>
    %c64_128 = arith.constant 64 : index
    %c80_129 = arith.constant 80 : index
    %152 = vector.load %arg13[%c64_128, %c80_129] : memref<200x320xf32, #tpu.memory_space<vmem>>, vector<8x40xf32>
    tpu.vector_store %arg13[%c64_128, %c80_129], %151 {strides = array<i32>} : memref<200x320xf32, #tpu.memory_space<vmem>>, vector<8x40xf32>,
    %153 = vector.extract_strided_slice %14 {offsets = [0, 329], sizes = [8, 40], strides = [1, 1]} : vector<8x512xf32> to vector<8x40xf32>
    %c64_130 = arith.constant 64 : index
    %c240_131 = arith.constant 240 : index
    %154 = vector.load %arg13[%c64_130, %c240_131] : memref<200x320xf32, #tpu.memory_space<vmem>>, vector<8x40xf32>
    tpu.vector_store %arg13[%c64_130, %c240_131], %153 {strides = array<i32>} : memref<200x320xf32, #tpu.memory_space<vmem>>, vector<8x40xf32>,
    %155 = vector.extract_strided_slice %14 {offsets = [0, 10], sizes = [8, 40], strides = [1, 1]} : vector<8x512xf32> to vector<8x40xf32>
    %c64_132 = arith.constant 64 : index
    %c120_133 = arith.constant 120 : index
    %156 = vector.load %arg13[%c64_132, %c120_133] : memref<200x320xf32, #tpu.memory_space<vmem>>, vector<8x40xf32>
    tpu.vector_store %arg13[%c64_132, %c120_133], %155 {strides = array<i32>} : memref<200x320xf32, #tpu.memory_space<vmem>>, vector<8x40xf32>,
    %157 = vector.extract_strided_slice %14 {offsets = [0, 266], sizes = [8, 40], strides = [1, 1]} : vector<8x512xf32> to vector<8x40xf32>
    %c64_134 = arith.constant 64 : index
    %c280_135 = arith.constant 280 : index
    %158 = vector.load %arg13[%c64_134, %c280_135] : memref<200x320xf32, #tpu.memory_space<vmem>>, vector<8x40xf32>
    tpu.vector_store %arg13[%c64_134, %c280_135], %157 {strides = array<i32>} : memref<200x320xf32, #tpu.memory_space<vmem>>, vector<8x40xf32>,
    %159 = vector.extract_strided_slice %14 {offsets = [0, 130], sizes = [8, 40], strides = [1, 1]} : vector<8x512xf32> to vector<8x40xf32>
    %c72 = arith.constant 72 : index
    %c0_136 = arith.constant 0 : index
    %160 = vector.load %arg13[%c72, %c0_136] : memref<200x320xf32, #tpu.memory_space<vmem>>, vector<8x40xf32>
    tpu.vector_store %arg13[%c72, %c0_136], %159 {strides = array<i32>} : memref<200x320xf32, #tpu.memory_space<vmem>>, vector<8x40xf32>,
    %161 = vector.extract_strided_slice %14 {offsets = [0, 386], sizes = [8, 40], strides = [1, 1]} : vector<8x512xf32> to vector<8x40xf32>
    %c72_137 = arith.constant 72 : index
    %c160_138 = arith.constant 160 : index
    %162 = vector.load %arg13[%c72_137, %c160_138] : memref<200x320xf32, #tpu.memory_space<vmem>>, vector<8x40xf32>
    tpu.vector_store %arg13[%c72_137, %c160_138], %161 {strides = array<i32>} : memref<200x320xf32, #tpu.memory_space<vmem>>, vector<8x40xf32>,
    %163 = vector.extract_strided_slice %14 {offsets = [0, 194], sizes = [8, 40], strides = [1, 1]} : vector<8x512xf32> to vector<8x40xf32>
    %c72_139 = arith.constant 72 : index
    %c40_140 = arith.constant 40 : index
    %164 = vector.load %arg13[%c72_139, %c40_140] : memref<200x320xf32, #tpu.memory_space<vmem>>, vector<8x40xf32>
    tpu.vector_store %arg13[%c72_139, %c40_140], %163 {strides = array<i32>} : memref<200x320xf32, #tpu.memory_space<vmem>>, vector<8x40xf32>,
    %165 = vector.extract_strided_slice %14 {offsets = [0, 450], sizes = [8, 40], strides = [1, 1]} : vector<8x512xf32> to vector<8x40xf32>
    %c72_141 = arith.constant 72 : index
    %c200_142 = arith.constant 200 : index
    %166 = vector.load %arg13[%c72_141, %c200_142] : memref<200x320xf32, #tpu.memory_space<vmem>>, vector<8x40xf32>
    tpu.vector_store %arg13[%c72_141, %c200_142], %165 {strides = array<i32>} : memref<200x320xf32, #tpu.memory_space<vmem>>, vector<8x40xf32>,
    %167 = vector.extract_strided_slice %14 {offsets = [0, 10], sizes = [8, 40], strides = [1, 1]} : vector<8x512xf32> to vector<8x40xf32>
    %c72_143 = arith.constant 72 : index
    %c80_144 = arith.constant 80 : index
    %168 = vector.load %arg13[%c72_143, %c80_144] : memref<200x320xf32, #tpu.memory_space<vmem>>, vector<8x40xf32>
    tpu.vector_store %arg13[%c72_143, %c80_144], %167 {strides = array<i32>} : memref<200x320xf32, #tpu.memory_space<vmem>>, vector<8x40xf32>,
    %169 = vector.extract_strided_slice %14 {offsets = [0, 266], sizes = [8, 40], strides = [1, 1]} : vector<8x512xf32> to vector<8x40xf32>
    %c72_145 = arith.constant 72 : index
    %c240_146 = arith.constant 240 : index
    %170 = vector.load %arg13[%c72_145, %c240_146] : memref<200x320xf32, #tpu.memory_space<vmem>>, vector<8x40xf32>
    tpu.vector_store %arg13[%c72_145, %c240_146], %169 {strides = array<i32>} : memref<200x320xf32, #tpu.memory_space<vmem>>, vector<8x40xf32>,
    %171 = vector.extract_strided_slice %14 {offsets = [0, 74], sizes = [8, 40], strides = [1, 1]} : vector<8x512xf32> to vector<8x40xf32>
    %c72_147 = arith.constant 72 : index
    %c120_148 = arith.constant 120 : index
    %172 = vector.load %arg13[%c72_147, %c120_148] : memref<200x320xf32, #tpu.memory_space<vmem>>, vector<8x40xf32>
    tpu.vector_store %arg13[%c72_147, %c120_148], %171 {strides = array<i32>} : memref<200x320xf32, #tpu.memory_space<vmem>>, vector<8x40xf32>,
    %173 = vector.extract_strided_slice %14 {offsets = [0, 330], sizes = [8, 40], strides = [1, 1]} : vector<8x512xf32> to vector<8x40xf32>
    %c72_149 = arith.constant 72 : index
    %c280_150 = arith.constant 280 : index
    %174 = vector.load %arg13[%c72_149, %c280_150] : memref<200x320xf32, #tpu.memory_space<vmem>>, vector<8x40xf32>
    tpu.vector_store %arg13[%c72_149, %c280_150], %173 {strides = array<i32>} : memref<200x320xf32, #tpu.memory_space<vmem>>, vector<8x40xf32>,
    %175 = vector.extract_strided_slice %14 {offsets = [0, 8], sizes = [8, 40], strides = [1, 1]} : vector<8x512xf32> to vector<8x40xf32>
    %c80_151 = arith.constant 80 : index
    %c0_152 = arith.constant 0 : index
    %176 = vector.load %arg13[%c80_151, %c0_152] : memref<200x320xf32, #tpu.memory_space<vmem>>, vector<8x40xf32>
    tpu.vector_store %arg13[%c80_151, %c0_152], %175 {strides = array<i32>} : memref<200x320xf32, #tpu.memory_space<vmem>>, vector<8x40xf32>,
    %177 = vector.extract_strided_slice %14 {offsets = [0, 264], sizes = [8, 40], strides = [1, 1]} : vector<8x512xf32> to vector<8x40xf32>
    %c80_153 = arith.constant 80 : index
    %c160_154 = arith.constant 160 : index
    %178 = vector.load %arg13[%c80_153, %c160_154] : memref<200x320xf32, #tpu.memory_space<vmem>>, vector<8x40xf32>
    tpu.vector_store %arg13[%c80_153, %c160_154], %177 {strides = array<i32>} : memref<200x320xf32, #tpu.memory_space<vmem>>, vector<8x40xf32>,
    %179 = vector.extract_strided_slice %14 {offsets = [0, 72], sizes = [8, 40], strides = [1, 1]} : vector<8x512xf32> to vector<8x40xf32>
    %c80_155 = arith.constant 80 : index
    %c40_156 = arith.constant 40 : index
    %180 = vector.load %arg13[%c80_155, %c40_156] : memref<200x320xf32, #tpu.memory_space<vmem>>, vector<8x40xf32>
    tpu.vector_store %arg13[%c80_155, %c40_156], %179 {strides = array<i32>} : memref<200x320xf32, #tpu.memory_space<vmem>>, vector<8x40xf32>,
    %181 = vector.extract_strided_slice %14 {offsets = [0, 328], sizes = [8, 40], strides = [1, 1]} : vector<8x512xf32> to vector<8x40xf32>
    %c80_157 = arith.constant 80 : index
    %c200_158 = arith.constant 200 : index
    %182 = vector.load %arg13[%c80_157, %c200_158] : memref<200x320xf32, #tpu.memory_space<vmem>>, vector<8x40xf32>
    tpu.vector_store %arg13[%c80_157, %c200_158], %181 {strides = array<i32>} : memref<200x320xf32, #tpu.memory_space<vmem>>, vector<8x40xf32>,
    %183 = vector.extract_strided_slice %14 {offsets = [0, 136], sizes = [8, 40], strides = [1, 1]} : vector<8x512xf32> to vector<8x40xf32>
    %c80_159 = arith.constant 80 : index
    %c80_160 = arith.constant 80 : index
    %184 = vector.load %arg13[%c80_159, %c80_160] : memref<200x320xf32, #tpu.memory_space<vmem>>, vector<8x40xf32>
    tpu.vector_store %arg13[%c80_159, %c80_160], %183 {strides = array<i32>} : memref<200x320xf32, #tpu.memory_space<vmem>>, vector<8x40xf32>,
    %185 = vector.extract_strided_slice %14 {offsets = [0, 392], sizes = [8, 40], strides = [1, 1]} : vector<8x512xf32> to vector<8x40xf32>
    %c80_161 = arith.constant 80 : index
    %c240_162 = arith.constant 240 : index
    %186 = vector.load %arg13[%c80_161, %c240_162] : memref<200x320xf32, #tpu.memory_space<vmem>>, vector<8x40xf32>
    tpu.vector_store %arg13[%c80_161, %c240_162], %185 {strides = array<i32>} : memref<200x320xf32, #tpu.memory_space<vmem>>, vector<8x40xf32>,
    %187 = vector.extract_strided_slice %14 {offsets = [0, 200], sizes = [8, 40], strides = [1, 1]} : vector<8x512xf32> to vector<8x40xf32>
    %c80_163 = arith.constant 80 : index
    %c120_164 = arith.constant 120 : index
    %188 = vector.load %arg13[%c80_163, %c120_164] : memref<200x320xf32, #tpu.memory_space<vmem>>, vector<8x40xf32>
    tpu.vector_store %arg13[%c80_163, %c120_164], %187 {strides = array<i32>} : memref<200x320xf32, #tpu.memory_space<vmem>>, vector<8x40xf32>,
    %189 = vector.extract_strided_slice %14 {offsets = [0, 456], sizes = [8, 40], strides = [1, 1]} : vector<8x512xf32> to vector<8x40xf32>
    %c80_165 = arith.constant 80 : index
    %c280_166 = arith.constant 280 : index
    %190 = vector.load %arg13[%c80_165, %c280_166] : memref<200x320xf32, #tpu.memory_space<vmem>>, vector<8x40xf32>
    tpu.vector_store %arg13[%c80_165, %c280_166], %189 {strides = array<i32>} : memref<200x320xf32, #tpu.memory_space<vmem>>, vector<8x40xf32>,
    %191 = vector.extract_strided_slice %14 {offsets = [0, 72], sizes = [8, 40], strides = [1, 1]} : vector<8x512xf32> to vector<8x40xf32>
    %c88 = arith.constant 88 : index
    %c0_167 = arith.constant 0 : index
    %192 = vector.load %arg13[%c88, %c0_167] : memref<200x320xf32, #tpu.memory_space<vmem>>, vector<8x40xf32>
    tpu.vector_store %arg13[%c88, %c0_167], %191 {strides = array<i32>} : memref<200x320xf32, #tpu.memory_space<vmem>>, vector<8x40xf32>,
    %193 = vector.extract_strided_slice %14 {offsets = [0, 328], sizes = [8, 40], strides = [1, 1]} : vector<8x512xf32> to vector<8x40xf32>
    %c88_168 = arith.constant 88 : index
    %c160_169 = arith.constant 160 : index
    %194 = vector.load %arg13[%c88_168, %c160_169] : memref<200x320xf32, #tpu.memory_space<vmem>>, vector<8x40xf32>
    tpu.vector_store %arg13[%c88_168, %c160_169], %193 {strides = array<i32>} : memref<200x320xf32, #tpu.memory_space<vmem>>, vector<8x40xf32>,
    %195 = vector.extract_strided_slice %14 {offsets = [0, 9], sizes = [8, 40], strides = [1, 1]} : vector<8x512xf32> to vector<8x40xf32>
    %c88_170 = arith.constant 88 : index
    %c40_171 = arith.constant 40 : index
    %196 = vector.load %arg13[%c88_170, %c40_171] : memref<200x320xf32, #tpu.memory_space<vmem>>, vector<8x40xf32>
    tpu.vector_store %arg13[%c88_170, %c40_171], %195 {strides = array<i32>} : memref<200x320xf32, #tpu.memory_space<vmem>>, vector<8x40xf32>,
    %197 = vector.extract_strided_slice %14 {offsets = [0, 265], sizes = [8, 40], strides = [1, 1]} : vector<8x512xf32> to vector<8x40xf32>
    %c88_172 = arith.constant 88 : index
    %c200_173 = arith.constant 200 : index
    %198 = vector.load %arg13[%c88_172, %c200_173] : memref<200x320xf32, #tpu.memory_space<vmem>>, vector<8x40xf32>
    tpu.vector_store %arg13[%c88_172, %c200_173], %197 {strides = array<i32>} : memref<200x320xf32, #tpu.memory_space<vmem>>, vector<8x40xf32>,
    %199 = vector.extract_strided_slice %14 {offsets = [0, 200], sizes = [8, 40], strides = [1, 1]} : vector<8x512xf32> to vector<8x40xf32>
    %c88_174 = arith.constant 88 : index
    %c80_175 = arith.constant 80 : index
    %200 = vector.load %arg13[%c88_174, %c80_175] : memref<200x320xf32, #tpu.memory_space<vmem>>, vector<8x40xf32>
    tpu.vector_store %arg13[%c88_174, %c80_175], %199 {strides = array<i32>} : memref<200x320xf32, #tpu.memory_space<vmem>>, vector<8x40xf32>,
    %201 = vector.extract_strided_slice %14 {offsets = [0, 456], sizes = [8, 40], strides = [1, 1]} : vector<8x512xf32> to vector<8x40xf32>
    %c88_176 = arith.constant 88 : index
    %c240_177 = arith.constant 240 : index
    %202 = vector.load %arg13[%c88_176, %c240_177] : memref<200x320xf32, #tpu.memory_space<vmem>>, vector<8x40xf32>
    tpu.vector_store %arg13[%c88_176, %c240_177], %201 {strides = array<i32>} : memref<200x320xf32, #tpu.memory_space<vmem>>, vector<8x40xf32>,
    %203 = vector.extract_strided_slice %14 {offsets = [0, 137], sizes = [8, 40], strides = [1, 1]} : vector<8x512xf32> to vector<8x40xf32>
    %c88_178 = arith.constant 88 : index
    %c120_179 = arith.constant 120 : index
    %204 = vector.load %arg13[%c88_178, %c120_179] : memref<200x320xf32, #tpu.memory_space<vmem>>, vector<8x40xf32>
    tpu.vector_store %arg13[%c88_178, %c120_179], %203 {strides = array<i32>} : memref<200x320xf32, #tpu.memory_space<vmem>>, vector<8x40xf32>,
    %205 = vector.extract_strided_slice %14 {offsets = [0, 393], sizes = [8, 40], strides = [1, 1]} : vector<8x512xf32> to vector<8x40xf32>
    %c88_180 = arith.constant 88 : index
    %c280_181 = arith.constant 280 : index
    %206 = vector.load %arg13[%c88_180, %c280_181] : memref<200x320xf32, #tpu.memory_space<vmem>>, vector<8x40xf32>
    tpu.vector_store %arg13[%c88_180, %c280_181], %205 {strides = array<i32>} : memref<200x320xf32, #tpu.memory_space<vmem>>, vector<8x40xf32>,
    %207 = vector.extract_strided_slice %14 {offsets = [0, 9], sizes = [8, 40], strides = [1, 1]} : vector<8x512xf32> to vector<8x40xf32>
    %c96 = arith.constant 96 : index
    %c0_182 = arith.constant 0 : index
    %208 = vector.load %arg13[%c96, %c0_182] : memref<200x320xf32, #tpu.memory_space<vmem>>, vector<8x40xf32>
    tpu.vector_store %arg13[%c96, %c0_182], %207 {strides = array<i32>} : memref<200x320xf32, #tpu.memory_space<vmem>>, vector<8x40xf32>,
    %209 = vector.extract_strided_slice %14 {offsets = [0, 265], sizes = [8, 40], strides = [1, 1]} : vector<8x512xf32> to vector<8x40xf32>
    %c96_183 = arith.constant 96 : index
    %c160_184 = arith.constant 160 : index
    %210 = vector.load %arg13[%c96_183, %c160_184] : memref<200x320xf32, #tpu.memory_space<vmem>>, vector<8x40xf32>
    tpu.vector_store %arg13[%c96_183, %c160_184], %209 {strides = array<i32>} : memref<200x320xf32, #tpu.memory_space<vmem>>, vector<8x40xf32>,
    %211 = vector.extract_strided_slice %14 {offsets = [0, 73], sizes = [8, 40], strides = [1, 1]} : vector<8x512xf32> to vector<8x40xf32>
    %c96_185 = arith.constant 96 : index
    %c40_186 = arith.constant 40 : index
    %212 = vector.load %arg13[%c96_185, %c40_186] : memref<200x320xf32, #tpu.memory_space<vmem>>, vector<8x40xf32>
    tpu.vector_store %arg13[%c96_185, %c40_186], %211 {strides = array<i32>} : memref<200x320xf32, #tpu.memory_space<vmem>>, vector<8x40xf32>,
    %213 = vector.extract_strided_slice %14 {offsets = [0, 329], sizes = [8, 40], strides = [1, 1]} : vector<8x512xf32> to vector<8x40xf32>
    %c96_187 = arith.constant 96 : index
    %c200_188 = arith.constant 200 : index
    %214 = vector.load %arg13[%c96_187, %c200_188] : memref<200x320xf32, #tpu.memory_space<vmem>>, vector<8x40xf32>
    tpu.vector_store %arg13[%c96_187, %c200_188], %213 {strides = array<i32>} : memref<200x320xf32, #tpu.memory_space<vmem>>, vector<8x40xf32>,
    %215 = vector.extract_strided_slice %14 {offsets = [0, 137], sizes = [8, 40], strides = [1, 1]} : vector<8x512xf32> to vector<8x40xf32>
    %c96_189 = arith.constant 96 : index
    %c80_190 = arith.constant 80 : index
    %216 = vector.load %arg13[%c96_189, %c80_190] : memref<200x320xf32, #tpu.memory_space<vmem>>, vector<8x40xf32>
    tpu.vector_store %arg13[%c96_189, %c80_190], %215 {strides = array<i32>} : memref<200x320xf32, #tpu.memory_space<vmem>>, vector<8x40xf32>,
    %217 = vector.extract_strided_slice %14 {offsets = [0, 393], sizes = [8, 40], strides = [1, 1]} : vector<8x512xf32> to vector<8x40xf32>
    %c96_191 = arith.constant 96 : index
    %c240_192 = arith.constant 240 : index
    %218 = vector.load %arg13[%c96_191, %c240_192] : memref<200x320xf32, #tpu.memory_space<vmem>>, vector<8x40xf32>
    tpu.vector_store %arg13[%c96_191, %c240_192], %217 {strides = array<i32>} : memref<200x320xf32, #tpu.memory_space<vmem>>, vector<8x40xf32>,
    %219 = vector.extract_strided_slice %14 {offsets = [0, 201], sizes = [8, 40], strides = [1, 1]} : vector<8x512xf32> to vector<8x40xf32>
    %c96_193 = arith.constant 96 : index
    %c120_194 = arith.constant 120 : index
    %220 = vector.load %arg13[%c96_193, %c120_194] : memref<200x320xf32, #tpu.memory_space<vmem>>, vector<8x40xf32>
    tpu.vector_store %arg13[%c96_193, %c120_194], %219 {strides = array<i32>} : memref<200x320xf32, #tpu.memory_space<vmem>>, vector<8x40xf32>,
    %221 = vector.extract_strided_slice %14 {offsets = [0, 457], sizes = [8, 40], strides = [1, 1]} : vector<8x512xf32> to vector<8x40xf32>
    %c96_195 = arith.constant 96 : index
    %c280_196 = arith.constant 280 : index
    %222 = vector.load %arg13[%c96_195, %c280_196] : memref<200x320xf32, #tpu.memory_space<vmem>>, vector<8x40xf32>
    tpu.vector_store %arg13[%c96_195, %c280_196], %221 {strides = array<i32>} : memref<200x320xf32, #tpu.memory_space<vmem>>, vector<8x40xf32>,
    %223 = vector.extract_strided_slice %14 {offsets = [0, 73], sizes = [8, 40], strides = [1, 1]} : vector<8x512xf32> to vector<8x40xf32>
    %c104 = arith.constant 104 : index
    %c0_197 = arith.constant 0 : index
    %224 = vector.load %arg13[%c104, %c0_197] : memref<200x320xf32, #tpu.memory_space<vmem>>, vector<8x40xf32>
    tpu.vector_store %arg13[%c104, %c0_197], %223 {strides = array<i32>} : memref<200x320xf32, #tpu.memory_space<vmem>>, vector<8x40xf32>,
    %225 = vector.extract_strided_slice %14 {offsets = [0, 329], sizes = [8, 40], strides = [1, 1]} : vector<8x512xf32> to vector<8x40xf32>
    %c104_198 = arith.constant 104 : index
    %c160_199 = arith.constant 160 : index
    %226 = vector.load %arg13[%c104_198, %c160_199] : memref<200x320xf32, #tpu.memory_space<vmem>>, vector<8x40xf32>
    tpu.vector_store %arg13[%c104_198, %c160_199], %225 {strides = array<i32>} : memref<200x320xf32, #tpu.memory_space<vmem>>, vector<8x40xf32>,
    %227 = vector.extract_strided_slice %14 {offsets = [0, 10], sizes = [8, 40], strides = [1, 1]} : vector<8x512xf32> to vector<8x40xf32>
    %c104_200 = arith.constant 104 : index
    %c40_201 = arith.constant 40 : index
    %228 = vector.load %arg13[%c104_200, %c40_201] : memref<200x320xf32, #tpu.memory_space<vmem>>, vector<8x40xf32>
    tpu.vector_store %arg13[%c104_200, %c40_201], %227 {strides = array<i32>} : memref<200x320xf32, #tpu.memory_space<vmem>>, vector<8x40xf32>,
    %229 = vector.extract_strided_slice %14 {offsets = [0, 266], sizes = [8, 40], strides = [1, 1]} : vector<8x512xf32> to vector<8x40xf32>
    %c104_202 = arith.constant 104 : index
    %c200_203 = arith.constant 200 : index
    %230 = vector.load %arg13[%c104_202, %c200_203] : memref<200x320xf32, #tpu.memory_space<vmem>>, vector<8x40xf32>
    tpu.vector_store %arg13[%c104_202, %c200_203], %229 {strides = array<i32>} : memref<200x320xf32, #tpu.memory_space<vmem>>, vector<8x40xf32>,
    %231 = vector.extract_strided_slice %14 {offsets = [0, 201], sizes = [8, 40], strides = [1, 1]} : vector<8x512xf32> to vector<8x40xf32>
    %c104_204 = arith.constant 104 : index
    %c80_205 = arith.constant 80 : index
    %232 = vector.load %arg13[%c104_204, %c80_205] : memref<200x320xf32, #tpu.memory_space<vmem>>, vector<8x40xf32>
    tpu.vector_store %arg13[%c104_204, %c80_205], %231 {strides = array<i32>} : memref<200x320xf32, #tpu.memory_space<vmem>>, vector<8x40xf32>,
    %233 = vector.extract_strided_slice %14 {offsets = [0, 457], sizes = [8, 40], strides = [1, 1]} : vector<8x512xf32> to vector<8x40xf32>
    %c104_206 = arith.constant 104 : index
    %c240_207 = arith.constant 240 : index
    %234 = vector.load %arg13[%c104_206, %c240_207] : memref<200x320xf32, #tpu.memory_space<vmem>>, vector<8x40xf32>
    tpu.vector_store %arg13[%c104_206, %c240_207], %233 {strides = array<i32>} : memref<200x320xf32, #tpu.memory_space<vmem>>, vector<8x40xf32>,
    %235 = vector.extract_strided_slice %14 {offsets = [0, 138], sizes = [8, 40], strides = [1, 1]} : vector<8x512xf32> to vector<8x40xf32>
    %c104_208 = arith.constant 104 : index
    %c120_209 = arith.constant 120 : index
    %236 = vector.load %arg13[%c104_208, %c120_209] : memref<200x320xf32, #tpu.memory_space<vmem>>, vector<8x40xf32>
    tpu.vector_store %arg13[%c104_208, %c120_209], %235 {strides = array<i32>} : memref<200x320xf32, #tpu.memory_space<vmem>>, vector<8x40xf32>,
    %237 = vector.extract_strided_slice %14 {offsets = [0, 394], sizes = [8, 40], strides = [1, 1]} : vector<8x512xf32> to vector<8x40xf32>
    %c104_210 = arith.constant 104 : index
    %c280_211 = arith.constant 280 : index
    %238 = vector.load %arg13[%c104_210, %c280_211] : memref<200x320xf32, #tpu.memory_space<vmem>>, vector<8x40xf32>
    tpu.vector_store %arg13[%c104_210, %c280_211], %237 {strides = array<i32>} : memref<200x320xf32, #tpu.memory_space<vmem>>, vector<8x40xf32>,
    %239 = vector.extract_strided_slice %14 {offsets = [0, 10], sizes = [8, 40], strides = [1, 1]} : vector<8x512xf32> to vector<8x40xf32>
    %c112 = arith.constant 112 : index
    %c0_212 = arith.constant 0 : index
    %240 = vector.load %arg13[%c112, %c0_212] : memref<200x320xf32, #tpu.memory_space<vmem>>, vector<8x40xf32>
    tpu.vector_store %arg13[%c112, %c0_212], %239 {strides = array<i32>} : memref<200x320xf32, #tpu.memory_space<vmem>>, vector<8x40xf32>,
    %241 = vector.extract_strided_slice %14 {offsets = [0, 266], sizes = [8, 40], strides = [1, 1]} : vector<8x512xf32> to vector<8x40xf32>
    %c112_213 = arith.constant 112 : index
    %c160_214 = arith.constant 160 : index
    %242 = vector.load %arg13[%c112_213, %c160_214] : memref<200x320xf32, #tpu.memory_space<vmem>>, vector<8x40xf32>
    tpu.vector_store %arg13[%c112_213, %c160_214], %241 {strides = array<i32>} : memref<200x320xf32, #tpu.memory_space<vmem>>, vector<8x40xf32>,
    %243 = vector.extract_strided_slice %14 {offsets = [0, 74], sizes = [8, 40], strides = [1, 1]} : vector<8x512xf32> to vector<8x40xf32>
    %c112_215 = arith.constant 112 : index
    %c40_216 = arith.constant 40 : index
    %244 = vector.load %arg13[%c112_215, %c40_216] : memref<200x320xf32, #tpu.memory_space<vmem>>, vector<8x40xf32>
    tpu.vector_store %arg13[%c112_215, %c40_216], %243 {strides = array<i32>} : memref<200x320xf32, #tpu.memory_space<vmem>>, vector<8x40xf32>,
    %245 = vector.extract_strided_slice %14 {offsets = [0, 330], sizes = [8, 40], strides = [1, 1]} : vector<8x512xf32> to vector<8x40xf32>
    %c112_217 = arith.constant 112 : index
    %c200_218 = arith.constant 200 : index
    %246 = vector.load %arg13[%c112_217, %c200_218] : memref<200x320xf32, #tpu.memory_space<vmem>>, vector<8x40xf32>
    tpu.vector_store %arg13[%c112_217, %c200_218], %245 {strides = array<i32>} : memref<200x320xf32, #tpu.memory_space<vmem>>, vector<8x40xf32>,
    %247 = vector.extract_strided_slice %14 {offsets = [0, 138], sizes = [8, 40], strides = [1, 1]} : vector<8x512xf32> to vector<8x40xf32>
    %c112_219 = arith.constant 112 : index
    %c80_220 = arith.constant 80 : index
    %248 = vector.load %arg13[%c112_219, %c80_220] : memref<200x320xf32, #tpu.memory_space<vmem>>, vector<8x40xf32>
    tpu.vector_store %arg13[%c112_219, %c80_220], %247 {strides = array<i32>} : memref<200x320xf32, #tpu.memory_space<vmem>>, vector<8x40xf32>,
    %249 = vector.extract_strided_slice %14 {offsets = [0, 394], sizes = [8, 40], strides = [1, 1]} : vector<8x512xf32> to vector<8x40xf32>
    %c112_221 = arith.constant 112 : index
    %c240_222 = arith.constant 240 : index
    %250 = vector.load %arg13[%c112_221, %c240_222] : memref<200x320xf32, #tpu.memory_space<vmem>>, vector<8x40xf32>
    tpu.vector_store %arg13[%c112_221, %c240_222], %249 {strides = array<i32>} : memref<200x320xf32, #tpu.memory_space<vmem>>, vector<8x40xf32>,
    %251 = vector.extract_strided_slice %14 {offsets = [0, 202], sizes = [8, 40], strides = [1, 1]} : vector<8x512xf32> to vector<8x40xf32>
    %c112_223 = arith.constant 112 : index
    %c120_224 = arith.constant 120 : index
    %252 = vector.load %arg13[%c112_223, %c120_224] : memref<200x320xf32, #tpu.memory_space<vmem>>, vector<8x40xf32>
    tpu.vector_store %arg13[%c112_223, %c120_224], %251 {strides = array<i32>} : memref<200x320xf32, #tpu.memory_space<vmem>>, vector<8x40xf32>,
    %253 = vector.extract_strided_slice %14 {offsets = [0, 458], sizes = [8, 40], strides = [1, 1]} : vector<8x512xf32> to vector<8x40xf32>
    %c112_225 = arith.constant 112 : index
    %c280_226 = arith.constant 280 : index
    %254 = vector.load %arg13[%c112_225, %c280_226] : memref<200x320xf32, #tpu.memory_space<vmem>>, vector<8x40xf32>
    tpu.vector_store %arg13[%c112_225, %c280_226], %253 {strides = array<i32>} : memref<200x320xf32, #tpu.memory_space<vmem>>, vector<8x40xf32>,
    %255 = vector.extract_strided_slice %14 {offsets = [0, 136], sizes = [8, 40], strides = [1, 1]} : vector<8x512xf32> to vector<8x40xf32>
    %c120_227 = arith.constant 120 : index
    %c0_228 = arith.constant 0 : index
    %256 = vector.load %arg13[%c120_227, %c0_228] : memref<200x320xf32, #tpu.memory_space<vmem>>, vector<8x40xf32>
    tpu.vector_store %arg13[%c120_227, %c0_228], %255 {strides = array<i32>} : memref<200x320xf32, #tpu.memory_space<vmem>>, vector<8x40xf32>,
    %257 = vector.extract_strided_slice %14 {offsets = [0, 392], sizes = [8, 40], strides = [1, 1]} : vector<8x512xf32> to vector<8x40xf32>
    %c120_229 = arith.constant 120 : index
    %c160_230 = arith.constant 160 : index
    %258 = vector.load %arg13[%c120_229, %c160_230] : memref<200x320xf32, #tpu.memory_space<vmem>>, vector<8x40xf32>
    tpu.vector_store %arg13[%c120_229, %c160_230], %257 {strides = array<i32>} : memref<200x320xf32, #tpu.memory_space<vmem>>, vector<8x40xf32>,
    %259 = vector.extract_strided_slice %14 {offsets = [0, 200], sizes = [8, 40], strides = [1, 1]} : vector<8x512xf32> to vector<8x40xf32>
    %c120_231 = arith.constant 120 : index
    %c40_232 = arith.constant 40 : index
    %260 = vector.load %arg13[%c120_231, %c40_232] : memref<200x320xf32, #tpu.memory_space<vmem>>, vector<8x40xf32>
    tpu.vector_store %arg13[%c120_231, %c40_232], %259 {strides = array<i32>} : memref<200x320xf32, #tpu.memory_space<vmem>>, vector<8x40xf32>,
    %261 = vector.extract_strided_slice %14 {offsets = [0, 456], sizes = [8, 40], strides = [1, 1]} : vector<8x512xf32> to vector<8x40xf32>
    %c120_233 = arith.constant 120 : index
    %c200_234 = arith.constant 200 : index
    %262 = vector.load %arg13[%c120_233, %c200_234] : memref<200x320xf32, #tpu.memory_space<vmem>>, vector<8x40xf32>
    tpu.vector_store %arg13[%c120_233, %c200_234], %261 {strides = array<i32>} : memref<200x320xf32, #tpu.memory_space<vmem>>, vector<8x40xf32>,
    %263 = vector.extract_strided_slice %14 {offsets = [0, 16], sizes = [8, 40], strides = [1, 1]} : vector<8x512xf32> to vector<8x40xf32>
    %c120_235 = arith.constant 120 : index
    %c80_236 = arith.constant 80 : index
    %264 = vector.load %arg13[%c120_235, %c80_236] : memref<200x320xf32, #tpu.memory_space<vmem>>, vector<8x40xf32>
    tpu.vector_store %arg13[%c120_235, %c80_236], %263 {strides = array<i32>} : memref<200x320xf32, #tpu.memory_space<vmem>>, vector<8x40xf32>,
    %265 = vector.extract_strided_slice %14 {offsets = [0, 272], sizes = [8, 40], strides = [1, 1]} : vector<8x512xf32> to vector<8x40xf32>
    %c120_237 = arith.constant 120 : index
    %c240_238 = arith.constant 240 : index
    %266 = vector.load %arg13[%c120_237, %c240_238] : memref<200x320xf32, #tpu.memory_space<vmem>>, vector<8x40xf32>
    tpu.vector_store %arg13[%c120_237, %c240_238], %265 {strides = array<i32>} : memref<200x320xf32, #tpu.memory_space<vmem>>, vector<8x40xf32>,
    %267 = vector.extract_strided_slice %14 {offsets = [0, 80], sizes = [8, 40], strides = [1, 1]} : vector<8x512xf32> to vector<8x40xf32>
    %c120_239 = arith.constant 120 : index
    %c120_240 = arith.constant 120 : index
    %268 = vector.load %arg13[%c120_239, %c120_240] : memref<200x320xf32, #tpu.memory_space<vmem>>, vector<8x40xf32>
    tpu.vector_store %arg13[%c120_239, %c120_240], %267 {strides = array<i32>} : memref<200x320xf32, #tpu.memory_space<vmem>>, vector<8x40xf32>,
    %269 = vector.extract_strided_slice %14 {offsets = [0, 336], sizes = [8, 40], strides = [1, 1]} : vector<8x512xf32> to vector<8x40xf32>
    %c120_241 = arith.constant 120 : index
    %c280_242 = arith.constant 280 : index
    %270 = vector.load %arg13[%c120_241, %c280_242] : memref<200x320xf32, #tpu.memory_space<vmem>>, vector<8x40xf32>
    tpu.vector_store %arg13[%c120_241, %c280_242], %269 {strides = array<i32>} : memref<200x320xf32, #tpu.memory_space<vmem>>, vector<8x40xf32>,
    %271 = vector.extract_strided_slice %14 {offsets = [0, 200], sizes = [8, 40], strides = [1, 1]} : vector<8x512xf32> to vector<8x40xf32>
    %c128 = arith.constant 128 : index
    %c0_243 = arith.constant 0 : index
    %272 = vector.load %arg13[%c128, %c0_243] : memref<200x320xf32, #tpu.memory_space<vmem>>, vector<8x40xf32>
    tpu.vector_store %arg13[%c128, %c0_243], %271 {strides = array<i32>} : memref<200x320xf32, #tpu.memory_space<vmem>>, vector<8x40xf32>,
    %273 = vector.extract_strided_slice %14 {offsets = [0, 456], sizes = [8, 40], strides = [1, 1]} : vector<8x512xf32> to vector<8x40xf32>
    %c128_244 = arith.constant 128 : index
    %c160_245 = arith.constant 160 : index
    %274 = vector.load %arg13[%c128_244, %c160_245] : memref<200x320xf32, #tpu.memory_space<vmem>>, vector<8x40xf32>
    tpu.vector_store %arg13[%c128_244, %c160_245], %273 {strides = array<i32>} : memref<200x320xf32, #tpu.memory_space<vmem>>, vector<8x40xf32>,
    %275 = vector.extract_strided_slice %14 {offsets = [0, 137], sizes = [8, 40], strides = [1, 1]} : vector<8x512xf32> to vector<8x40xf32>
    %c128_246 = arith.constant 128 : index
    %c40_247 = arith.constant 40 : index
    %276 = vector.load %arg13[%c128_246, %c40_247] : memref<200x320xf32, #tpu.memory_space<vmem>>, vector<8x40xf32>
    tpu.vector_store %arg13[%c128_246, %c40_247], %275 {strides = array<i32>} : memref<200x320xf32, #tpu.memory_space<vmem>>, vector<8x40xf32>,
    %277 = vector.extract_strided_slice %14 {offsets = [0, 393], sizes = [8, 40], strides = [1, 1]} : vector<8x512xf32> to vector<8x40xf32>
    %c128_248 = arith.constant 128 : index
    %c200_249 = arith.constant 200 : index
    %278 = vector.load %arg13[%c128_248, %c200_249] : memref<200x320xf32, #tpu.memory_space<vmem>>, vector<8x40xf32>
    tpu.vector_store %arg13[%c128_248, %c200_249], %277 {strides = array<i32>} : memref<200x320xf32, #tpu.memory_space<vmem>>, vector<8x40xf32>,
    %279 = vector.extract_strided_slice %14 {offsets = [0, 80], sizes = [8, 40], strides = [1, 1]} : vector<8x512xf32> to vector<8x40xf32>
    %c128_250 = arith.constant 128 : index
    %c80_251 = arith.constant 80 : index
    %280 = vector.load %arg13[%c128_250, %c80_251] : memref<200x320xf32, #tpu.memory_space<vmem>>, vector<8x40xf32>
    tpu.vector_store %arg13[%c128_250, %c80_251], %279 {strides = array<i32>} : memref<200x320xf32, #tpu.memory_space<vmem>>, vector<8x40xf32>,
    %281 = vector.extract_strided_slice %14 {offsets = [0, 336], sizes = [8, 40], strides = [1, 1]} : vector<8x512xf32> to vector<8x40xf32>
    %c128_252 = arith.constant 128 : index
    %c240_253 = arith.constant 240 : index
    %282 = vector.load %arg13[%c128_252, %c240_253] : memref<200x320xf32, #tpu.memory_space<vmem>>, vector<8x40xf32>
    tpu.vector_store %arg13[%c128_252, %c240_253], %281 {strides = array<i32>} : memref<200x320xf32, #tpu.memory_space<vmem>>, vector<8x40xf32>,
    %283 = vector.extract_strided_slice %14 {offsets = [0, 17], sizes = [8, 40], strides = [1, 1]} : vector<8x512xf32> to vector<8x40xf32>
    %c128_254 = arith.constant 128 : index
    %c120_255 = arith.constant 120 : index
    %284 = vector.load %arg13[%c128_254, %c120_255] : memref<200x320xf32, #tpu.memory_space<vmem>>, vector<8x40xf32>
    tpu.vector_store %arg13[%c128_254, %c120_255], %283 {strides = array<i32>} : memref<200x320xf32, #tpu.memory_space<vmem>>, vector<8x40xf32>,
    %285 = vector.extract_strided_slice %14 {offsets = [0, 273], sizes = [8, 40], strides = [1, 1]} : vector<8x512xf32> to vector<8x40xf32>
    %c128_256 = arith.constant 128 : index
    %c280_257 = arith.constant 280 : index
    %286 = vector.load %arg13[%c128_256, %c280_257] : memref<200x320xf32, #tpu.memory_space<vmem>>, vector<8x40xf32>
    tpu.vector_store %arg13[%c128_256, %c280_257], %285 {strides = array<i32>} : memref<200x320xf32, #tpu.memory_space<vmem>>, vector<8x40xf32>,
    %287 = vector.extract_strided_slice %14 {offsets = [0, 137], sizes = [8, 40], strides = [1, 1]} : vector<8x512xf32> to vector<8x40xf32>
    %c136 = arith.constant 136 : index
    %c0_258 = arith.constant 0 : index
    %288 = vector.load %arg13[%c136, %c0_258] : memref<200x320xf32, #tpu.memory_space<vmem>>, vector<8x40xf32>
    tpu.vector_store %arg13[%c136, %c0_258], %287 {strides = array<i32>} : memref<200x320xf32, #tpu.memory_space<vmem>>, vector<8x40xf32>,
    %289 = vector.extract_strided_slice %14 {offsets = [0, 393], sizes = [8, 40], strides = [1, 1]} : vector<8x512xf32> to vector<8x40xf32>
    %c136_259 = arith.constant 136 : index
    %c160_260 = arith.constant 160 : index
    %290 = vector.load %arg13[%c136_259, %c160_260] : memref<200x320xf32, #tpu.memory_space<vmem>>, vector<8x40xf32>
    tpu.vector_store %arg13[%c136_259, %c160_260], %289 {strides = array<i32>} : memref<200x320xf32, #tpu.memory_space<vmem>>, vector<8x40xf32>,
    %291 = vector.extract_strided_slice %14 {offsets = [0, 201], sizes = [8, 40], strides = [1, 1]} : vector<8x512xf32> to vector<8x40xf32>
    %c136_261 = arith.constant 136 : index
    %c40_262 = arith.constant 40 : index
    %292 = vector.load %arg13[%c136_261, %c40_262] : memref<200x320xf32, #tpu.memory_space<vmem>>, vector<8x40xf32>
    tpu.vector_store %arg13[%c136_261, %c40_262], %291 {strides = array<i32>} : memref<200x320xf32, #tpu.memory_space<vmem>>, vector<8x40xf32>,
    %293 = vector.extract_strided_slice %14 {offsets = [0, 457], sizes = [8, 40], strides = [1, 1]} : vector<8x512xf32> to vector<8x40xf32>
    %c136_263 = arith.constant 136 : index
    %c200_264 = arith.constant 200 : index
    %294 = vector.load %arg13[%c136_263, %c200_264] : memref<200x320xf32, #tpu.memory_space<vmem>>, vector<8x40xf32>
    tpu.vector_store %arg13[%c136_263, %c200_264], %293 {strides = array<i32>} : memref<200x320xf32, #tpu.memory_space<vmem>>, vector<8x40xf32>,
    %295 = vector.extract_strided_slice %14 {offsets = [0, 17], sizes = [8, 40], strides = [1, 1]} : vector<8x512xf32> to vector<8x40xf32>
    %c136_265 = arith.constant 136 : index
    %c80_266 = arith.constant 80 : index
    %296 = vector.load %arg13[%c136_265, %c80_266] : memref<200x320xf32, #tpu.memory_space<vmem>>, vector<8x40xf32>
    tpu.vector_store %arg13[%c136_265, %c80_266], %295 {strides = array<i32>} : memref<200x320xf32, #tpu.memory_space<vmem>>, vector<8x40xf32>,
    %297 = vector.extract_strided_slice %14 {offsets = [0, 273], sizes = [8, 40], strides = [1, 1]} : vector<8x512xf32> to vector<8x40xf32>
    %c136_267 = arith.constant 136 : index
    %c240_268 = arith.constant 240 : index
    %298 = vector.load %arg13[%c136_267, %c240_268] : memref<200x320xf32, #tpu.memory_space<vmem>>, vector<8x40xf32>
    tpu.vector_store %arg13[%c136_267, %c240_268], %297 {strides = array<i32>} : memref<200x320xf32, #tpu.memory_space<vmem>>, vector<8x40xf32>,
    %299 = vector.extract_strided_slice %14 {offsets = [0, 81], sizes = [8, 40], strides = [1, 1]} : vector<8x512xf32> to vector<8x40xf32>
    %c136_269 = arith.constant 136 : index
    %c120_270 = arith.constant 120 : index
    %300 = vector.load %arg13[%c136_269, %c120_270] : memref<200x320xf32, #tpu.memory_space<vmem>>, vector<8x40xf32>
    tpu.vector_store %arg13[%c136_269, %c120_270], %299 {strides = array<i32>} : memref<200x320xf32, #tpu.memory_space<vmem>>, vector<8x40xf32>,
    %301 = vector.extract_strided_slice %14 {offsets = [0, 337], sizes = [8, 40], strides = [1, 1]} : vector<8x512xf32> to vector<8x40xf32>
    %c136_271 = arith.constant 136 : index
    %c280_272 = arith.constant 280 : index
    %302 = vector.load %arg13[%c136_271, %c280_272] : memref<200x320xf32, #tpu.memory_space<vmem>>, vector<8x40xf32>
    tpu.vector_store %arg13[%c136_271, %c280_272], %301 {strides = array<i32>} : memref<200x320xf32, #tpu.memory_space<vmem>>, vector<8x40xf32>,
    %303 = vector.extract_strided_slice %14 {offsets = [0, 201], sizes = [8, 40], strides = [1, 1]} : vector<8x512xf32> to vector<8x40xf32>
    %c144 = arith.constant 144 : index
    %c0_273 = arith.constant 0 : index
    %304 = vector.load %arg13[%c144, %c0_273] : memref<200x320xf32, #tpu.memory_space<vmem>>, vector<8x40xf32>
    tpu.vector_store %arg13[%c144, %c0_273], %303 {strides = array<i32>} : memref<200x320xf32, #tpu.memory_space<vmem>>, vector<8x40xf32>,
    %305 = vector.extract_strided_slice %14 {offsets = [0, 457], sizes = [8, 40], strides = [1, 1]} : vector<8x512xf32> to vector<8x40xf32>
    %c144_274 = arith.constant 144 : index
    %c160_275 = arith.constant 160 : index
    %306 = vector.load %arg13[%c144_274, %c160_275] : memref<200x320xf32, #tpu.memory_space<vmem>>, vector<8x40xf32>
    tpu.vector_store %arg13[%c144_274, %c160_275], %305 {strides = array<i32>} : memref<200x320xf32, #tpu.memory_space<vmem>>, vector<8x40xf32>,
    %307 = vector.extract_strided_slice %14 {offsets = [0, 138], sizes = [8, 40], strides = [1, 1]} : vector<8x512xf32> to vector<8x40xf32>
    %c144_276 = arith.constant 144 : index
    %c40_277 = arith.constant 40 : index
    %308 = vector.load %arg13[%c144_276, %c40_277] : memref<200x320xf32, #tpu.memory_space<vmem>>, vector<8x40xf32>
    tpu.vector_store %arg13[%c144_276, %c40_277], %307 {strides = array<i32>} : memref<200x320xf32, #tpu.memory_space<vmem>>, vector<8x40xf32>,
    %309 = vector.extract_strided_slice %14 {offsets = [0, 394], sizes = [8, 40], strides = [1, 1]} : vector<8x512xf32> to vector<8x40xf32>
    %c144_278 = arith.constant 144 : index
    %c200_279 = arith.constant 200 : index
    %310 = vector.load %arg13[%c144_278, %c200_279] : memref<200x320xf32, #tpu.memory_space<vmem>>, vector<8x40xf32>
    tpu.vector_store %arg13[%c144_278, %c200_279], %309 {strides = array<i32>} : memref<200x320xf32, #tpu.memory_space<vmem>>, vector<8x40xf32>,
    %311 = vector.extract_strided_slice %14 {offsets = [0, 81], sizes = [8, 40], strides = [1, 1]} : vector<8x512xf32> to vector<8x40xf32>
    %c144_280 = arith.constant 144 : index
    %c80_281 = arith.constant 80 : index
    %312 = vector.load %arg13[%c144_280, %c80_281] : memref<200x320xf32, #tpu.memory_space<vmem>>, vector<8x40xf32>
    tpu.vector_store %arg13[%c144_280, %c80_281], %311 {strides = array<i32>} : memref<200x320xf32, #tpu.memory_space<vmem>>, vector<8x40xf32>,
    %313 = vector.extract_strided_slice %14 {offsets = [0, 337], sizes = [8, 40], strides = [1, 1]} : vector<8x512xf32> to vector<8x40xf32>
    %c144_282 = arith.constant 144 : index
    %c240_283 = arith.constant 240 : index
    %314 = vector.load %arg13[%c144_282, %c240_283] : memref<200x320xf32, #tpu.memory_space<vmem>>, vector<8x40xf32>
    tpu.vector_store %arg13[%c144_282, %c240_283], %313 {strides = array<i32>} : memref<200x320xf32, #tpu.memory_space<vmem>>, vector<8x40xf32>,
    %315 = vector.extract_strided_slice %14 {offsets = [0, 18], sizes = [8, 40], strides = [1, 1]} : vector<8x512xf32> to vector<8x40xf32>
    %c144_284 = arith.constant 144 : index
    %c120_285 = arith.constant 120 : index
    %316 = vector.load %arg13[%c144_284, %c120_285] : memref<200x320xf32, #tpu.memory_space<vmem>>, vector<8x40xf32>
    tpu.vector_store %arg13[%c144_284, %c120_285], %315 {strides = array<i32>} : memref<200x320xf32, #tpu.memory_space<vmem>>, vector<8x40xf32>,
    %317 = vector.extract_strided_slice %14 {offsets = [0, 274], sizes = [8, 40], strides = [1, 1]} : vector<8x512xf32> to vector<8x40xf32>
    %c144_286 = arith.constant 144 : index
    %c280_287 = arith.constant 280 : index
    %318 = vector.load %arg13[%c144_286, %c280_287] : memref<200x320xf32, #tpu.memory_space<vmem>>, vector<8x40xf32>
    tpu.vector_store %arg13[%c144_286, %c280_287], %317 {strides = array<i32>} : memref<200x320xf32, #tpu.memory_space<vmem>>, vector<8x40xf32>,
    %319 = vector.extract_strided_slice %14 {offsets = [0, 138], sizes = [8, 40], strides = [1, 1]} : vector<8x512xf32> to vector<8x40xf32>
    %c152 = arith.constant 152 : index
    %c0_288 = arith.constant 0 : index
    %320 = vector.load %arg13[%c152, %c0_288] : memref<200x320xf32, #tpu.memory_space<vmem>>, vector<8x40xf32>
    tpu.vector_store %arg13[%c152, %c0_288], %319 {strides = array<i32>} : memref<200x320xf32, #tpu.memory_space<vmem>>, vector<8x40xf32>,
    %321 = vector.extract_strided_slice %14 {offsets = [0, 394], sizes = [8, 40], strides = [1, 1]} : vector<8x512xf32> to vector<8x40xf32>
    %c152_289 = arith.constant 152 : index
    %c160_290 = arith.constant 160 : index
    %322 = vector.load %arg13[%c152_289, %c160_290] : memref<200x320xf32, #tpu.memory_space<vmem>>, vector<8x40xf32>
    tpu.vector_store %arg13[%c152_289, %c160_290], %321 {strides = array<i32>} : memref<200x320xf32, #tpu.memory_space<vmem>>, vector<8x40xf32>,
    %323 = vector.extract_strided_slice %14 {offsets = [0, 202], sizes = [8, 40], strides = [1, 1]} : vector<8x512xf32> to vector<8x40xf32>
    %c152_291 = arith.constant 152 : index
    %c40_292 = arith.constant 40 : index
    %324 = vector.load %arg13[%c152_291, %c40_292] : memref<200x320xf32, #tpu.memory_space<vmem>>, vector<8x40xf32>
    tpu.vector_store %arg13[%c152_291, %c40_292], %323 {strides = array<i32>} : memref<200x320xf32, #tpu.memory_space<vmem>>, vector<8x40xf32>,
    %325 = vector.extract_strided_slice %14 {offsets = [0, 458], sizes = [8, 40], strides = [1, 1]} : vector<8x512xf32> to vector<8x40xf32>
    %c152_293 = arith.constant 152 : index
    %c200_294 = arith.constant 200 : index
    %326 = vector.load %arg13[%c152_293, %c200_294] : memref<200x320xf32, #tpu.memory_space<vmem>>, vector<8x40xf32>
    tpu.vector_store %arg13[%c152_293, %c200_294], %325 {strides = array<i32>} : memref<200x320xf32, #tpu.memory_space<vmem>>, vector<8x40xf32>,
    %327 = vector.extract_strided_slice %14 {offsets = [0, 18], sizes = [8, 40], strides = [1, 1]} : vector<8x512xf32> to vector<8x40xf32>
    %c152_295 = arith.constant 152 : index
    %c80_296 = arith.constant 80 : index
    %328 = vector.load %arg13[%c152_295, %c80_296] : memref<200x320xf32, #tpu.memory_space<vmem>>, vector<8x40xf32>
    tpu.vector_store %arg13[%c152_295, %c80_296], %327 {strides = array<i32>} : memref<200x320xf32, #tpu.memory_space<vmem>>, vector<8x40xf32>,
    %329 = vector.extract_strided_slice %14 {offsets = [0, 274], sizes = [8, 40], strides = [1, 1]} : vector<8x512xf32> to vector<8x40xf32>
    %c152_297 = arith.constant 152 : index
    %c240_298 = arith.constant 240 : index
    %330 = vector.load %arg13[%c152_297, %c240_298] : memref<200x320xf32, #tpu.memory_space<vmem>>, vector<8x40xf32>
    tpu.vector_store %arg13[%c152_297, %c240_298], %329 {strides = array<i32>} : memref<200x320xf32, #tpu.memory_space<vmem>>, vector<8x40xf32>,
    %331 = vector.extract_strided_slice %14 {offsets = [0, 82], sizes = [8, 40], strides = [1, 1]} : vector<8x512xf32> to vector<8x40xf32>
    %c152_299 = arith.constant 152 : index
    %c120_300 = arith.constant 120 : index
    %332 = vector.load %arg13[%c152_299, %c120_300] : memref<200x320xf32, #tpu.memory_space<vmem>>, vector<8x40xf32>
    tpu.vector_store %arg13[%c152_299, %c120_300], %331 {strides = array<i32>} : memref<200x320xf32, #tpu.memory_space<vmem>>, vector<8x40xf32>,
    %333 = vector.extract_strided_slice %14 {offsets = [0, 338], sizes = [8, 40], strides = [1, 1]} : vector<8x512xf32> to vector<8x40xf32>
    %c152_301 = arith.constant 152 : index
    %c280_302 = arith.constant 280 : index
    %334 = vector.load %arg13[%c152_301, %c280_302] : memref<200x320xf32, #tpu.memory_space<vmem>>, vector<8x40xf32>
    tpu.vector_store %arg13[%c152_301, %c280_302], %333 {strides = array<i32>} : memref<200x320xf32, #tpu.memory_space<vmem>>, vector<8x40xf32>,
    %335 = vector.extract_strided_slice %14 {offsets = [0, 16], sizes = [8, 40], strides = [1, 1]} : vector<8x512xf32> to vector<8x40xf32>
    %c160_303 = arith.constant 160 : index
    %c0_304 = arith.constant 0 : index
    %336 = vector.load %arg13[%c160_303, %c0_304] : memref<200x320xf32, #tpu.memory_space<vmem>>, vector<8x40xf32>
    tpu.vector_store %arg13[%c160_303, %c0_304], %335 {strides = array<i32>} : memref<200x320xf32, #tpu.memory_space<vmem>>, vector<8x40xf32>,
    %337 = vector.extract_strided_slice %14 {offsets = [0, 272], sizes = [8, 40], strides = [1, 1]} : vector<8x512xf32> to vector<8x40xf32>
    %c160_305 = arith.constant 160 : index
    %c160_306 = arith.constant 160 : index
    %338 = vector.load %arg13[%c160_305, %c160_306] : memref<200x320xf32, #tpu.memory_space<vmem>>, vector<8x40xf32>
    tpu.vector_store %arg13[%c160_305, %c160_306], %337 {strides = array<i32>} : memref<200x320xf32, #tpu.memory_space<vmem>>, vector<8x40xf32>,
    %339 = vector.extract_strided_slice %14 {offsets = [0, 80], sizes = [8, 40], strides = [1, 1]} : vector<8x512xf32> to vector<8x40xf32>
    %c160_307 = arith.constant 160 : index
    %c40_308 = arith.constant 40 : index
    %340 = vector.load %arg13[%c160_307, %c40_308] : memref<200x320xf32, #tpu.memory_space<vmem>>, vector<8x40xf32>
    tpu.vector_store %arg13[%c160_307, %c40_308], %339 {strides = array<i32>} : memref<200x320xf32, #tpu.memory_space<vmem>>, vector<8x40xf32>,
    %341 = vector.extract_strided_slice %14 {offsets = [0, 336], sizes = [8, 40], strides = [1, 1]} : vector<8x512xf32> to vector<8x40xf32>
    %c160_309 = arith.constant 160 : index
    %c200_310 = arith.constant 200 : index
    %342 = vector.load %arg13[%c160_309, %c200_310] : memref<200x320xf32, #tpu.memory_space<vmem>>, vector<8x40xf32>
    tpu.vector_store %arg13[%c160_309, %c200_310], %341 {strides = array<i32>} : memref<200x320xf32, #tpu.memory_space<vmem>>, vector<8x40xf32>,
    %343 = vector.extract_strided_slice %14 {offsets = [0, 144], sizes = [8, 40], strides = [1, 1]} : vector<8x512xf32> to vector<8x40xf32>
    %c160_311 = arith.constant 160 : index
    %c80_312 = arith.constant 80 : index
    %344 = vector.load %arg13[%c160_311, %c80_312] : memref<200x320xf32, #tpu.memory_space<vmem>>, vector<8x40xf32>
    tpu.vector_store %arg13[%c160_311, %c80_312], %343 {strides = array<i32>} : memref<200x320xf32, #tpu.memory_space<vmem>>, vector<8x40xf32>,
    %345 = vector.extract_strided_slice %14 {offsets = [0, 400], sizes = [8, 40], strides = [1, 1]} : vector<8x512xf32> to vector<8x40xf32>
    %c160_313 = arith.constant 160 : index
    %c240_314 = arith.constant 240 : index
    %346 = vector.load %arg13[%c160_313, %c240_314] : memref<200x320xf32, #tpu.memory_space<vmem>>, vector<8x40xf32>
    tpu.vector_store %arg13[%c160_313, %c240_314], %345 {strides = array<i32>} : memref<200x320xf32, #tpu.memory_space<vmem>>, vector<8x40xf32>,
    %347 = vector.extract_strided_slice %14 {offsets = [0, 208], sizes = [8, 40], strides = [1, 1]} : vector<8x512xf32> to vector<8x40xf32>
    %c160_315 = arith.constant 160 : index
    %c120_316 = arith.constant 120 : index
    %348 = vector.load %arg13[%c160_315, %c120_316] : memref<200x320xf32, #tpu.memory_space<vmem>>, vector<8x40xf32>
    tpu.vector_store %arg13[%c160_315, %c120_316], %347 {strides = array<i32>} : memref<200x320xf32, #tpu.memory_space<vmem>>, vector<8x40xf32>,
    %349 = vector.extract_strided_slice %14 {offsets = [0, 464], sizes = [8, 40], strides = [1, 1]} : vector<8x512xf32> to vector<8x40xf32>
    %c160_317 = arith.constant 160 : index
    %c280_318 = arith.constant 280 : index
    %350 = vector.load %arg13[%c160_317, %c280_318] : memref<200x320xf32, #tpu.memory_space<vmem>>, vector<8x40xf32>
    tpu.vector_store %arg13[%c160_317, %c280_318], %349 {strides = array<i32>} : memref<200x320xf32, #tpu.memory_space<vmem>>, vector<8x40xf32>,
    %351 = vector.extract_strided_slice %14 {offsets = [0, 80], sizes = [8, 40], strides = [1, 1]} : vector<8x512xf32> to vector<8x40xf32>
    %c168 = arith.constant 168 : index
    %c0_319 = arith.constant 0 : index
    %352 = vector.load %arg13[%c168, %c0_319] : memref<200x320xf32, #tpu.memory_space<vmem>>, vector<8x40xf32>
    tpu.vector_store %arg13[%c168, %c0_319], %351 {strides = array<i32>} : memref<200x320xf32, #tpu.memory_space<vmem>>, vector<8x40xf32>,
    %353 = vector.extract_strided_slice %14 {offsets = [0, 336], sizes = [8, 40], strides = [1, 1]} : vector<8x512xf32> to vector<8x40xf32>
    %c168_320 = arith.constant 168 : index
    %c160_321 = arith.constant 160 : index
    %354 = vector.load %arg13[%c168_320, %c160_321] : memref<200x320xf32, #tpu.memory_space<vmem>>, vector<8x40xf32>
    tpu.vector_store %arg13[%c168_320, %c160_321], %353 {strides = array<i32>} : memref<200x320xf32, #tpu.memory_space<vmem>>, vector<8x40xf32>,
    %355 = vector.extract_strided_slice %14 {offsets = [0, 17], sizes = [8, 40], strides = [1, 1]} : vector<8x512xf32> to vector<8x40xf32>
    %c168_322 = arith.constant 168 : index
    %c40_323 = arith.constant 40 : index
    %356 = vector.load %arg13[%c168_322, %c40_323] : memref<200x320xf32, #tpu.memory_space<vmem>>, vector<8x40xf32>
    tpu.vector_store %arg13[%c168_322, %c40_323], %355 {strides = array<i32>} : memref<200x320xf32, #tpu.memory_space<vmem>>, vector<8x40xf32>,
    %357 = vector.extract_strided_slice %14 {offsets = [0, 273], sizes = [8, 40], strides = [1, 1]} : vector<8x512xf32> to vector<8x40xf32>
    %c168_324 = arith.constant 168 : index
    %c200_325 = arith.constant 200 : index
    %358 = vector.load %arg13[%c168_324, %c200_325] : memref<200x320xf32, #tpu.memory_space<vmem>>, vector<8x40xf32>
    tpu.vector_store %arg13[%c168_324, %c200_325], %357 {strides = array<i32>} : memref<200x320xf32, #tpu.memory_space<vmem>>, vector<8x40xf32>,
    %359 = vector.extract_strided_slice %14 {offsets = [0, 208], sizes = [8, 40], strides = [1, 1]} : vector<8x512xf32> to vector<8x40xf32>
    %c168_326 = arith.constant 168 : index
    %c80_327 = arith.constant 80 : index
    %360 = vector.load %arg13[%c168_326, %c80_327] : memref<200x320xf32, #tpu.memory_space<vmem>>, vector<8x40xf32>
    tpu.vector_store %arg13[%c168_326, %c80_327], %359 {strides = array<i32>} : memref<200x320xf32, #tpu.memory_space<vmem>>, vector<8x40xf32>,
    %361 = vector.extract_strided_slice %14 {offsets = [0, 464], sizes = [8, 40], strides = [1, 1]} : vector<8x512xf32> to vector<8x40xf32>
    %c168_328 = arith.constant 168 : index
    %c240_329 = arith.constant 240 : index
    %362 = vector.load %arg13[%c168_328, %c240_329] : memref<200x320xf32, #tpu.memory_space<vmem>>, vector<8x40xf32>
    tpu.vector_store %arg13[%c168_328, %c240_329], %361 {strides = array<i32>} : memref<200x320xf32, #tpu.memory_space<vmem>>, vector<8x40xf32>,
    %363 = vector.extract_strided_slice %14 {offsets = [0, 145], sizes = [8, 40], strides = [1, 1]} : vector<8x512xf32> to vector<8x40xf32>
    %c168_330 = arith.constant 168 : index
    %c120_331 = arith.constant 120 : index
    %364 = vector.load %arg13[%c168_330, %c120_331] : memref<200x320xf32, #tpu.memory_space<vmem>>, vector<8x40xf32>
    tpu.vector_store %arg13[%c168_330, %c120_331], %363 {strides = array<i32>} : memref<200x320xf32, #tpu.memory_space<vmem>>, vector<8x40xf32>,
    %365 = vector.extract_strided_slice %14 {offsets = [0, 401], sizes = [8, 40], strides = [1, 1]} : vector<8x512xf32> to vector<8x40xf32>
    %c168_332 = arith.constant 168 : index
    %c280_333 = arith.constant 280 : index
    %366 = vector.load %arg13[%c168_332, %c280_333] : memref<200x320xf32, #tpu.memory_space<vmem>>, vector<8x40xf32>
    tpu.vector_store %arg13[%c168_332, %c280_333], %365 {strides = array<i32>} : memref<200x320xf32, #tpu.memory_space<vmem>>, vector<8x40xf32>,
    %367 = vector.extract_strided_slice %14 {offsets = [0, 17], sizes = [8, 40], strides = [1, 1]} : vector<8x512xf32> to vector<8x40xf32>
    %c176 = arith.constant 176 : index
    %c0_334 = arith.constant 0 : index
    %368 = vector.load %arg13[%c176, %c0_334] : memref<200x320xf32, #tpu.memory_space<vmem>>, vector<8x40xf32>
    tpu.vector_store %arg13[%c176, %c0_334], %367 {strides = array<i32>} : memref<200x320xf32, #tpu.memory_space<vmem>>, vector<8x40xf32>,
    %369 = vector.extract_strided_slice %14 {offsets = [0, 273], sizes = [8, 40], strides = [1, 1]} : vector<8x512xf32> to vector<8x40xf32>
    %c176_335 = arith.constant 176 : index
    %c160_336 = arith.constant 160 : index
    %370 = vector.load %arg13[%c176_335, %c160_336] : memref<200x320xf32, #tpu.memory_space<vmem>>, vector<8x40xf32>
    tpu.vector_store %arg13[%c176_335, %c160_336], %369 {strides = array<i32>} : memref<200x320xf32, #tpu.memory_space<vmem>>, vector<8x40xf32>,
    %371 = vector.extract_strided_slice %14 {offsets = [0, 81], sizes = [8, 40], strides = [1, 1]} : vector<8x512xf32> to vector<8x40xf32>
    %c176_337 = arith.constant 176 : index
    %c40_338 = arith.constant 40 : index
    %372 = vector.load %arg13[%c176_337, %c40_338] : memref<200x320xf32, #tpu.memory_space<vmem>>, vector<8x40xf32>
    tpu.vector_store %arg13[%c176_337, %c40_338], %371 {strides = array<i32>} : memref<200x320xf32, #tpu.memory_space<vmem>>, vector<8x40xf32>,
    %373 = vector.extract_strided_slice %14 {offsets = [0, 337], sizes = [8, 40], strides = [1, 1]} : vector<8x512xf32> to vector<8x40xf32>
    %c176_339 = arith.constant 176 : index
    %c200_340 = arith.constant 200 : index
    %374 = vector.load %arg13[%c176_339, %c200_340] : memref<200x320xf32, #tpu.memory_space<vmem>>, vector<8x40xf32>
    tpu.vector_store %arg13[%c176_339, %c200_340], %373 {strides = array<i32>} : memref<200x320xf32, #tpu.memory_space<vmem>>, vector<8x40xf32>,
    %375 = vector.extract_strided_slice %14 {offsets = [0, 145], sizes = [8, 40], strides = [1, 1]} : vector<8x512xf32> to vector<8x40xf32>
    %c176_341 = arith.constant 176 : index
    %c80_342 = arith.constant 80 : index
    %376 = vector.load %arg13[%c176_341, %c80_342] : memref<200x320xf32, #tpu.memory_space<vmem>>, vector<8x40xf32>
    tpu.vector_store %arg13[%c176_341, %c80_342], %375 {strides = array<i32>} : memref<200x320xf32, #tpu.memory_space<vmem>>, vector<8x40xf32>,
    %377 = vector.extract_strided_slice %14 {offsets = [0, 401], sizes = [8, 40], strides = [1, 1]} : vector<8x512xf32> to vector<8x40xf32>
    %c176_343 = arith.constant 176 : index
    %c240_344 = arith.constant 240 : index
    %378 = vector.load %arg13[%c176_343, %c240_344] : memref<200x320xf32, #tpu.memory_space<vmem>>, vector<8x40xf32>
    tpu.vector_store %arg13[%c176_343, %c240_344], %377 {strides = array<i32>} : memref<200x320xf32, #tpu.memory_space<vmem>>, vector<8x40xf32>,
    %379 = vector.extract_strided_slice %14 {offsets = [0, 209], sizes = [8, 40], strides = [1, 1]} : vector<8x512xf32> to vector<8x40xf32>
    %c176_345 = arith.constant 176 : index
    %c120_346 = arith.constant 120 : index
    %380 = vector.load %arg13[%c176_345, %c120_346] : memref<200x320xf32, #tpu.memory_space<vmem>>, vector<8x40xf32>
    tpu.vector_store %arg13[%c176_345, %c120_346], %379 {strides = array<i32>} : memref<200x320xf32, #tpu.memory_space<vmem>>, vector<8x40xf32>,
    %381 = vector.extract_strided_slice %14 {offsets = [0, 465], sizes = [8, 40], strides = [1, 1]} : vector<8x512xf32> to vector<8x40xf32>
    %c176_347 = arith.constant 176 : index
    %c280_348 = arith.constant 280 : index
    %382 = vector.load %arg13[%c176_347, %c280_348] : memref<200x320xf32, #tpu.memory_space<vmem>>, vector<8x40xf32>
    tpu.vector_store %arg13[%c176_347, %c280_348], %381 {strides = array<i32>} : memref<200x320xf32, #tpu.memory_space<vmem>>, vector<8x40xf32>,
    %383 = vector.extract_strided_slice %14 {offsets = [0, 81], sizes = [8, 40], strides = [1, 1]} : vector<8x512xf32> to vector<8x40xf32>
    %c184 = arith.constant 184 : index
    %c0_349 = arith.constant 0 : index
    %384 = vector.load %arg13[%c184, %c0_349] : memref<200x320xf32, #tpu.memory_space<vmem>>, vector<8x40xf32>
    tpu.vector_store %arg13[%c184, %c0_349], %383 {strides = array<i32>} : memref<200x320xf32, #tpu.memory_space<vmem>>, vector<8x40xf32>,
    %385 = vector.extract_strided_slice %14 {offsets = [0, 337], sizes = [8, 40], strides = [1, 1]} : vector<8x512xf32> to vector<8x40xf32>
    %c184_350 = arith.constant 184 : index
    %c160_351 = arith.constant 160 : index
    %386 = vector.load %arg13[%c184_350, %c160_351] : memref<200x320xf32, #tpu.memory_space<vmem>>, vector<8x40xf32>
    tpu.vector_store %arg13[%c184_350, %c160_351], %385 {strides = array<i32>} : memref<200x320xf32, #tpu.memory_space<vmem>>, vector<8x40xf32>,
    %387 = vector.extract_strided_slice %14 {offsets = [0, 18], sizes = [8, 40], strides = [1, 1]} : vector<8x512xf32> to vector<8x40xf32>
    %c184_352 = arith.constant 184 : index
    %c40_353 = arith.constant 40 : index
    %388 = vector.load %arg13[%c184_352, %c40_353] : memref<200x320xf32, #tpu.memory_space<vmem>>, vector<8x40xf32>
    tpu.vector_store %arg13[%c184_352, %c40_353], %387 {strides = array<i32>} : memref<200x320xf32, #tpu.memory_space<vmem>>, vector<8x40xf32>,
    %389 = vector.extract_strided_slice %14 {offsets = [0, 274], sizes = [8, 40], strides = [1, 1]} : vector<8x512xf32> to vector<8x40xf32>
    %c184_354 = arith.constant 184 : index
    %c200_355 = arith.constant 200 : index
    %390 = vector.load %arg13[%c184_354, %c200_355] : memref<200x320xf32, #tpu.memory_space<vmem>>, vector<8x40xf32>
    tpu.vector_store %arg13[%c184_354, %c200_355], %389 {strides = array<i32>} : memref<200x320xf32, #tpu.memory_space<vmem>>, vector<8x40xf32>,
    %391 = vector.extract_strided_slice %14 {offsets = [0, 209], sizes = [8, 40], strides = [1, 1]} : vector<8x512xf32> to vector<8x40xf32>
    %c184_356 = arith.constant 184 : index
    %c80_357 = arith.constant 80 : index
    %392 = vector.load %arg13[%c184_356, %c80_357] : memref<200x320xf32, #tpu.memory_space<vmem>>, vector<8x40xf32>
    tpu.vector_store %arg13[%c184_356, %c80_357], %391 {strides = array<i32>} : memref<200x320xf32, #tpu.memory_space<vmem>>, vector<8x40xf32>,
    %393 = vector.extract_strided_slice %14 {offsets = [0, 465], sizes = [8, 40], strides = [1, 1]} : vector<8x512xf32> to vector<8x40xf32>
    %c184_358 = arith.constant 184 : index
    %c240_359 = arith.constant 240 : index
    %394 = vector.load %arg13[%c184_358, %c240_359] : memref<200x320xf32, #tpu.memory_space<vmem>>, vector<8x40xf32>
    tpu.vector_store %arg13[%c184_358, %c240_359], %393 {strides = array<i32>} : memref<200x320xf32, #tpu.memory_space<vmem>>, vector<8x40xf32>,
    %395 = vector.extract_strided_slice %14 {offsets = [0, 146], sizes = [8, 40], strides = [1, 1]} : vector<8x512xf32> to vector<8x40xf32>
    %c184_360 = arith.constant 184 : index
    %c120_361 = arith.constant 120 : index
    %396 = vector.load %arg13[%c184_360, %c120_361] : memref<200x320xf32, #tpu.memory_space<vmem>>, vector<8x40xf32>
    tpu.vector_store %arg13[%c184_360, %c120_361], %395 {strides = array<i32>} : memref<200x320xf32, #tpu.memory_space<vmem>>, vector<8x40xf32>,
    %397 = vector.extract_strided_slice %14 {offsets = [0, 402], sizes = [8, 40], strides = [1, 1]} : vector<8x512xf32> to vector<8x40xf32>
    %c184_362 = arith.constant 184 : index
    %c280_363 = arith.constant 280 : index
    %398 = vector.load %arg13[%c184_362, %c280_363] : memref<200x320xf32, #tpu.memory_space<vmem>>, vector<8x40xf32>
    tpu.vector_store %arg13[%c184_362, %c280_363], %397 {strides = array<i32>} : memref<200x320xf32, #tpu.memory_space<vmem>>, vector<8x40xf32>,
    %399 = vector.extract_strided_slice %14 {offsets = [0, 18], sizes = [8, 40], strides = [1, 1]} : vector<8x512xf32> to vector<8x40xf32>
    %c192 = arith.constant 192 : index
    %c0_364 = arith.constant 0 : index
    %400 = vector.load %arg13[%c192, %c0_364] : memref<200x320xf32, #tpu.memory_space<vmem>>, vector<8x40xf32>
    tpu.vector_store %arg13[%c192, %c0_364], %399 {strides = array<i32>} : memref<200x320xf32, #tpu.memory_space<vmem>>, vector<8x40xf32>,
    %401 = vector.extract_strided_slice %14 {offsets = [0, 274], sizes = [8, 40], strides = [1, 1]} : vector<8x512xf32> to vector<8x40xf32>
    %c192_365 = arith.constant 192 : index
    %c160_366 = arith.constant 160 : index
    %402 = vector.load %arg13[%c192_365, %c160_366] : memref<200x320xf32, #tpu.memory_space<vmem>>, vector<8x40xf32>
    tpu.vector_store %arg13[%c192_365, %c160_366], %401 {strides = array<i32>} : memref<200x320xf32, #tpu.memory_space<vmem>>, vector<8x40xf32>,
    %403 = vector.extract_strided_slice %14 {offsets = [0, 82], sizes = [8, 40], strides = [1, 1]} : vector<8x512xf32> to vector<8x40xf32>
    %c192_367 = arith.constant 192 : index
    %c40_368 = arith.constant 40 : index
    %404 = vector.load %arg13[%c192_367, %c40_368] : memref<200x320xf32, #tpu.memory_space<vmem>>, vector<8x40xf32>
    tpu.vector_store %arg13[%c192_367, %c40_368], %403 {strides = array<i32>} : memref<200x320xf32, #tpu.memory_space<vmem>>, vector<8x40xf32>,
    %405 = vector.extract_strided_slice %14 {offsets = [0, 338], sizes = [8, 40], strides = [1, 1]} : vector<8x512xf32> to vector<8x40xf32>
    %c192_369 = arith.constant 192 : index
    %c200_370 = arith.constant 200 : index
    %406 = vector.load %arg13[%c192_369, %c200_370] : memref<200x320xf32, #tpu.memory_space<vmem>>, vector<8x40xf32>
    tpu.vector_store %arg13[%c192_369, %c200_370], %405 {strides = array<i32>} : memref<200x320xf32, #tpu.memory_space<vmem>>, vector<8x40xf32>,
    %407 = vector.extract_strided_slice %14 {offsets = [0, 146], sizes = [8, 40], strides = [1, 1]} : vector<8x512xf32> to vector<8x40xf32>
    %c192_371 = arith.constant 192 : index
    %c80_372 = arith.constant 80 : index
    %408 = vector.load %arg13[%c192_371, %c80_372] : memref<200x320xf32, #tpu.memory_space<vmem>>, vector<8x40xf32>
    tpu.vector_store %arg13[%c192_371, %c80_372], %407 {strides = array<i32>} : memref<200x320xf32, #tpu.memory_space<vmem>>, vector<8x40xf32>,
    %409 = vector.extract_strided_slice %14 {offsets = [0, 402], sizes = [8, 40], strides = [1, 1]} : vector<8x512xf32> to vector<8x40xf32>
    %c192_373 = arith.constant 192 : index
    %c240_374 = arith.constant 240 : index
    %410 = vector.load %arg13[%c192_373, %c240_374] : memref<200x320xf32, #tpu.memory_space<vmem>>, vector<8x40xf32>
    tpu.vector_store %arg13[%c192_373, %c240_374], %409 {strides = array<i32>} : memref<200x320xf32, #tpu.memory_space<vmem>>, vector<8x40xf32>,
    %411 = vector.extract_strided_slice %14 {offsets = [0, 210], sizes = [8, 40], strides = [1, 1]} : vector<8x512xf32> to vector<8x40xf32>
    %c192_375 = arith.constant 192 : index
    %c120_376 = arith.constant 120 : index
    %412 = vector.load %arg13[%c192_375, %c120_376] : memref<200x320xf32, #tpu.memory_space<vmem>>, vector<8x40xf32>
    tpu.vector_store %arg13[%c192_375, %c120_376], %411 {strides = array<i32>} : memref<200x320xf32, #tpu.memory_space<vmem>>, vector<8x40xf32>,
    %413 = vector.extract_strided_slice %14 {offsets = [0, 466], sizes = [8, 40], strides = [1, 1]} : vector<8x512xf32> to vector<8x40xf32>
    %c192_377 = arith.constant 192 : index
    %c280_378 = arith.constant 280 : index
    %414 = vector.load %arg13[%c192_377, %c280_378] : memref<200x320xf32, #tpu.memory_space<vmem>>, vector<8x40xf32>
    tpu.vector_store %arg13[%c192_377, %c280_378], %413 {strides = array<i32>} : memref<200x320xf32, #tpu.memory_space<vmem>>, vector<8x40xf32>,
    %c0_379 = arith.constant 0 : index
    %c0_380 = arith.constant 0 : index
    %415 = vector.load %arg4[%c0_379, %c0_380] : memref<16x200xbf16, #tpu.memory_space<vmem>>, vector<16x200xbf16>
    %c0_381 = arith.constant 0 : index
    %c0_382 = arith.constant 0 : index
    %416 = vector.load %arg13[%c0_381, %c0_382] : memref<200x320xf32, #tpu.memory_space<vmem>>, vector<200x320xf32>
    %417 = arith.truncf %416 : vector<200x320xf32> to vector<200x320xbf16>
    %cst_383 = arith.constant dense<0.000000e+00> : vector<16x320xf32>
    %418 = tpu.matmul %415, %417, %cst_383 {dimension_numbers = #tpu.dot_dimension_numbers<[1], [0], [0], [1], [0, 0, 1, 1], [], []>} : vector<16x200xbf16>, vector<200x320xbf16>, vector<16x320xf32> -> vector<16x320xf32>
    %419 = vector.extract_strided_slice %418 {offsets = [0, 0], sizes = [16, 160], strides = [1, 1]} : vector<16x320xf32> to vector<16x160xf32>
    %420 = vector.extract_strided_slice %419 {offsets = [0, 0], sizes = [16, 40], strides = [1, 1]} : vector<16x160xf32> to vector<16x40xf32>
    %421 = vector.extract_strided_slice %419 {offsets = [0, 40], sizes = [16, 40], strides = [1, 1]} : vector<16x160xf32> to vector<16x40xf32>
    %422 = arith.maximumf %420, %421 : vector<16x40xf32>
    %423 = vector.extract_strided_slice %419 {offsets = [0, 80], sizes = [16, 40], strides = [1, 1]} : vector<16x160xf32> to vector<16x40xf32>
    %424 = vector.extract_strided_slice %419 {offsets = [0, 120], sizes = [16, 40], strides = [1, 1]} : vector<16x160xf32> to vector<16x40xf32>
    %425 = arith.maximumf %423, %424 : vector<16x40xf32>
    %426 = arith.maximumf %422, %425 : vector<16x40xf32>
    %c0_384 = arith.constant 0 : index
    %c0_385 = arith.constant 0 : index
    %427 = vector.load %arg5[%c0_384, %c0_385] : memref<16x1xf32, #tpu.memory_space<vmem>>, vector<16x1xf32>
    %428 = vector.broadcast %427 : vector<16x1xf32> to vector<16x40xf32>
    %429 = arith.addf %426, %428 : vector<16x40xf32>
    %cst_386 = arith.constant 0.000000e+00 : f32
    %430 = vector.broadcast %cst_386 : f32 to vector<16x40xf32>
    %431 = arith.maximumf %429, %430 : vector<16x40xf32>
    %432 = vector.extract_strided_slice %431 {offsets = [0, 0], sizes = [1, 40], strides = [1, 1]} : vector<16x40xf32> to vector<1x40xf32>
    %c0_387 = arith.constant 0 : index
    %c0_388 = arith.constant 0 : index
    %433 = vector.load %arg14[%c0_387, %c0_388] : memref<2x640xf32, #tpu.memory_space<vmem>>, vector<1x40xf32>
    tpu.vector_store %arg14[%c0_387, %c0_388], %432 {strides = array<i32>} : memref<2x640xf32, #tpu.memory_space<vmem>>, vector<1x40xf32>,
    %434 = vector.extract_strided_slice %431 {offsets = [1, 0], sizes = [1, 40], strides = [1, 1]} : vector<16x40xf32> to vector<1x40xf32>
    %c0_389 = arith.constant 0 : index
    %c40_390 = arith.constant 40 : index
    %435 = vector.load %arg14[%c0_389, %c40_390] : memref<2x640xf32, #tpu.memory_space<vmem>>, vector<1x40xf32>
    tpu.vector_store %arg14[%c0_389, %c40_390], %434 {strides = array<i32>} : memref<2x640xf32, #tpu.memory_space<vmem>>, vector<1x40xf32>,
    %436 = vector.extract_strided_slice %431 {offsets = [2, 0], sizes = [1, 40], strides = [1, 1]} : vector<16x40xf32> to vector<1x40xf32>
    %c0_391 = arith.constant 0 : index
    %c80_392 = arith.constant 80 : index
    %437 = vector.load %arg14[%c0_391, %c80_392] : memref<2x640xf32, #tpu.memory_space<vmem>>, vector<1x40xf32>
    tpu.vector_store %arg14[%c0_391, %c80_392], %436 {strides = array<i32>} : memref<2x640xf32, #tpu.memory_space<vmem>>, vector<1x40xf32>,
    %438 = vector.extract_strided_slice %431 {offsets = [3, 0], sizes = [1, 40], strides = [1, 1]} : vector<16x40xf32> to vector<1x40xf32>
    %c0_393 = arith.constant 0 : index
    %c120_394 = arith.constant 120 : index
    %439 = vector.load %arg14[%c0_393, %c120_394] : memref<2x640xf32, #tpu.memory_space<vmem>>, vector<1x40xf32>
    tpu.vector_store %arg14[%c0_393, %c120_394], %438 {strides = array<i32>} : memref<2x640xf32, #tpu.memory_space<vmem>>, vector<1x40xf32>,
    %440 = vector.extract_strided_slice %431 {offsets = [4, 0], sizes = [1, 40], strides = [1, 1]} : vector<16x40xf32> to vector<1x40xf32>
    %c0_395 = arith.constant 0 : index
    %c160_396 = arith.constant 160 : index
    %441 = vector.load %arg14[%c0_395, %c160_396] : memref<2x640xf32, #tpu.memory_space<vmem>>, vector<1x40xf32>
    tpu.vector_store %arg14[%c0_395, %c160_396], %440 {strides = array<i32>} : memref<2x640xf32, #tpu.memory_space<vmem>>, vector<1x40xf32>,
    %442 = vector.extract_strided_slice %431 {offsets = [5, 0], sizes = [1, 40], strides = [1, 1]} : vector<16x40xf32> to vector<1x40xf32>
    %c0_397 = arith.constant 0 : index
    %c200_398 = arith.constant 200 : index
    %443 = vector.load %arg14[%c0_397, %c200_398] : memref<2x640xf32, #tpu.memory_space<vmem>>, vector<1x40xf32>
    tpu.vector_store %arg14[%c0_397, %c200_398], %442 {strides = array<i32>} : memref<2x640xf32, #tpu.memory_space<vmem>>, vector<1x40xf32>,
    %444 = vector.extract_strided_slice %431 {offsets = [6, 0], sizes = [1, 40], strides = [1, 1]} : vector<16x40xf32> to vector<1x40xf32>
    %c0_399 = arith.constant 0 : index
    %c240_400 = arith.constant 240 : index
    %445 = vector.load %arg14[%c0_399, %c240_400] : memref<2x640xf32, #tpu.memory_space<vmem>>, vector<1x40xf32>
    tpu.vector_store %arg14[%c0_399, %c240_400], %444 {strides = array<i32>} : memref<2x640xf32, #tpu.memory_space<vmem>>, vector<1x40xf32>,
    %446 = vector.extract_strided_slice %431 {offsets = [7, 0], sizes = [1, 40], strides = [1, 1]} : vector<16x40xf32> to vector<1x40xf32>
    %c0_401 = arith.constant 0 : index
    %c280_402 = arith.constant 280 : index
    %447 = vector.load %arg14[%c0_401, %c280_402] : memref<2x640xf32, #tpu.memory_space<vmem>>, vector<1x40xf32>
    tpu.vector_store %arg14[%c0_401, %c280_402], %446 {strides = array<i32>} : memref<2x640xf32, #tpu.memory_space<vmem>>, vector<1x40xf32>,
    %448 = vector.extract_strided_slice %431 {offsets = [8, 0], sizes = [1, 40], strides = [1, 1]} : vector<16x40xf32> to vector<1x40xf32>
    %c0_403 = arith.constant 0 : index
    %c320 = arith.constant 320 : index
    %449 = vector.load %arg14[%c0_403, %c320] : memref<2x640xf32, #tpu.memory_space<vmem>>, vector<1x40xf32>
    tpu.vector_store %arg14[%c0_403, %c320], %448 {strides = array<i32>} : memref<2x640xf32, #tpu.memory_space<vmem>>, vector<1x40xf32>,
    %450 = vector.extract_strided_slice %431 {offsets = [9, 0], sizes = [1, 40], strides = [1, 1]} : vector<16x40xf32> to vector<1x40xf32>
    %c0_404 = arith.constant 0 : index
    %c360 = arith.constant 360 : index
    %451 = vector.load %arg14[%c0_404, %c360] : memref<2x640xf32, #tpu.memory_space<vmem>>, vector<1x40xf32>
    tpu.vector_store %arg14[%c0_404, %c360], %450 {strides = array<i32>} : memref<2x640xf32, #tpu.memory_space<vmem>>, vector<1x40xf32>,
    %452 = vector.extract_strided_slice %431 {offsets = [10, 0], sizes = [1, 40], strides = [1, 1]} : vector<16x40xf32> to vector<1x40xf32>
    %c0_405 = arith.constant 0 : index
    %c400 = arith.constant 400 : index
    %453 = vector.load %arg14[%c0_405, %c400] : memref<2x640xf32, #tpu.memory_space<vmem>>, vector<1x40xf32>
    tpu.vector_store %arg14[%c0_405, %c400], %452 {strides = array<i32>} : memref<2x640xf32, #tpu.memory_space<vmem>>, vector<1x40xf32>,
    %454 = vector.extract_strided_slice %431 {offsets = [11, 0], sizes = [1, 40], strides = [1, 1]} : vector<16x40xf32> to vector<1x40xf32>
    %c0_406 = arith.constant 0 : index
    %c440 = arith.constant 440 : index
    %455 = vector.load %arg14[%c0_406, %c440] : memref<2x640xf32, #tpu.memory_space<vmem>>, vector<1x40xf32>
    tpu.vector_store %arg14[%c0_406, %c440], %454 {strides = array<i32>} : memref<2x640xf32, #tpu.memory_space<vmem>>, vector<1x40xf32>,
    %456 = vector.extract_strided_slice %431 {offsets = [12, 0], sizes = [1, 40], strides = [1, 1]} : vector<16x40xf32> to vector<1x40xf32>
    %c0_407 = arith.constant 0 : index
    %c480 = arith.constant 480 : index
    %457 = vector.load %arg14[%c0_407, %c480] : memref<2x640xf32, #tpu.memory_space<vmem>>, vector<1x40xf32>
    tpu.vector_store %arg14[%c0_407, %c480], %456 {strides = array<i32>} : memref<2x640xf32, #tpu.memory_space<vmem>>, vector<1x40xf32>,
    %458 = vector.extract_strided_slice %431 {offsets = [13, 0], sizes = [1, 40], strides = [1, 1]} : vector<16x40xf32> to vector<1x40xf32>
    %c0_408 = arith.constant 0 : index
    %c520 = arith.constant 520 : index
    %459 = vector.load %arg14[%c0_408, %c520] : memref<2x640xf32, #tpu.memory_space<vmem>>, vector<1x40xf32>
    tpu.vector_store %arg14[%c0_408, %c520], %458 {strides = array<i32>} : memref<2x640xf32, #tpu.memory_space<vmem>>, vector<1x40xf32>,
    %460 = vector.extract_strided_slice %431 {offsets = [14, 0], sizes = [1, 40], strides = [1, 1]} : vector<16x40xf32> to vector<1x40xf32>
    %c0_409 = arith.constant 0 : index
    %c560 = arith.constant 560 : index
    %461 = vector.load %arg14[%c0_409, %c560] : memref<2x640xf32, #tpu.memory_space<vmem>>, vector<1x40xf32>
    tpu.vector_store %arg14[%c0_409, %c560], %460 {strides = array<i32>} : memref<2x640xf32, #tpu.memory_space<vmem>>, vector<1x40xf32>,
    %462 = vector.extract_strided_slice %431 {offsets = [15, 0], sizes = [1, 40], strides = [1, 1]} : vector<16x40xf32> to vector<1x40xf32>
    %c0_410 = arith.constant 0 : index
    %c600 = arith.constant 600 : index
    %463 = vector.load %arg14[%c0_410, %c600] : memref<2x640xf32, #tpu.memory_space<vmem>>, vector<1x40xf32>
    tpu.vector_store %arg14[%c0_410, %c600], %462 {strides = array<i32>} : memref<2x640xf32, #tpu.memory_space<vmem>>, vector<1x40xf32>,
    %464 = vector.extract_strided_slice %418 {offsets = [0, 160], sizes = [16, 160], strides = [1, 1]} : vector<16x320xf32> to vector<16x160xf32>
    %465 = vector.extract_strided_slice %464 {offsets = [0, 0], sizes = [16, 40], strides = [1, 1]} : vector<16x160xf32> to vector<16x40xf32>
    %466 = vector.extract_strided_slice %464 {offsets = [0, 40], sizes = [16, 40], strides = [1, 1]} : vector<16x160xf32> to vector<16x40xf32>
    %467 = arith.maximumf %465, %466 : vector<16x40xf32>
    %468 = vector.extract_strided_slice %464 {offsets = [0, 80], sizes = [16, 40], strides = [1, 1]} : vector<16x160xf32> to vector<16x40xf32>
    %469 = vector.extract_strided_slice %464 {offsets = [0, 120], sizes = [16, 40], strides = [1, 1]} : vector<16x160xf32> to vector<16x40xf32>
    %470 = arith.maximumf %468, %469 : vector<16x40xf32>
    %471 = arith.maximumf %467, %470 : vector<16x40xf32>
    %c0_411 = arith.constant 0 : index
    %c0_412 = arith.constant 0 : index
    %472 = vector.load %arg5[%c0_411, %c0_412] : memref<16x1xf32, #tpu.memory_space<vmem>>, vector<16x1xf32>
    %473 = vector.broadcast %472 : vector<16x1xf32> to vector<16x40xf32>
    %474 = arith.addf %471, %473 : vector<16x40xf32>
    %cst_413 = arith.constant 0.000000e+00 : f32
    %475 = vector.broadcast %cst_413 : f32 to vector<16x40xf32>
    %476 = arith.maximumf %474, %475 : vector<16x40xf32>
    %477 = vector.extract_strided_slice %476 {offsets = [0, 0], sizes = [1, 40], strides = [1, 1]} : vector<16x40xf32> to vector<1x40xf32>
    %c1 = arith.constant 1 : index
    %c0_414 = arith.constant 0 : index
    %478 = vector.load %arg14[%c1, %c0_414] : memref<2x640xf32, #tpu.memory_space<vmem>>, vector<1x40xf32>
    tpu.vector_store %arg14[%c1, %c0_414], %477 {strides = array<i32>} : memref<2x640xf32, #tpu.memory_space<vmem>>, vector<1x40xf32>,
    %479 = vector.extract_strided_slice %476 {offsets = [1, 0], sizes = [1, 40], strides = [1, 1]} : vector<16x40xf32> to vector<1x40xf32>
    %c1_415 = arith.constant 1 : index
    %c40_416 = arith.constant 40 : index
    %480 = vector.load %arg14[%c1_415, %c40_416] : memref<2x640xf32, #tpu.memory_space<vmem>>, vector<1x40xf32>
    tpu.vector_store %arg14[%c1_415, %c40_416], %479 {strides = array<i32>} : memref<2x640xf32, #tpu.memory_space<vmem>>, vector<1x40xf32>,
    %481 = vector.extract_strided_slice %476 {offsets = [2, 0], sizes = [1, 40], strides = [1, 1]} : vector<16x40xf32> to vector<1x40xf32>
    %c1_417 = arith.constant 1 : index
    %c80_418 = arith.constant 80 : index
    %482 = vector.load %arg14[%c1_417, %c80_418] : memref<2x640xf32, #tpu.memory_space<vmem>>, vector<1x40xf32>
    tpu.vector_store %arg14[%c1_417, %c80_418], %481 {strides = array<i32>} : memref<2x640xf32, #tpu.memory_space<vmem>>, vector<1x40xf32>,
    %483 = vector.extract_strided_slice %476 {offsets = [3, 0], sizes = [1, 40], strides = [1, 1]} : vector<16x40xf32> to vector<1x40xf32>
    %c1_419 = arith.constant 1 : index
    %c120_420 = arith.constant 120 : index
    %484 = vector.load %arg14[%c1_419, %c120_420] : memref<2x640xf32, #tpu.memory_space<vmem>>, vector<1x40xf32>
    tpu.vector_store %arg14[%c1_419, %c120_420], %483 {strides = array<i32>} : memref<2x640xf32, #tpu.memory_space<vmem>>, vector<1x40xf32>,
    %485 = vector.extract_strided_slice %476 {offsets = [4, 0], sizes = [1, 40], strides = [1, 1]} : vector<16x40xf32> to vector<1x40xf32>
    %c1_421 = arith.constant 1 : index
    %c160_422 = arith.constant 160 : index
    %486 = vector.load %arg14[%c1_421, %c160_422] : memref<2x640xf32, #tpu.memory_space<vmem>>, vector<1x40xf32>
    tpu.vector_store %arg14[%c1_421, %c160_422], %485 {strides = array<i32>} : memref<2x640xf32, #tpu.memory_space<vmem>>, vector<1x40xf32>,
    %487 = vector.extract_strided_slice %476 {offsets = [5, 0], sizes = [1, 40], strides = [1, 1]} : vector<16x40xf32> to vector<1x40xf32>
    %c1_423 = arith.constant 1 : index
    %c200_424 = arith.constant 200 : index
    %488 = vector.load %arg14[%c1_423, %c200_424] : memref<2x640xf32, #tpu.memory_space<vmem>>, vector<1x40xf32>
    tpu.vector_store %arg14[%c1_423, %c200_424], %487 {strides = array<i32>} : memref<2x640xf32, #tpu.memory_space<vmem>>, vector<1x40xf32>,
    %489 = vector.extract_strided_slice %476 {offsets = [6, 0], sizes = [1, 40], strides = [1, 1]} : vector<16x40xf32> to vector<1x40xf32>
    %c1_425 = arith.constant 1 : index
    %c240_426 = arith.constant 240 : index
    %490 = vector.load %arg14[%c1_425, %c240_426] : memref<2x640xf32, #tpu.memory_space<vmem>>, vector<1x40xf32>
    tpu.vector_store %arg14[%c1_425, %c240_426], %489 {strides = array<i32>} : memref<2x640xf32, #tpu.memory_space<vmem>>, vector<1x40xf32>,
    %491 = vector.extract_strided_slice %476 {offsets = [7, 0], sizes = [1, 40], strides = [1, 1]} : vector<16x40xf32> to vector<1x40xf32>
    %c1_427 = arith.constant 1 : index
    %c280_428 = arith.constant 280 : index
    %492 = vector.load %arg14[%c1_427, %c280_428] : memref<2x640xf32, #tpu.memory_space<vmem>>, vector<1x40xf32>
    tpu.vector_store %arg14[%c1_427, %c280_428], %491 {strides = array<i32>} : memref<2x640xf32, #tpu.memory_space<vmem>>, vector<1x40xf32>,
    %493 = vector.extract_strided_slice %476 {offsets = [8, 0], sizes = [1, 40], strides = [1, 1]} : vector<16x40xf32> to vector<1x40xf32>
    %c1_429 = arith.constant 1 : index
    %c320_430 = arith.constant 320 : index
    %494 = vector.load %arg14[%c1_429, %c320_430] : memref<2x640xf32, #tpu.memory_space<vmem>>, vector<1x40xf32>
    tpu.vector_store %arg14[%c1_429, %c320_430], %493 {strides = array<i32>} : memref<2x640xf32, #tpu.memory_space<vmem>>, vector<1x40xf32>,
    %495 = vector.extract_strided_slice %476 {offsets = [9, 0], sizes = [1, 40], strides = [1, 1]} : vector<16x40xf32> to vector<1x40xf32>
    %c1_431 = arith.constant 1 : index
    %c360_432 = arith.constant 360 : index
    %496 = vector.load %arg14[%c1_431, %c360_432] : memref<2x640xf32, #tpu.memory_space<vmem>>, vector<1x40xf32>
    tpu.vector_store %arg14[%c1_431, %c360_432], %495 {strides = array<i32>} : memref<2x640xf32, #tpu.memory_space<vmem>>, vector<1x40xf32>,
    %497 = vector.extract_strided_slice %476 {offsets = [10, 0], sizes = [1, 40], strides = [1, 1]} : vector<16x40xf32> to vector<1x40xf32>
    %c1_433 = arith.constant 1 : index
    %c400_434 = arith.constant 400 : index
    %498 = vector.load %arg14[%c1_433, %c400_434] : memref<2x640xf32, #tpu.memory_space<vmem>>, vector<1x40xf32>
    tpu.vector_store %arg14[%c1_433, %c400_434], %497 {strides = array<i32>} : memref<2x640xf32, #tpu.memory_space<vmem>>, vector<1x40xf32>,
    %499 = vector.extract_strided_slice %476 {offsets = [11, 0], sizes = [1, 40], strides = [1, 1]} : vector<16x40xf32> to vector<1x40xf32>
    %c1_435 = arith.constant 1 : index
    %c440_436 = arith.constant 440 : index
    %500 = vector.load %arg14[%c1_435, %c440_436] : memref<2x640xf32, #tpu.memory_space<vmem>>, vector<1x40xf32>
    tpu.vector_store %arg14[%c1_435, %c440_436], %499 {strides = array<i32>} : memref<2x640xf32, #tpu.memory_space<vmem>>, vector<1x40xf32>,
    %501 = vector.extract_strided_slice %476 {offsets = [12, 0], sizes = [1, 40], strides = [1, 1]} : vector<16x40xf32> to vector<1x40xf32>
    %c1_437 = arith.constant 1 : index
    %c480_438 = arith.constant 480 : index
    %502 = vector.load %arg14[%c1_437, %c480_438] : memref<2x640xf32, #tpu.memory_space<vmem>>, vector<1x40xf32>
    tpu.vector_store %arg14[%c1_437, %c480_438], %501 {strides = array<i32>} : memref<2x640xf32, #tpu.memory_space<vmem>>, vector<1x40xf32>,
    %503 = vector.extract_strided_slice %476 {offsets = [13, 0], sizes = [1, 40], strides = [1, 1]} : vector<16x40xf32> to vector<1x40xf32>
    %c1_439 = arith.constant 1 : index
    %c520_440 = arith.constant 520 : index
    %504 = vector.load %arg14[%c1_439, %c520_440] : memref<2x640xf32, #tpu.memory_space<vmem>>, vector<1x40xf32>
    tpu.vector_store %arg14[%c1_439, %c520_440], %503 {strides = array<i32>} : memref<2x640xf32, #tpu.memory_space<vmem>>, vector<1x40xf32>,
    %505 = vector.extract_strided_slice %476 {offsets = [14, 0], sizes = [1, 40], strides = [1, 1]} : vector<16x40xf32> to vector<1x40xf32>
    %c1_441 = arith.constant 1 : index
    %c560_442 = arith.constant 560 : index
    %506 = vector.load %arg14[%c1_441, %c560_442] : memref<2x640xf32, #tpu.memory_space<vmem>>, vector<1x40xf32>
    tpu.vector_store %arg14[%c1_441, %c560_442], %505 {strides = array<i32>} : memref<2x640xf32, #tpu.memory_space<vmem>>, vector<1x40xf32>,
    %507 = vector.extract_strided_slice %476 {offsets = [15, 0], sizes = [1, 40], strides = [1, 1]} : vector<16x40xf32> to vector<1x40xf32>
    %c1_443 = arith.constant 1 : index
    %c600_444 = arith.constant 600 : index
    %508 = vector.load %arg14[%c1_443, %c600_444] : memref<2x640xf32, #tpu.memory_space<vmem>>, vector<1x40xf32>
    tpu.vector_store %arg14[%c1_443, %c600_444], %507 {strides = array<i32>} : memref<2x640xf32, #tpu.memory_space<vmem>>, vector<1x40xf32>,
    %c0_445 = arith.constant 0 : index
    %c0_446 = arith.constant 0 : index
    %509 = vector.load %arg14[%c0_445, %c0_446] : memref<2x640xf32, #tpu.memory_space<vmem>>, vector<2x640xf32>
    %510 = arith.truncf %509 : vector<2x640xf32> to vector<2x640xbf16>
    %c0_447 = arith.constant 0 : index
    %c0_448 = arith.constant 0 : index
    %511 = vector.load %arg6[%c0_447, %c0_448] : memref<640x120xbf16, #tpu.memory_space<vmem>>, vector<640x120xbf16>
    %cst_449 = arith.constant dense<0.000000e+00> : vector<2x120xf32>
    %512 = tpu.matmul %510, %511, %cst_449 {dimension_numbers = #tpu.dot_dimension_numbers<[1], [0], [0], [1], [0, 0, 1, 1], [], []>} : vector<2x640xbf16>, vector<640x120xbf16>, vector<2x120xf32> -> vector<2x120xf32>
    %c0_450 = arith.constant 0 : index
    %c0_451 = arith.constant 0 : index
    %513 = vector.load %arg7[%c0_450, %c0_451] : memref<1x120xf32, #tpu.memory_space<vmem>>, vector<1x120xf32>
    %514 = vector.broadcast %513 : vector<1x120xf32> to vector<2x120xf32>
    %515 = arith.addf %512, %514 : vector<2x120xf32>
    %cst_452 = arith.constant 0.000000e+00 : f32
    %516 = vector.broadcast %cst_452 : f32 to vector<2x120xf32>
    %517 = arith.maximumf %515, %516 : vector<2x120xf32>
    %518 = arith.truncf %517 : vector<2x120xf32> to vector<2x120xbf16>
    %c0_453 = arith.constant 0 : index
    %c0_454 = arith.constant 0 : index
    %519 = vector.load %arg8[%c0_453, %c0_454] : memref<120x84xbf16, #tpu.memory_space<vmem>>, vector<120x84xbf16>
    %cst_455 = arith.constant dense<0.000000e+00> : vector<2x84xf32>
    %520 = tpu.matmul %518, %519, %cst_455 {dimension_numbers = #tpu.dot_dimension_numbers<[1], [0], [0], [1], [0, 0, 1, 1], [], []>} : vector<2x120xbf16>, vector<120x84xbf16>, vector<2x84xf32> -> vector<2x84xf32>
    %c0_456 = arith.constant 0 : index
    %c0_457 = arith.constant 0 : index
    %521 = vector.load %arg9[%c0_456, %c0_457] : memref<1x84xf32, #tpu.memory_space<vmem>>, vector<1x84xf32>
    %522 = vector.broadcast %521 : vector<1x84xf32> to vector<2x84xf32>
    %523 = arith.addf %520, %522 : vector<2x84xf32>
    %cst_458 = arith.constant 0.000000e+00 : f32
    %524 = vector.broadcast %cst_458 : f32 to vector<2x84xf32>
    %525 = arith.maximumf %523, %524 : vector<2x84xf32>
    %526 = arith.truncf %525 : vector<2x84xf32> to vector<2x84xbf16>
    %c0_459 = arith.constant 0 : index
    %c0_460 = arith.constant 0 : index
    %527 = vector.load %arg10[%c0_459, %c0_460] : memref<84x1xbf16, #tpu.memory_space<vmem>>, vector<84x1xbf16>
    %cst_461 = arith.constant dense<0.000000e+00> : vector<2x1xf32>
    %528 = tpu.matmul %526, %527, %cst_461 {dimension_numbers = #tpu.dot_dimension_numbers<[1], [0], [0], [1], [0, 0, 1, 1], [], []>} : vector<2x84xbf16>, vector<84x1xbf16>, vector<2x1xf32> -> vector<2x1xf32>
    %c0_462 = arith.constant 0 : index
    %c0_463 = arith.constant 0 : index
    %529 = vector.load %arg11[%c0_462, %c0_463] : memref<1x1xf32, #tpu.memory_space<vmem>>, vector<1x1xf32>
    %530 = vector.broadcast %529 : vector<1x1xf32> to vector<2x1xf32>
    %531 = arith.addf %528, %530 : vector<2x1xf32>
    %c0_464 = arith.constant 0 : index
    %c0_465 = arith.constant 0 : index
    %532 = vector.load %arg12[%c0_464, %c0_465] : memref<2x1xf32, #tpu.memory_space<vmem>>, vector<2x1xf32>
    tpu.vector_store %arg12[%c0_464, %c0_465], %531 {strides = array<i32>} : memref<2x1xf32, #tpu.memory_space<vmem>>, vector<2x1xf32>,
    return
  }
  func.func @transform_0(%arg0: i32) -> (i32, i32) {
    %c0_i32 = arith.constant 0 : i32
    %c0_i32_0 = arith.constant 0 : i32
    %c0_i32_1 = arith.constant 0 : i32
    return %c0_i32, %c0_i32_0 : i32, i32
  }
  func.func @transform_1(%arg0: i32) -> (i32, i32) {
    %c0_i32 = arith.constant 0 : i32
    %c0_i32_0 = arith.constant 0 : i32
    %c0_i32_1 = arith.constant 0 : i32
    return %c0_i32, %c0_i32_0 : i32, i32
  }
  func.func @transform_2(%arg0: i32) -> (i32, i32) {
    %c0_i32 = arith.constant 0 : i32
    %c0_i32_0 = arith.constant 0 : i32
    %c0_i32_1 = arith.constant 0 : i32
    return %c0_i32, %c0_i32_0 : i32, i32
  }
  func.func @transform_3(%arg0: i32) -> (i32, i32) {
    %c0_i32 = arith.constant 0 : i32
    %c0_i32_0 = arith.constant 0 : i32
    %c0_i32_1 = arith.constant 0 : i32
    return %c0_i32, %c0_i32_0 : i32, i32
  }
  func.func @transform_4(%arg0: i32) -> (i32, i32) {
    %c0_i32 = arith.constant 0 : i32
    %c0_i32_0 = arith.constant 0 : i32
    %c0_i32_1 = arith.constant 0 : i32
    return %c0_i32, %c0_i32_0 : i32, i32
  }
  func.func @transform_5(%arg0: i32) -> (i32, i32) {
    %c0_i32 = arith.constant 0 : i32
    %c0_i32_0 = arith.constant 0 : i32
    %c0_i32_1 = arith.constant 0 : i32
    return %c0_i32, %c0_i32_0 : i32, i32
  }
  func.func @transform_6(%arg0: i32) -> (i32, i32) {
    %c0_i32 = arith.constant 0 : i32
    %c0_i32_0 = arith.constant 0 : i32
    %c0_i32_1 = arith.constant 0 : i32
    return %c0_i32, %c0_i32_0 : i32, i32
  }
  func.func @transform_7(%arg0: i32) -> (i32, i32) {
    %c0_i32 = arith.constant 0 : i32
    %c0_i32_0 = arith.constant 0 : i32
    %c0_i32_1 = arith.constant 0 : i32
    return %c0_i32, %c0_i32_0 : i32, i32
  }
  func.func @transform_8(%arg0: i32) -> (i32, i32) {
    %c0_i32 = arith.constant 0 : i32
    %c0_i32_0 = arith.constant 0 : i32
    %c0_i32_1 = arith.constant 0 : i32
    return %c0_i32, %c0_i32_0 : i32, i32
  }
  func.func @transform_9(%arg0: i32) -> (i32, i32) {
    %c0_i32 = arith.constant 0 : i32
    %c0_i32_0 = arith.constant 0 : i32
    %c0_i32_1 = arith.constant 0 : i32
    return %c0_i32, %c0_i32_0 : i32, i32
  }
  func.func @transform_10(%arg0: i32) -> (i32, i32) {
    %c0_i32 = arith.constant 0 : i32
    %c0_i32_0 = arith.constant 0 : i32
    %c0_i32_1 = arith.constant 0 : i32
    return %c0_i32, %c0_i32_0 : i32, i32
  }
  func.func @transform_11(%arg0: i32) -> (i32, i32) {
    %c0_i32 = arith.constant 0 : i32
    %c0_i32_0 = arith.constant 0 : i32
    %c0_i32_1 = arith.constant 0 : i32
    return %c0_i32, %c0_i32_0 : i32, i32
  }
}

</mosaic_0001>

<bundles_post_ra>
// kernel: net_forward.1
= control target key start
LH: loop header
LB: loop body
LE: loop exit
PB: predicated region body
PF: predicated region fallthrough
CT: control target
= control target key end

     0   :  { %v3295_v3 = vmov 0   ;;  %vm522_vm0 = vcmask 654336   ;;  %vm880_vm1 = vcmask 326656   ;;  %s4893_s20 = smov 64   ;;  %s4910_s21 = smov 72   ;;  %vm892_vm2 = vcmask 654656   ;;  %s4865_s0 = inlined_call_operand.vmem [shape: bf16[80,2048], index: 0, kind: input, shape index: {}]   ;;  %s4866_s1 = inlined_call_operand.vmem [shape: bf16[8,80], index: 1, kind: input, shape index: {}]   ;;  %s4867_s2 = inlined_call_operand.vmem [shape: f32[8,1], index: 2, kind: input, shape index: {}]   ;;  %s4868_s3 = inlined_call_operand.vmem [shape: bf16[16,200], index: 3, kind: input, shape index: {}]   ;;  %s4869_s4 = inlined_call_operand.vmem [shape: f32[16,1], index: 4, kind: input, shape index: {}]   ;;  %s4870_s5 = inlined_call_operand.vmem [shape: bf16[640,120], index: 5, kind: input, shape index: {}]   ;;  %s4871_s7 = inlined_call_operand.vmem [shape: bf16[120,84], index: 7, kind: input, shape index: {}]   ;;  %s4872_s9 = inlined_call_operand.vmem [shape: bf16[84,1], index: 9, kind: input, shape index: {}]   ;;  %s4873_s6 = inlined_call_operand.vmem [shape: f32[1,120], index: 6, kind: input, shape index: {}]   ;;  %s4874_s10 = inlined_call_operand.<no memory space> [shape: f32[1,1], index: 10, kind: input, shape index: {}]   ;;  %s4875_s8 = inlined_call_operand.vmem [shape: f32[1,84], index: 8, kind: input, shape index: {}]   ;;  %s4876_s11 = inlined_call_operand.vmem [shape: f32[2,1], index: 11, kind: output, shape index: {}]  }
   0x1   :  { %v42_v0 = vld [vmem:[%s4865_s0] sm:$0xff]  ;;  %v44_v2 = vld [vmem:[%s4865_s0 + $0x10] sm:$0xff]  ;;  %558 = vmatprep.mubr.bf16.mxu1 %v3295_v3  ;;  %640 = vmatprep.mubr.bf16.mxu0 %v3295_v3  ;;  %v43_v39 = vld [vmem:[%s4865_s0 + $0x8] sm:$0xff]  ;;  %s4929_s22 = smov 39   ;;  %s4887_s23 = smov 71   ;;  %vm903_vm3 = vcmask 982656  }
   0x2   :  { %v50_v1 = vld [vmem:[%s4865_s0 + $0x40] sm:$0xff]  ;;  %v52_v5 = vld [vmem:[%s4865_s0 + $0x50] sm:$0xff]  ;;  %3235 = vset.pattern.permute.xlu0 %v3295_v3  ;;  %3236 = vset.pattern.permute.xlu1 %v3295_v3  ;;  %v51_v40 = vld [vmem:[%s4865_s0 + $0x48] sm:$0xff]  ;;  %s4924_s24 = smov 127   ;;  %s4885_s25 = smov 7   ;;  %vm916_vm4 = vcmask 1048512  }
   0x3   :  { %v2891_v4 = vcombine.high %v42_v0, %v50_v1  ;;  %v2890_v6 = vcombine.low %v42_v0, %v50_v1  ;;  %v58_v7 = vld [vmem:[%s4865_s0 + $0x80] sm:$0xff]  ;;  %v2895_v9 = vcombine.high %v44_v2, %v52_v5  ;;  %v2894_v10 = vcombine.low %v44_v2, %v52_v5  ;;  %v60_v12 = vld [vmem:[%s4865_s0 + $0x90] sm:$0xff]  ;;  %v59_v47 = vld [vmem:[%s4865_s0 + $0x88] sm:$0xff]  ;;  %s4923_s26 = smov 63   ;;  %s4881_s27 = smov 70  }
   0x4   :  { %v66_v8 = vld [vmem:[%s4865_s0 + $0xc0] sm:$0xff]  ;;  %v68_v13 = vld [vmem:[%s4865_s0 + $0xd0] sm:$0xff]  ;;  %v2893_v45 = vcombine.high %v43_v39, %v51_v40  ;;  %v67_v48 = vld [vmem:[%s4865_s0 + $0xc8] sm:$0xff]  ;;  %v2892_v52 = vcombine.low %v43_v39, %v51_v40  ;;  %s4932_s28 = smov 103   ;;  %s4883_s29 = smov 120   ;;  %vm886_vm5 = vcmask 589056  }
   0x5   :  { %v2907_v11 = vcombine.high %v58_v7, %v66_v8  ;;  %v74_v14 = vld [vmem:[%s4865_s0 + $0x100] sm:$0xff]  ;;  %526 = vmatprep.subr.bf16.mxu1 %v2891_v4  ;;  %v2911_v15 = vcombine.high %v60_v12, %v68_v13  ;;  %v76_v17 = vld [vmem:[%s4865_s0 + $0x110] sm:$0xff]  ;;  %608 = vmatprep.subr.bf16.mxu0 %v2895_v9  ;;  %v2906_v19 = vcombine.low %v58_v7, %v66_v8  ;;  %v75_v56 = vld [vmem:[%s4865_s0 + $0x108] sm:$0xff]  ;;  %s3309_s30 = smov 38   ;;  %s4879_s12 = smov 94   ;;  %vm911_vm6 = vcmask 195584  }
   0x6   :  { %v82_v16 = vld [vmem:[%s4865_s0 + $0x140] sm:$0xff]  ;;  %v84_v18 = vld [vmem:[%s4865_s0 + $0x150] sm:$0xff]  ;;  %527 = vmatpush1.bf16.msra.mxu1 %v2890_v6  ;;  %609 = vmatpush1.bf16.msra.mxu0 %v2894_v10  ;;  %v2910_v20 = vcombine.low %v60_v12, %v68_v13  ;;  %v2909_v54 = vcombine.high %v59_v47, %v67_v48  ;;  %v83_v57 = vld [vmem:[%s4865_s0 + $0x148] sm:$0xff]  ;;  %v2908_v60 = vcombine.low %v59_v47, %v67_v48  ;;  %s4922_s13 = smov 126   ;;  %s4877_s14 = smov 88   ;;  %vm897_vm7 = vcmask 917056  }
   0x7   :  { %528 = vmatprep.subr.bf16.mxu1 %v2907_v11  ;;  %v2923_v21 = vcombine.high %v74_v14, %v82_v16  ;;  %610 = vmatprep.subr.bf16.mxu0 %v2911_v15  ;;  %v2927_v22 = vcombine.high %v76_v17, %v84_v18  ;;  %v90_v23 = vld [vmem:[%s4865_s0 + $0x180] sm:$0xff]  ;;  %v92_v25 = vld [vmem:[%s4865_s0 + $0x190] sm:$0xff]  ;;  %v2922_v27 = vcombine.low %v74_v14, %v82_v16  ;;  %v91_v0 = vld [vmem:[%s4865_s0 + $0x188] sm:$0xff]  ;;  %s4902_s15 = smov 48   ;;  %s4907_s16 = smov 111   ;;  %vm923_vm8 = vcmask 523456  }
   0x8   :  { %v98_v24 = vld [vmem:[%s4865_s0 + $0x1c0] sm:$0xff]  ;;  %v100_v26 = vld [vmem:[%s4865_s0 + $0x1d0] sm:$0xff]  ;;  %v2926_v28 = vcombine.low %v76_v17, %v84_v18  ;;  %v2925_v62 = vcombine.high %v75_v56, %v83_v57  ;;  %v99_v1 = vld [vmem:[%s4865_s0 + $0x1c8] sm:$0xff]  ;;  %v2924_v6 = vcombine.low %v75_v56, %v83_v57  ;;  %s4891_s17 = smov 56   ;;  %s4904_s18 = smov 47   ;;  %vm1713_vm9 = vcmask 588800  }
   0x9   :  { %v2939_v29 = vcombine.high %v90_v23, %v98_v24  ;;  %v2943_v30 = vcombine.high %v92_v25, %v100_v26  ;;  %v106_v31 = vld [vmem:[%s4865_s0 + $0x200] sm:$0xff]  ;;  %v108_v33 = vld [vmem:[%s4865_s0 + $0x210] sm:$0xff]  ;;  %v2938_v35 = vcombine.low %v90_v23, %v98_v24  ;;  %v2942_v36 = vcombine.low %v92_v25, %v100_v26  ;;  %v107_v10 = vld [vmem:[%s4865_s0 + $0x208] sm:$0xff]  ;;  %s4895_s19 = smov 119  }
   0xa   :  { %529 = vmatpush1.bf16.msra.mxu1 %v2906_v19  ;;  %611 = vmatpush1.bf16.msra.mxu0 %v2910_v20  ;;  %v114_v32 = vld [vmem:[%s4865_s0 + $0x240] sm:$0xff]  ;;  %v116_v34 = vld [vmem:[%s4865_s0 + $0x250] sm:$0xff]  ;;  %v2941_v8 = vcombine.high %v91_v0, %v99_v1  ;;  %v115_v11 = vld [vmem:[%s4865_s0 + $0x248] sm:$0xff]  ;;  %v2940_v14 = vcombine.low %v91_v0, %v99_v1  ;;  %vm909_vm10 = vcmask 1048448   ;;  %vm918_vm11 = vcmask 261120  }
   0xb   :  { %530 = vmatprep.subr.bf16.mxu1 %v2923_v21  ;;  %612 = vmatprep.subr.bf16.mxu0 %v2927_v22  ;;  %v2955_v37 = vcombine.high %v106_v31, %v114_v32  ;;  %v2959_v38 = vcombine.high %v108_v33, %v116_v34  ;;  %v46_v41 = vld [vmem:[%s4865_s0 + $0x20] sm:$0xff]  ;;  %v2954_v43 = vcombine.low %v106_v31, %v114_v32  ;;  %v45_v18 = vld [vmem:[%s4865_s0 + $0x18] sm:$0xff]  ;;  %v48_v20 = vld [vmem:[%s4865_s0 + $0x30] sm:$0xff]  ;;  %vm1717_vm12 = vcmask 1043456  }
   0xc   :  { %v54_v42 = vld [vmem:[%s4865_s0 + $0x60] sm:$0xff]  ;;  %v2958_v44 = vcombine.low %v108_v33, %v116_v34  ;;  %v2957_v16 = vcombine.high %v107_v10, %v115_v11  ;;  %v53_v19 = vld [vmem:[%s4865_s0 + $0x58] sm:$0xff]  ;;  %v56_v21 = vld [vmem:[%s4865_s0 + $0x70] sm:$0xff]  ;;  %v2956_v22 = vcombine.low %v107_v10, %v115_v11  ;;  %vm1827_vm13 = vcmask 719872  }
   0xd   :  { %v2899_v46 = vcombine.high %v46_v41, %v54_v42  ;;  %v62_v49 = vld [vmem:[%s4865_s0 + $0xa0] sm:$0xff]  ;;  %v2898_v53 = vcombine.low %v46_v41, %v54_v42  ;;  %v2897_v24 = vcombine.high %v45_v18, %v53_v19  ;;  %v2903_v25 = vcombine.high %v48_v20, %v56_v21  ;;  %v61_v26 = vld [vmem:[%s4865_s0 + $0x98] sm:$0xff]  ;;  %v63_v0 = vld [vmem:[%s4865_s0 + $0xa8] sm:$0xff] }
   0xe   :  { %531 = vmatpush1.bf16.msra.mxu1 %v2922_v27  ;;  %613 = vmatpush1.bf16.msra.mxu0 %v2926_v28  ;;  %v70_v50 = vld [vmem:[%s4865_s0 + $0xe0] sm:$0xff]  ;;  %v69_v27 = vld [vmem:[%s4865_s0 + $0xd8] sm:$0xff]  ;;  %v64_v28 = vld [vmem:[%s4865_s0 + $0xb0] sm:$0xff]  ;;  %v2902_v31 = vcombine.low %v48_v20, %v56_v21  ;;  %vm2037_vm14 = vcmask 392192   ;;  %vm1860_vm15 = vcmask 319488  }
   0xf   :  { %532 = vmatprep.subr.bf16.mxu1 %v2939_v29  ;;  %614 = vmatprep.subr.bf16.mxu0 %v2943_v30  ;;  %v3497_v51 = vld [vmem:[%s4866_s1] sm:$0xf]  ;;  %v2915_v55 = vcombine.high %v62_v49, %v70_v50  ;;  %v2914_v61 = vcombine.low %v62_v49, %v70_v50  ;;  %v72_v29 = vld [vmem:[%s4865_s0 + $0xf0] sm:$0xff]  ;;  %v2896_v30 = vcombine.low %v45_v18, %v53_v19  ;;  %v77_v34 = vld [vmem:[%s4865_s0 + $0x118] sm:$0xff]  ;;  %s4889_s1 = smov 8  }
  0x10   :  { %v78_v58 = vld [vmem:[%s4865_s0 + $0x120] sm:$0xff]  ;;  %v2913_v32 = vcombine.high %v61_v26, %v69_v27  ;;  %v2919_v33 = vcombine.high %v64_v28, %v72_v29  ;;  %v2918_v39 = vcombine.low %v64_v28, %v72_v29  ;;  %v93_v42 = vld [vmem:[%s4865_s0 + $0x198] sm:$0xff]  ;;  %v71_v1 = vld [vmem:[%s4865_s0 + $0xe8] sm:$0xff] }
  0x11   :  { %v86_v59 = vld [vmem:[%s4865_s0 + $0x160] sm:$0xff]  ;;  %v109_v50 = vld [vmem:[%s4865_s0 + $0x218] sm:$0xff]  ;;  %v103_v10 = vld [vmem:[%s4865_s0 + $0x1e8] sm:$0xff] }
  0x12   :  { %533 = vmatpush1.bf16.msra.mxu1 %v2938_v35  ;;  %615 = vmatpush1.bf16.msra.mxu0 %v2942_v36  ;;  %v2931_v63 = vcombine.high %v78_v58, %v86_v59  ;;  %v94_v2 = vld [vmem:[%s4865_s0 + $0x1a0] sm:$0xff]  ;;  %v2930_v7 = vcombine.low %v78_v58, %v86_v59  ;;  %v85_v35 = vld [vmem:[%s4865_s0 + $0x158] sm:$0xff]  ;;  %v80_v36 = vld [vmem:[%s4865_s0 + $0x130] sm:$0xff] }
  0x13   :  { %534 = vmatprep.subr.bf16.mxu1 %v2955_v37  ;;  %616 = vmatprep.subr.bf16.mxu0 %v2959_v38  ;;  %v102_v4 = vld [vmem:[%s4865_s0 + $0x1e0] sm:$0xff]  ;;  %v88_v37 = vld [vmem:[%s4865_s0 + $0x170] sm:$0xff]  ;;  %v2912_v38 = vcombine.low %v61_v26, %v69_v27  ;;  %v2929_v40 = vcombine.high %v77_v34, %v85_v35  ;;  %v47_v59 = vld [vmem:[%s4865_s0 + $0x28] sm:$0xff] }
  0x14   :  { %v866_v5 = vld [vmem:[%s4867_s2] sm:$0xff]  ;;  %v2947_v9 = vcombine.high %v94_v2, %v102_v4  ;;  %v2946_v15 = vcombine.low %v94_v2, %v102_v4  ;;  %v2935_v41 = vcombine.high %v80_v36, %v88_v37  ;;  %v2934_v47 = vcombine.low %v80_v36, %v88_v37  ;;  %v57_v18 = vld [vmem:[%s4865_s0 + $0x78] sm:$0xff]  ;;  %s3299_s2 = smov 104  }
  0x15   :  { %869 = vperm.xlu0 %3235, %v866_v5   ;;  %v110_v12 = vld [vmem:[%s4865_s0 + $0x220] sm:$0xff]  ;;  %v2917_v4 = vcombine.high %v63_v0, %v71_v1  ;;  %v79_v5 = vld [vmem:[%s4865_s0 + $0x128] sm:$0xff]  ;;  %v65_v21 = vld [vmem:[%s4865_s0 + $0xb8] sm:$0xff] }
  0x16   :  { %535 = vmatpush1.bf16.msra.mxu1 %v2954_v43  ;;  %617 = vmatpush1.bf16.msra.mxu0 %v2958_v44  ;;  %v118_v13 = vld [vmem:[%s4865_s0 + $0x260] sm:$0xff]  ;;  %v101_v43 = vld [vmem:[%s4865_s0 + $0x1d8] sm:$0xff]  ;;  %v96_v44 = vld [vmem:[%s4865_s0 + $0x1b0] sm:$0xff] }
  0x17   :  { %567 = vmatprep.subr.bf16.mxu1 %v2893_v45  ;;  %690 = vmatprep.subr.bf16.mxu0 %v2899_v46  ;;  %v2963_v17 = vcombine.high %v110_v12, %v118_v13  ;;  %v2962_v23 = vcombine.low %v110_v12, %v118_v13  ;;  %v104_v45 = vld [vmem:[%s4865_s0 + $0x1f0] sm:$0xff]  ;;  %v2928_v46 = vcombine.low %v77_v34, %v85_v35  ;;  %v111_v13 = vld [vmem:[%s4865_s0 + $0x228] sm:$0xff]  ;;  %v89_v26 = vld [vmem:[%s4865_s0 + $0x178] sm:$0xff] }
  0x18   :  { %v2945_v48 = vcombine.high %v93_v42, %v101_v43  ;;  %v2951_v49 = vcombine.high %v96_v44, %v104_v45  ;;  %v2950_v56 = vcombine.low %v96_v44, %v104_v45  ;;  %v97_v29 = vld [vmem:[%s4865_s0 + $0x1b8] sm:$0xff] }
  0x19   :  { %2970 = vmatmul.mubr.msk.bf16.vlgmr.msra.gmra.mrb[0].mxu1 %vm522_vm0, %v3497_v51  ;;  %2972 = vmatmul.mubr.msk.bf16.vlgmr.msra.gmra.mrb[0].mxu0 %vm522_vm0, %v3497_v51  ;;  %v121_v34 = vld [vmem:[%s4865_s0 + $0x278] sm:$0xff] }
  0x1a   :  { %568 = vmatpush1.bf16.msra.mxu1 %v2892_v52  ;;  %691 = vmatpush1.bf16.msra.mxu0 %v2898_v53  ;;  %v117_v52 = vld [vmem:[%s4865_s0 + $0x258] sm:$0xff]  ;;  %v112_v53 = vld [vmem:[%s4865_s0 + $0x230] sm:$0xff] }
  0x1b   :  { %569 = vmatprep.subr.bf16.mxu1 %v2909_v54  ;;  %692 = vmatprep.subr.bf16.mxu0 %v2915_v55  ;;  %v120_v54 = vld [vmem:[%s4865_s0 + $0x270] sm:$0xff]  ;;  %v2944_v55 = vcombine.low %v93_v42, %v101_v43  ;;  %v2961_v57 = vcombine.high %v109_v50, %v117_v52 }
  0x1c   :  { %722 = vmatprep.mubr.bf16.mxu0 %v3295_v3  ;;  %599 = vmatprep.mubr.bf16.mxu1 %v3295_v3  ;;  %v2967_v58 = vcombine.high %v112_v53, %v120_v54 }
  0x1e   :  { %570 = vmatpush1.bf16.msra.mxu1 %v2908_v60  ;;  %693 = vmatpush1.bf16.msra.mxu0 %v2914_v61  ;;  %v55_v60 = vld [vmem:[%s4865_s0 + $0x68] sm:$0xff]  ;;  %v2960_v61 = vcombine.low %v109_v50, %v117_v52 }
  0x1f   :  { %571 = vmatprep.subr.bf16.mxu1 %v2925_v62  ;;  %694 = vmatprep.subr.bf16.mxu0 %v2931_v63  ;;  %v2966_v62 = vcombine.low %v112_v53, %v120_v54  ;;  %v2901_v63 = vcombine.high %v47_v59, %v55_v60  ;;  %v2900_v2 = vcombine.low %v47_v59, %v55_v60 }
  0x22   :  { %572 = vmatpush1.bf16.msra.mxu1 %v2924_v6  ;;  %695 = vmatpush1.bf16.msra.mxu0 %v2930_v7  ;;  %v87_v6 = vld [vmem:[%s4865_s0 + $0x168] sm:$0xff]  ;;  %v2916_v7 = vcombine.low %v63_v0, %v71_v1 }
  0x23   :  { %573 = vmatprep.subr.bf16.mxu1 %v2941_v8  ;;  %696 = vmatprep.subr.bf16.mxu0 %v2947_v9  ;;  %v2933_v8 = vcombine.high %v79_v5, %v87_v6  ;;  %v95_v9 = vld [vmem:[%s4865_s0 + $0x1a8] sm:$0xff]  ;;  %v2932_v11 = vcombine.low %v79_v5, %v87_v6 }
  0x24   :  { %v2949_v12 = vcombine.high %v95_v9, %v103_v10 }
  0x26   :  { %574 = vmatpush1.bf16.msra.mxu1 %v2940_v14  ;;  %697 = vmatpush1.bf16.msra.mxu0 %v2946_v15  ;;  %v119_v14 = vld [vmem:[%s4865_s0 + $0x268] sm:$0xff]  ;;  %v2948_v15 = vcombine.low %v95_v9, %v103_v10 }
  0x27   :  { %575 = vmatprep.subr.bf16.mxu1 %v2957_v16  ;;  %698 = vmatprep.subr.bf16.mxu0 %v2963_v17  ;;  %v2965_v16 = vcombine.high %v111_v13, %v119_v14  ;;  %v49_v17 = vld [vmem:[%s4865_s0 + $0x38] sm:$0xff]  ;;  %v2964_v19 = vcombine.low %v111_v13, %v119_v14 }
  0x28   :  { %v2905_v20 = vcombine.high %v49_v17, %v57_v18 }
  0x2a   :  { %576 = vmatpush1.bf16.msra.mxu1 %v2956_v22  ;;  %699 = vmatpush1.bf16.msra.mxu0 %v2962_v23  ;;  %v73_v22 = vld [vmem:[%s4865_s0 + $0xf8] sm:$0xff]  ;;  %v2904_v23 = vcombine.low %v49_v17, %v57_v18 }
  0x2b   :  { %649 = vmatprep.subr.bf16.mxu1 %v2897_v24  ;;  %772 = vmatprep.subr.bf16.mxu0 %v2903_v25  ;;  %v2921_v24 = vcombine.high %v65_v21, %v73_v22  ;;  %v81_v25 = vld [vmem:[%s4865_s0 + $0x138] sm:$0xff]  ;;  %v2920_v27 = vcombine.low %v65_v21, %v73_v22 }
  0x2c   :  { %v2937_v28 = vcombine.high %v81_v25, %v89_v26 }
  0x2d   :  { %2971 = vmatmul.mubr.msk.bf16.vlgmr.msra.gmra.mrb[4].mxu1 %vm522_vm0, %v3497_v51  ;;  %2974 = vmatmul.mubr.msk.bf16.vlgmr.msra.gmra.mrb[4].mxu0 %vm522_vm0, %v3497_v51 }
  0x2e   :  { %650 = vmatpush1.bf16.msra.mxu1 %v2896_v30  ;;  %773 = vmatpush1.bf16.msra.mxu0 %v2902_v31  ;;  %v105_v30 = vld [vmem:[%s4865_s0 + $0x1f8] sm:$0xff]  ;;  %v2936_v31 = vcombine.low %v81_v25, %v89_v26 }
  0x2f   :  { %651 = vmatprep.subr.bf16.mxu1 %v2913_v32  ;;  %774 = vmatprep.subr.bf16.mxu0 %v2919_v33  ;;  %v2953_v32 = vcombine.high %v97_v29, %v105_v30  ;;  %v113_v33 = vld [vmem:[%s4865_s0 + $0x238] sm:$0xff]  ;;  %v2952_v35 = vcombine.low %v97_v29, %v105_v30  ;;  %s4925_s0 = smov 102  }
  0x30   :  { %804 = vmatprep.mubr.bf16.mxu0 %v3295_v3  ;;  %681 = vmatprep.mubr.bf16.mxu1 %v3295_v3  ;;  %v2969_v36 = vcombine.high %v113_v33, %v121_v34  ;;  %v2968_v37 = vcombine.low %v113_v33, %v121_v34 }
  0x32   :  { %652 = vmatpush1.bf16.msra.mxu1 %v2912_v38  ;;  %775 = vmatpush1.bf16.msra.mxu0 %v2918_v39 }
  0x33   :  { %653 = vmatprep.subr.bf16.mxu1 %v2929_v40  ;;  %776 = vmatprep.subr.bf16.mxu0 %v2935_v41 }
  0x36   :  { %654 = vmatpush1.bf16.msra.mxu1 %v2928_v46  ;;  %777 = vmatpush1.bf16.msra.mxu0 %v2934_v47 }
  0x37   :  { %655 = vmatprep.subr.bf16.mxu1 %v2945_v48  ;;  %778 = vmatprep.subr.bf16.mxu0 %v2951_v49 }
  0x3a   :  { %656 = vmatpush1.bf16.msra.mxu1 %v2944_v55  ;;  %779 = vmatpush1.bf16.msra.mxu0 %v2950_v56 }
  0x3b   :  { %657 = vmatprep.subr.bf16.mxu1 %v2961_v57  ;;  %780 = vmatprep.subr.bf16.mxu0 %v2967_v58 }
  0x3e   :  { %658 = vmatpush1.bf16.msra.mxu1 %v2960_v61  ;;  %781 = vmatpush1.bf16.msra.mxu0 %v2966_v62 }
  0x3f   :  { %731 = vmatprep.subr.bf16.mxu1 %v2901_v63 }
  0x41   :  { %2973 = vmatmul.mubr.msk.bf16.vlgmr.msra.gmra.mrb[8].mxu1 %vm522_vm0, %v3497_v51  ;;  %2976 = vmatmul.mubr.msk.bf16.vlgmr.msra.gmra.mrb[8].mxu0 %vm522_vm0, %v3497_v51 }
  0x42   :  { %732 = vmatpush1.bf16.msra.mxu1 %v2900_v2  ;;  %763 = vmatprep.mubr.bf16.mxu1 %v3295_v3 }
  0x43   :  { %733 = vmatprep.subr.bf16.mxu1 %v2917_v4 }
  0x46   :  { %734 = vmatpush1.bf16.msra.mxu1 %v2916_v7 }
  0x47   :  { %735 = vmatprep.subr.bf16.mxu1 %v2933_v8 }
  0x4a   :  { %736 = vmatpush1.bf16.msra.mxu1 %v2932_v11 }
  0x4b   :  { %737 = vmatprep.subr.bf16.mxu1 %v2949_v12 }
  0x4e   :  { %738 = vmatpush1.bf16.msra.mxu1 %v2948_v15 }
  0x4f   :  { %739 = vmatprep.subr.bf16.mxu1 %v2965_v16 }
  0x52   :  { %740 = vmatpush1.bf16.msra.mxu1 %v2964_v19 }
  0x53   :  { %813 = vmatprep.subr.bf16.mxu1 %v2905_v20 }
  0x55   :  { %2975 = vmatmul.mubr.msk.bf16.vlgmr.msra.gmra.mrb[12].mxu1 %vm522_vm0, %v3497_v51 }
  0x56   :  { %814 = vmatpush1.bf16.msra.mxu1 %v2904_v23  ;;  %845 = vmatprep.mubr.bf16.mxu1 %v3295_v3 }
  0x57   :  { %815 = vmatprep.subr.bf16.mxu1 %v2921_v24 }
  0x5a   :  { %816 = vmatpush1.bf16.msra.mxu1 %v2920_v27 }
  0x5b   :  { %817 = vmatprep.subr.bf16.mxu1 %v2937_v28 }
  0x5e   :  { %818 = vmatpush1.bf16.msra.mxu1 %v2936_v31 }
  0x5f   :  { %819 = vmatprep.subr.bf16.mxu1 %v2953_v32 }
  0x62   :  { %820 = vmatpush1.bf16.msra.mxu1 %v2952_v35 }
  0x63   :  { %821 = vmatprep.subr.bf16.mxu1 %v2969_v36 }
  0x66   :  { %822 = vmatpush1.bf16.msra.mxu1 %v2968_v37 }
  0x67   :  { %1770 = vmatprep.subr.bf16.mxu1 %v3295_v3 }
  0x69   :  { %2977 = vmatmul.mubr.msk.bf16.vlgmr.msra.gmra.mrb[16].mxu1 %vm522_vm0, %v3497_v51 }
  0x94   :  { %v3685_v56 = vpop.permute.xlu0 %869 }
  0xec   :  { %v560_v38 = vpop.f32.mrb[0].mxu1  ;;  %v642_v39 = vpop.f32.mrb[0].mxu0 }
  0xed   :  { %v562_v40 = vpop.f32.mrb[1].mxu1  ;;  %v854_v41 = vmax.f32 %v560_v38, %v642_v39  ;;  %v644_v42 = vpop.f32.mrb[1].mxu0 }
  0xee   :  { %v564_v43 = vpop.f32.mrb[2].mxu1  ;;  %v855_v44 = vmax.f32 %v562_v40, %v644_v42  ;;  %v646_v45 = vpop.f32.mrb[2].mxu0 }
  0xef   :  { %v565_v46 = vpop.f32.mrb[3].mxu1  ;;  %v647_v47 = vpop.f32.mrb[3].mxu0 }
 0x100   :  { %v3681_v48 = vpop.f32.mrb[4].mxu1  ;;  %v724_v49 = vpop.f32.mrb[4].mxu0 }
 0x101   :  { %v3683_v50 = vpop.f32.mrb[5].mxu1  ;;  %v726_v52 = vpop.f32.mrb[5].mxu0 }
 0x102   :  { %v605_v53 = vpop.f32.mrb[6].mxu1  ;;  %v728_v54 = vpop.f32.mrb[6].mxu0 }
 0x103   :  { %v606_v55 = vpop.f32.mrb[7].mxu1  ;;  %v729_v51 = vpop.f32.mrb[7].mxu0 }
 0x114   :  { %v3687_v57 = vpop.f32.mrb[8].mxu1  ;;  %v806_v58 = vpop.f32.mrb[8].mxu0 }
 0x115   :  { %v856_v59 = vmax.f32 %v3681_v48, %v3687_v57  ;;  %v3691_v60 = vpop.f32.mrb[9].mxu1  ;;  %v858_v61 = vmax.f32 %v724_v49, %v806_v58  ;;  %v808_v62 = vpop.f32.mrb[9].mxu0 }
 0x116   :  { %v857_v63 = vmax.f32 %v3683_v50, %v3691_v60  ;;  %v687_v0 = vpop.f32.mrb[10].mxu1  ;;  %v859_v1 = vmax.f32 %v726_v52, %v808_v62  ;;  %v810_v2 = vpop.f32.mrb[10].mxu0 }
 0x117   :  { %v688_v4 = vpop.f32.mrb[11].mxu1  ;;  %v862_v5 = vmax.f32 %v854_v41, %v858_v61  ;;  %v811_v6 = vpop.f32.mrb[11].mxu0 }
 0x118   :  { %v863_v7 = vmax.f32 %v855_v44, %v859_v1 }
 0x119   :  { %v872_v8 = vadd.f32 %v3685_v56, %v862_v5 }
 0x11a   :  { %v873_v9 = vadd.f32 %v3685_v56, %v863_v7 }
 0x11b   :  { %v3697_v10 = vmax.f32 %v872_v8, 0.0 }
 0x11c   :  { %v3699_v11 = vmax.f32 %v873_v9, 0.0 }
 0x11d   :  { %1035 = vrot.lane.b32.xlu1 %v3697_v10, %s4925_s0  ;;  %925 = vrot.lane.b32.xlu0 %v3697_v10, %s4893_s20  ;;  %881 = vst.msk [vmem:[#allocation2] sm:$0xff] %vm880_vm1, %v3697_v10 }
 0x11e   :  { %1061 = vst.msk [vmem:[#allocation2 + $0x78] sm:$0xff] %vm880_vm1, %v3699_v11 }
 0x121   :  { %1074 = vrot.lane.b32.xlu1 %v3697_v10, %s4910_s21  ;;  %889 = vrot.lane.b32.xlu0 %v3697_v10, %s3299_s2 }
 0x125   :  { %1108 = vrot.lane.b32.xlu1 %v3697_v10, %s4889_s1  ;;  %933 = vrot.lane.b32.xlu0 %v3697_v10, %s4929_s22  ;;  %s3324_s1 = smov 31  }
 0x128   :  { %v765_v12 = vpop.f32.mrb[12].mxu1 }
 0x129   :  { %v767_v13 = vpop.f32.mrb[13].mxu1  ;;  %1142 = vrot.lane.b32.xlu1 %v3697_v10, %s4887_s23  ;;  %959 = vrot.lane.b32.xlu0 %v3697_v10, %s4924_s24  ;;  %s4897_s23 = smov 78  }
 0x12a   :  { %v769_v14 = vpop.f32.mrb[14].mxu1 }
 0x12b   :  { %v770_v15 = vpop.f32.mrb[15].mxu1 }
 0x12d   :  { %1176 = vrot.lane.b32.xlu1 %v3697_v10, %s4885_s25  ;;  %993 = vrot.lane.b32.xlu0 %v3697_v10, %s4923_s26  ;;  %s4908_s25 = smov 96  }
 0x131   :  { %1210 = vrot.lane.b32.xlu1 %v3697_v10, %s4881_s27  ;;  %967 = vrot.lane.b32.xlu0 %v3697_v10, %s4932_s28  ;;  %s3320_s27 = smov 46  }
 0x135   :  { %1228 = vrot.lane.b32.xlu1 %v3697_v10, %s4883_s29  ;;  %1001 = vrot.lane.b32.xlu0 %v3697_v10, %s3309_s30  ;;  %s4899_s29 = smov 118  }
 0x139   :  { %1369 = vrot.lane.b32.xlu1 %v3697_v10, %s4879_s12  ;;  %1027 = vrot.lane.b32.xlu0 %v3697_v10, %s4922_s13  ;;  %s4896_s12 = smov 55  }
 0x13c   :  { %v847_v16 = vpop.f32.mrb[16].mxu1 }
 0x13d   :  { %v860_v17 = vmax.f32 %v765_v12, %v847_v16  ;;  %v849_v18 = vpop.f32.mrb[17].mxu1  ;;  %1498 = vrot.lane.b32.xlu1 %v3697_v10, %s4877_s14  ;;  %1083 = vrot.lane.b32.xlu0 %v3697_v10, %s4902_s15  ;;  %s4905_s14 = smov 110  }
 0x13e   :  { %v861_v19 = vmax.f32 %v767_v13, %v849_v18  ;;  %v851_v20 = vpop.f32.mrb[18].mxu1 }
 0x13f   :  { %v3744_v21 = vmax.f32 %v856_v59, %v860_v17  ;;  %v852_v22 = vpop.f32.mrb[19].mxu1 }
 0x140   :  { %v3746_v23 = vmax.f32 %v857_v63, %v861_v19 }
 0x141   :  { %1117 = vrot.lane.b32.xlu0 %v3697_v10, %s4907_s16  ;;  %913 = vrot.lane.b32.xlu1 %v3699_v11, %s4891_s17  ;;  %v874_v28 = vadd.f32 %v3685_v56, %v3744_v21 }
 0x142   :  { %v875_v4 = vadd.f32 %v3685_v56, %v3746_v23 }
 0x143   :  { %v3857_v31 = vmax.f32 %v874_v28, 0.0 }
 0x144   :  { %v4042_v7 = vmax.f32 %v875_v4, 0.0 }
 0x145   :  { %1151 = vrot.lane.b32.xlu0 %v3697_v10, %s4904_s18  ;;  %950 = vrot.lane.b32.xlu1 %v3699_v11, %s4895_s19 }
 0x149   :  { %1185 = vrot.lane.b32.xlu0 %v3697_v10, %s4905_s14  ;;  %984 = vrot.lane.b32.xlu1 %v3699_v11, %s4896_s12 }
 0x14d   :  { %1219 = vrot.lane.b32.xlu0 %v3697_v10, %s3320_s27  ;;  %1018 = vrot.lane.b32.xlu1 %v3699_v11, %s4899_s29 }
 0x151   :  { %1259 = vrot.lane.b32.xlu0 %v3697_v10, %s4891_s17  ;;  %1066 = vrot.lane.b32.xlu1 %v3699_v11, %s3299_s2  ;;  %s4914_s17 = smov 95  }
 0x155   :  { %1236 = vrot.lane.b32.xlu0 %v3697_v10, %s4908_s25  ;;  %1043 = vrot.lane.b32.xlu1 %v3699_v11, %s4897_s23  ;;  %s4900_s23 = smov 112  }
 0x159   :  { %1267 = vrot.lane.b32.xlu0 %v3697_v10, %s3324_s1  ;;  %1092 = vrot.lane.b32.xlu1 %v3699_v11, %s4893_s20  ;;  %s3326_s20 = smov 30  }
 0x15d   :  { %1293 = vrot.lane.b32.xlu0 %v3697_v10, %s4895_s19  ;;  %1126 = vrot.lane.b32.xlu1 %v3699_v11, %s4924_s24  ;;  %s3327_s19 = smov 40  }
 0x161   :  { %1327 = vrot.lane.b32.xlu0 %v3697_v10, %s4896_s12  ;;  %1100 = vrot.lane.b32.xlu1 %v3699_v11, %s4929_s22  ;;  %s4920_s12 = smov 62  }
 0x165   :  { %1301 = vrot.lane.b32.xlu0 %v3697_v10, %s4914_s17  ;;  %1134 = vrot.lane.b32.xlu1 %v3699_v11, %s4932_s28 }
 0x169   :  { %1335 = vrot.lane.b32.xlu0 %v3697_v10, %s3326_s20  ;;  %1160 = vrot.lane.b32.xlu1 %v3699_v11, %s4923_s26 }
 0x16d   :  { %1361 = vrot.lane.b32.xlu0 %v3697_v10, %s4899_s29  ;;  %1194 = vrot.lane.b32.xlu1 %v3699_v11, %s4922_s13  ;;  %s4912_s29 = smov 23  }
 0x171   :  { %1411 = vrot.lane.b32.xlu0 %v3697_v10, %s3327_s19  ;;  %1168 = vrot.lane.b32.xlu1 %v3699_v11, %s3309_s30  ;;  %s4930_s30 = smov 80  }
 0x175   :  { %1478 = vrot.lane.b32.xlu0 %v3697_v10, %s4920_s12  ;;  %1202 = vrot.lane.b32.xlu1 %v3699_v11, %s4925_s0 }
 0x179   :  { %1490 = vrot.lane.b32.xlu0 %v3697_v10, %s4900_s23  ;;  %1250 = vrot.lane.b32.xlu1 %v3699_v11, %s4902_s15  ;;  %s4915_s23 = smov 16   ;;  %s4928_s15 = smov 79  }
 0x17d   :  { %1520 = vrot.lane.b32.xlu0 %v3697_v10, %s4912_s29  ;;  %1284 = vrot.lane.b32.xlu1 %v3699_v11, %s4907_s16  ;;  %s4935_s16 = smov 7   ;;  %s4938_s29 = smov 94  }
 0x181   :  { %1318 = vrot.lane.b32.xlu1 %v3699_v11, %s4904_s18  ;;  %900 = vrot.lane.b32.xlu0 %v3699_v11, %s4930_s30  ;;  %s4918_s18 = smov 15  }
 0x185   :  { %1352 = vrot.lane.b32.xlu1 %v3699_v11, %s4905_s14  ;;  %941 = vrot.lane.b32.xlu0 %v3699_v11, %s4915_s23  ;;  %s4906_s14 = smov 54   ;;  %s3337_s23 = smov 32  }
 0x189   :  { %1403 = vrot.lane.b32.xlu1 %v3699_v11, %s4908_s25  ;;  %975 = vrot.lane.b32.xlu0 %v3699_v11, %s4928_s15 }
 0x18d   :  { %1386 = vrot.lane.b32.xlu1 %v3699_v11, %s3320_s27  ;;  %1009 = vrot.lane.b32.xlu0 %v3699_v11, %s4918_s18  ;;  %s4933_s27 = smov 8  }
 0x18f   :  { %v3828_v24 = vpop.permute.xlu1 %1035  ;;  %v3830_v25 = vpop.permute.xlu0 %925 }
 0x190   :  { %928 = vst.msk [vmem:[#allocation2 + $0x18] sm:$0xff] %vm880_vm1, %v3830_v25 }
 0x191   :  { %1422 = vrot.lane.b32.xlu1 %v3699_v11, %s3324_s1  ;;  %1052 = vrot.lane.b32.xlu0 %v3699_v11, %s4906_s14  ;;  %s4934_s14 = smov 71  }
 0x193   :  { %v3838_v26 = vpop.permute.xlu1 %1074  ;;  %v890_v27 = vpop.permute.xlu0 %889 }
 0x194   :  { %893 = vst.msk [vmem:[#allocation2] sm:$0xff] %vm892_vm2, %v890_v27 }
 0x195   :  { %1454 = vrot.lane.b32.xlu1 %v3699_v11, %s3326_s20  ;;  %1241 = vrot.lane.b32.xlu0 %v3699_v11, %s4910_s21  ;;  %s4937_s21 = smov 70  }
 0x197   :  { %v3847_v29 = vpop.permute.xlu1 %1108  ;;  %v3849_v30 = vpop.permute.xlu0 %933 }
 0x198   :  { %936 = vst.msk [vmem:[#allocation2 + $0x18] sm:$0xff] %vm892_vm2, %v3849_v30 }
 0x199   :  { %1509 = vrot.lane.b32.xlu1 %v3699_v11, %s3327_s19  ;;  %1275 = vrot.lane.b32.xlu0 %v3699_v11, %s4933_s27 }
 0x19b   :  { %v3859_v32 = vpop.permute.xlu1 %1142  ;;  %v3861_v33 = vpop.permute.xlu0 %959 }
 0x19c   :  { %962 = vst.msk [vmem:[#allocation2 + $0x30] sm:$0xff] %vm880_vm1, %v3861_v33 }
 0x19d   :  { %1309 = vrot.lane.b32.xlu0 %v3699_v11, %s4934_s14  ;;  %929 = vrot.lane.b32.xlu1 %v3857_v31, %s4908_s25  ;;  %s4936_s25 = smov 120  }
 0x19f   :  { %v3869_v34 = vpop.permute.xlu1 %1176  ;;  %v3871_v35 = vpop.permute.xlu0 %993 }
 0x1a0   :  { %996 = vst.msk [vmem:[#allocation2 + $0x48] sm:$0xff] %vm880_vm1, %v3871_v35 }
 0x1a1   :  { %1343 = vrot.lane.b32.xlu0 %v3699_v11, %s4935_s16  ;;  %894 = vrot.lane.b32.xlu1 %v3857_v31, %s4933_s27 }
 0x1a3   :  { %v3879_v36 = vpop.permute.xlu1 %1210  ;;  %v3881_v37 = vpop.permute.xlu0 %967 }
 0x1a4   :  { %970 = vst.msk [vmem:[#allocation2 + $0x30] sm:$0xff] %vm892_vm2, %v3881_v37 }
 0x1a5   :  { %1395 = vrot.lane.b32.xlu0 %v3699_v11, %s4936_s25  ;;  %937 = vrot.lane.b32.xlu1 %v3857_v31, %s4934_s14 }
 0x1a7   :  { %v1229_v38 = vpop.permute.xlu1 %1228  ;;  %v3889_v39 = vpop.permute.xlu0 %1001 }
 0x1a8   :  { %1231 = vst.msk [vmem:[#allocation2 + $0xf0] sm:$0xff] %vm880_vm1, %v1229_v38 }
 0x1a9   :  { %1004 = vst.msk [vmem:[#allocation2 + $0x48] sm:$0xff] %vm892_vm2, %v3889_v39  ;;  %1377 = vrot.lane.b32.xlu0 %v3699_v11, %s4937_s21  ;;  %997 = vrot.lane.b32.xlu1 %v3857_v31, %s4914_s17 }
 0x1ab   :  { %v3898_v40 = vpop.permute.xlu1 %1369  ;;  %v1028_v41 = vpop.permute.xlu0 %1027 }
 0x1ac   :  { %1030 = vst.msk [vmem:[#allocation2 + $0x60] sm:$0xff] %vm880_vm1, %v1028_v41 }
 0x1ad   :  { %1038 = vst.msk [vmem:[#allocation2 + $0x60] sm:$0xff] %vm892_vm2, %v3828_v24  ;;  %1438 = vrot.lane.b32.xlu0 %v3699_v11, %s4914_s17  ;;  %971 = vrot.lane.b32.xlu1 %v3857_v31, %s4935_s16  ;;  %s4917_s17 = smov 6  }
 0x1af   :  { %v3907_v42 = vpop.permute.xlu1 %1498  ;;  %v3909_v43 = vpop.permute.xlu0 %1083 }
 0x1b0   :  { %1518 = vst.msk [vmem:[#allocation2 + $0x1f8] sm:$0xff] %vm880_vm1, %v3909_v43 }
 0x1b1   :  { %1470 = vrot.lane.b32.xlu0 %v3699_v11, %s4938_s29  ;;  %1005 = vrot.lane.b32.xlu1 %v3857_v31, %s4937_s21 }
 0x1b3   :  { %v3917_v44 = vpop.permute.xlu0 %1117  ;;  %v3919_v45 = vpop.permute.xlu1 %913 }
 0x1b4   :  { %1534 = vst.msk [vmem:[#allocation2 + $0x210] sm:$0xff] %vm880_vm1, %v3917_v44  ;;  %1420 = vst.msk [vmem:[#allocation2 + $0x180] sm:$0xff] %vm880_vm1, %v3919_v45 }
 0x1b5   :  { %1039 = vrot.lane.b32.xlu1 %v3857_v31, %s4917_s17  ;;  %883 = vrot.lane.b32.xlu0 %v3857_v31, %s3337_s23  ;;  %s4926_s17 = smov 24  }
 0x1b7   :  { %v3929_v46 = vpop.permute.xlu0 %1151  ;;  %v3931_v47 = vpop.permute.xlu1 %950 }
 0x1b8   :  { %1550 = vst.msk [vmem:[#allocation2 + $0x228] sm:$0xff] %vm880_vm1, %v3929_v46  ;;  %1436 = vst.msk [vmem:[#allocation2 + $0x198] sm:$0xff] %vm880_vm1, %v3931_v47 }
 0x1b9   :  { %1122 = vrot.lane.b32.xlu1 %v3857_v31, %s4918_s18  ;;  %963 = vrot.lane.b32.xlu0 %v3857_v31, %s3324_s1  ;;  %s4919_s18 = smov 14  }
 0x1bb   :  { %v3941_v48 = vpop.permute.xlu0 %1185  ;;  %v3943_v49 = vpop.permute.xlu1 %984 }
 0x1bc   :  { %1566 = vst.msk [vmem:[#allocation2 + $0x240] sm:$0xff] %vm880_vm1, %v3941_v48  ;;  %1452 = vst.msk [vmem:[#allocation2 + $0x1b0] sm:$0xff] %vm880_vm1, %v3943_v49 }
 0x1bd   :  { %1232 = vrot.lane.b32.xlu1 %v3857_v31, %s4926_s17  ;;  %1031 = vrot.lane.b32.xlu0 %v3857_v31, %s3326_s20  ;;  %s3341_s17 = smov 22  }
 0x1bf   :  { %v3953_v50 = vpop.permute.xlu0 %1219  ;;  %v3955_v52 = vpop.permute.xlu1 %1018 }
 0x1c0   :  { %1468 = vst.msk [vmem:[#allocation2 + $0x1c8] sm:$0xff] %vm880_vm1, %v3955_v52 }
 0x1c1   :  { %1190 = vrot.lane.b32.xlu1 %v3857_v31, %s4919_s18  ;;  %1078 = vrot.lane.b32.xlu0 %v3857_v31, %s3299_s2  ;;  %s3340_s18 = smov 87  }
 0x1c3   :  { %v1260_v53 = vpop.permute.xlu0 %1259  ;;  %v1067_v54 = vpop.permute.xlu1 %1066 }
 0x1c4   :  { %1262 = vst.msk [vmem:[#allocation2 + $0x108] sm:$0xff] %vm880_vm1, %v1260_v53 }
 0x1c5   :  { %1069 = vst.msk [vmem:[#allocation2 + $0x78] sm:$0xff] %vm892_vm2, %v1067_v54  ;;  %1271 = vrot.lane.b32.xlu1 %v3857_v31, %s4923_s26  ;;  %1088 = vrot.lane.b32.xlu0 %v3857_v31, %s4930_s30  ;;  %s4941_s26 = smov 78   ;;  %s4946_s30 = smov 55  }
 0x1c6   :  { %1077 = vst.msk [vmem:[#allocation2 + $0x78] sm:$0xff] %vm903_vm3, %v3838_v26 }
 0x1c7   :  { %1086 = vst.msk [vmem:[#allocation2 + $0x78] sm:$0xff] %vm916_vm4, %v3909_v43  ;;  %v1237_v55 = vpop.permute.xlu0 %1236  ;;  %v1044_v51 = vpop.permute.xlu1 %1043 }
 0x1c8   :  { %1239 = vst.msk [vmem:[#allocation2 + $0xf0] sm:$0xff] %vm892_vm2, %v1237_v55 }
 0x1c9   :  { %1046 = vst.msk [vmem:[#allocation2 + $0x60] sm:$0xff] %vm903_vm3, %v1044_v51  ;;  %1331 = vrot.lane.b32.xlu1 %v3857_v31, %s3340_s18  ;;  %1112 = vrot.lane.b32.xlu0 %v3857_v31, %s3327_s19 }
 0x1cb   :  { %v1268_v57 = vpop.permute.xlu0 %1267  ;;  %v3979_v58 = vpop.permute.xlu1 %1092 }
 0x1cc   :  { %1270 = vst.msk [vmem:[#allocation2 + $0x108] sm:$0xff] %vm892_vm2, %v1268_v57 }
 0x1cd   :  { %1095 = vst.msk [vmem:[#allocation2 + $0x90] sm:$0xff] %vm880_vm1, %v3979_v58  ;;  %1305 = vrot.lane.b32.xlu1 %v3857_v31, %s4924_s24  ;;  %1146 = vrot.lane.b32.xlu0 %v3857_v31, %s4932_s28  ;;  %s4942_s24 = smov 23   ;;  %s4947_s28 = smov 111  }
 0x1cf   :  { %v1294_v59 = vpop.permute.xlu0 %1293  ;;  %v3988_v60 = vpop.permute.xlu1 %1126 }
 0x1d0   :  { %1296 = vst.msk [vmem:[#allocation2 + $0x120] sm:$0xff] %vm880_vm1, %v1294_v59  ;;  %1129 = vst.msk [vmem:[#allocation2 + $0xa8] sm:$0xff] %vm880_vm1, %v3988_v60 }
 0x1d1   :  { %1339 = vrot.lane.b32.xlu1 %v3857_v31, %s4920_s12  ;;  %1156 = vrot.lane.b32.xlu0 %v3857_v31, %s4928_s15  ;;  %s4939_s12 = smov 16   ;;  %s4944_s15 = smov 48  }
 0x1d3   :  { %v1328_v61 = vpop.permute.xlu0 %1327  ;;  %v3997_v62 = vpop.permute.xlu1 %1100 }
 0x1d4   :  { %1330 = vst.msk [vmem:[#allocation2 + $0x138] sm:$0xff] %vm880_vm1, %v1328_v61 }
 0x1d5   :  { %1103 = vst.msk [vmem:[#allocation2 + $0x90] sm:$0xff] %vm892_vm2, %v3997_v62  ;;  %1373 = vrot.lane.b32.xlu1 %v3857_v31, %s4922_s13  ;;  %1180 = vrot.lane.b32.xlu0 %v3857_v31, %s4929_s22  ;;  %s4940_s13 = smov 88   ;;  %s4945_s22 = smov 72  }
 0x1d6   :  { %1111 = vst.msk [vmem:[#allocation2 + $0x90] sm:$0xff] %vm903_vm3, %v3847_v29 }
 0x1d7   :  { %1120 = vst.msk [vmem:[#allocation2 + $0x90] sm:$0xff] %vm916_vm4, %v3917_v44  ;;  %v1302_v63 = vpop.permute.xlu0 %1301  ;;  %v4010_v0 = vpop.permute.xlu1 %1134 }
 0x1d8   :  { %1304 = vst.msk [vmem:[#allocation2 + $0x120] sm:$0xff] %vm892_vm2, %v1302_v63  ;;  %1137 = vst.msk [vmem:[#allocation2 + $0xa8] sm:$0xff] %vm892_vm2, %v4010_v0 }
 0x1d9   :  { %1145 = vst.msk [vmem:[#allocation2 + $0xa8] sm:$0xff] %vm903_vm3, %v3859_v32  ;;  %1482 = vrot.lane.b32.xlu1 %v3857_v31, %s4938_s29  ;;  %1214 = vrot.lane.b32.xlu0 %v3857_v31, %s4925_s0  ;;  %s4943_s0 = smov 112  }
 0x1da   :  { %1154 = vst.msk [vmem:[#allocation2 + $0xa8] sm:$0xff] %vm916_vm4, %v3929_v46 }
 0x1db   :  { %v1336_v1 = vpop.permute.xlu0 %1335  ;;  %v4023_v2 = vpop.permute.xlu1 %1160 }
 0x1dc   :  { %1338 = vst.msk [vmem:[#allocation2 + $0x138] sm:$0xff] %vm892_vm2, %v1336_v1 }
 0x1dd   :  { %1163 = vst.msk [vmem:[#allocation2 + $0xc0] sm:$0xff] %vm880_vm1, %v4023_v2  ;;  %1494 = vrot.lane.b32.xlu1 %v3857_v31, %s4939_s12  ;;  %1263 = vrot.lane.b32.xlu0 %v3857_v31, %s4940_s13 }
 0x1df   :  { %v1362_v5 = vpop.permute.xlu0 %1361  ;;  %v1195_v6 = vpop.permute.xlu1 %1194 }
 0x1e0   :  { %1364 = vst.msk [vmem:[#allocation2 + $0x150] sm:$0xff] %vm880_vm1, %v1362_v5  ;;  %1197 = vst.msk [vmem:[#allocation2 + $0xd8] sm:$0xff] %vm880_vm1, %v1195_v6 }
 0x1e1   :  { %1372 = vst.msk [vmem:[#allocation2 + $0x150] sm:$0xff] %vm892_vm2, %v3898_v40  ;;  %1502 = vrot.lane.b32.xlu1 %v3857_v31, %s4936_s25  ;;  %1224 = vrot.lane.b32.xlu0 %v3857_v31, %s4941_s26 }
 0x1e3   :  { %v4044_v8 = vpop.permute.xlu0 %1411  ;;  %v4046_v56 = vpop.permute.xlu1 %1168 }
 0x1e4   :  { %1171 = vst.msk [vmem:[#allocation2 + $0xc0] sm:$0xff] %vm892_vm2, %v4046_v56 }
 0x1e5   :  { %1179 = vst.msk [vmem:[#allocation2 + $0xc0] sm:$0xff] %vm903_vm3, %v3869_v34  ;;  %1297 = vrot.lane.b32.xlu0 %v3857_v31, %s4942_s24  ;;  %906 = vrot.lane.b32.xlu1 %v4042_v7, %s4943_s0 }
 0x1e6   :  { %1188 = vst.msk [vmem:[#allocation2 + $0xc0] sm:$0xff] %vm916_vm4, %v3941_v48 }
 0x1e7   :  { %v4058_v9 = vpop.permute.xlu0 %1478  ;;  %v4060_v12 = vpop.permute.xlu1 %1202 }
 0x1e8   :  { %1205 = vst.msk [vmem:[#allocation2 + $0xd8] sm:$0xff] %vm892_vm2, %v4060_v12 }
 0x1e9   :  { %1213 = vst.msk [vmem:[#allocation2 + $0xd8] sm:$0xff] %vm903_vm3, %v3879_v36  ;;  %1365 = vrot.lane.b32.xlu0 %v3857_v31, %s3341_s17  ;;  %945 = vrot.lane.b32.xlu1 %v4042_v7, %s4944_s15 }
 0x1ea   :  { %1222 = vst.msk [vmem:[#allocation2 + $0xd8] sm:$0xff] %vm916_vm4, %v3953_v50 }
 0x1eb   :  { %v1491_v13 = vpop.permute.xlu0 %1490  ;;  %v4072_v14 = vpop.permute.xlu1 %1250 }
 0x1ec   :  { %1493 = vst.msk [vmem:[#allocation2 + $0x1e0] sm:$0xff] %vm880_vm1, %v1491_v13 }
 0x1ed   :  { %1501 = vst.msk [vmem:[#allocation2 + $0x1e0] sm:$0xff] %vm892_vm2, %v3907_v42  ;;  %1416 = vrot.lane.b32.xlu0 %v3857_v31, %s4945_s22  ;;  %955 = vrot.lane.b32.xlu1 %v4042_v7, %s4942_s24  ;;  %s4948_s24 = smov 47  }
 0x1ee   :  { %1506 = vst.msk [vmem:[#allocation2 + $0x1e0] sm:$0xff] %vm903_vm3, %v3979_v58 }
 0x1ef   :  { %v1521_v15 = vpop.permute.xlu0 %1520  ;;  %v4083_v16 = vpop.permute.xlu1 %1284 }
 0x1f0   :  { %1523 = vst.msk [vmem:[#allocation2 + $0x1f8] sm:$0xff] %vm892_vm2, %v1521_v15 }
 0x1f1   :  { %1528 = vst.msk [vmem:[#allocation2 + $0x1f8] sm:$0xff] %vm903_vm3, %v3699_v11  ;;  %1524 = vrot.lane.b32.xlu0 %v3857_v31, %s4946_s30  ;;  %979 = vrot.lane.b32.xlu1 %v4042_v7, %s4947_s28  ;;  %s4949_s28 = smov 110   ;;  %s4950_s30 = smov 96  }
 0x1f2   :  { %1531 = vst.msk [vmem:[#allocation2 + $0x1f8] sm:$0xff] %vm916_vm4, %v4010_v0 }
 0x1f3   :  { %v4094_v17 = vpop.permute.xlu1 %1318  ;;  %v901_v18 = vpop.permute.xlu0 %900 }
 0x1f4   :  { %904 = vst.msk [vmem:[#allocation2] sm:$0xff] %vm903_vm3, %v901_v18 }
 0x1f5   :  { %917 = vst.msk [vmem:[#allocation2] sm:$0xff] %vm916_vm4, %v3919_v45  ;;  %920 = vrot.lane.b32.xlu0 %v4042_v7, %s4940_s13  ;;  %1013 = vrot.lane.b32.xlu1 %v4042_v7, %s4948_s24  ;;  %s3342_s24 = smov 86  }
 0x1f7   :  { %v4103_v19 = vpop.permute.xlu1 %1352  ;;  %v942_v20 = vpop.permute.xlu0 %941 }
 0x1f8   :  { %944 = vst.msk [vmem:[#allocation2 + $0x18] sm:$0xff] %vm903_vm3, %v942_v20 }
 0x1f9   :  { %953 = vst.msk [vmem:[#allocation2 + $0x18] sm:$0xff] %vm916_vm4, %v3931_v47  ;;  %989 = vrot.lane.b32.xlu0 %v4042_v7, %s3340_s18  ;;  %1062 = vrot.lane.b32.xlu1 %v4042_v7, %s3337_s23 }
 0x1fb   :  { %v1404_v21 = vpop.permute.xlu1 %1403  ;;  %v976_v22 = vpop.permute.xlu0 %975 }
 0x1fc   :  { %978 = vst.msk [vmem:[#allocation2 + $0x30] sm:$0xff] %vm903_vm3, %v976_v22  ;;  %v3237_v22 = vld [vmem:[%s4868_s3 + $0x4] ss:$8 sps:$4 sm:$0xff]  }
 0x1fd   :  { %987 = vst.msk [vmem:[#allocation2 + $0x30] sm:$0xff] %vm916_vm4, %v3943_v49  ;;  %1070 = vrot.lane.b32.xlu0 %v4042_v7, %s4933_s27  ;;  %1023 = vrot.lane.b32.xlu1 %v4042_v7, %s3341_s17 }
 0x1fe   :  { %2981 = vmatprep.mubr.msk.bf16.mxu0 %vm1713_vm9, %v3237_v22  ;;  %2982 = vmatprep.mubr.msk.bf16.mxu1 %vm1713_vm9, %v3237_v22 }
 0x1ff   :  { %v4119_v23 = vpop.permute.xlu1 %1386  ;;  %v1010_v26 = vpop.permute.xlu0 %1009 }
 0x200   :  { %1012 = vst.msk [vmem:[#allocation2 + $0x48] sm:$0xff] %vm903_vm3, %v1010_v26 }
 0x201   :  { %1021 = vst.msk [vmem:[#allocation2 + $0x48] sm:$0xff] %vm916_vm4, %v3955_v52  ;;  %1047 = vrot.lane.b32.xlu0 %v4042_v7, %s4949_s28  ;;  %1096 = vrot.lane.b32.xlu1 %v4042_v7, %s4950_s30  ;;  %s4956_s28 = smov 39  }
 0x203   :  { %v1423_v27 = vpop.permute.xlu1 %1422  ;;  %v4128_v28 = vpop.permute.xlu0 %1052 }
 0x204   :  { %1425 = vst.msk [vmem:[#allocation2 + $0x180] sm:$0xff] %vm892_vm2, %v1423_v27 }
 0x205   :  { %1055 = vst.msk [vmem:[#allocation2 + $0x60] sm:$0xff] %vm916_vm4, %v4128_v28  ;;  %1130 = vrot.lane.b32.xlu0 %v4042_v7, %s3324_s1  ;;  %1057 = vrot.lane.b32.xlu1 %v4042_v7, %s3342_s24  ;;  %s4951_s1 = smov 95  }
 0x206   :  { %1430 = vst.msk [vmem:[#allocation2 + $0x180] sm:$0xff] %vm903_vm3, %v3697_v10 }
 0x207   :  { %1433 = vst.msk [vmem:[#allocation2 + $0x180] sm:$0xff] %vm916_vm4, %v3881_v37  ;;  %v1455_v29 = vpop.permute.xlu1 %1454  ;;  %v1242_v32 = vpop.permute.xlu0 %1241 }
 0x208   :  { %1457 = vst.msk [vmem:[#allocation2 + $0x1b0] sm:$0xff] %vm892_vm2, %v1455_v29 }
 0x209   :  { %1244 = vst.msk [vmem:[#allocation2 + $0xf0] sm:$0xff] %vm903_vm3, %v1242_v32  ;;  %1462 = vst.msk [vmem:[#allocation2 + $0x1b0] sm:$0xff] %vm903_vm3, %v3861_v33  ;;  %1104 = vrot.lane.b32.xlu0 %v4042_v7, %s4934_s14  ;;  %1164 = vrot.lane.b32.xlu1 %v4042_v7, %s4951_s1  ;;  %s4952_s14 = smov 15   ;;  %s4957_s1 = smov 79  }
 0x20a   :  { %1253 = vst.msk [vmem:[#allocation2 + $0xf0] sm:$0xff] %vm916_vm4, %v4072_v14  ;;  %1465 = vst.msk [vmem:[#allocation2 + $0x1b0] sm:$0xff] %vm916_vm4, %v3828_v24 }
 0x20b   :  { %v4153_v34 = vpop.permute.xlu1 %1509  ;;  %v1276_v36 = vpop.permute.xlu0 %1275 }
 0x20c   :  { %1512 = vst.msk [vmem:[#allocation2 + $0x1e0] sm:$0xff] %vm916_vm4, %v4153_v34 }
 0x20d   :  { %1278 = vst.msk [vmem:[#allocation2 + $0x108] sm:$0xff] %vm903_vm3, %v1276_v36  ;;  %1138 = vrot.lane.b32.xlu0 %v4042_v7, %s4935_s16  ;;  %1245 = vrot.lane.b32.xlu1 %v4042_v7, %s3299_s2  ;;  %s4954_s16 = smov 103  }
 0x20e   :  { %1287 = vst.msk [vmem:[#allocation2 + $0x108] sm:$0xff] %vm916_vm4, %v4083_v16 }
 0x20f   :  { %v1310_v33 = vpop.permute.xlu0 %1309  ;;  %v4164_v38 = vpop.permute.xlu1 %929 }
 0x210   :  { %1312 = vst.msk [vmem:[#allocation2 + $0x120] sm:$0xff] %vm903_vm3, %v1310_v33 }
 0x211   :  { %932 = vst.msk [vmem:[#allocation2 + $0x20] sm:$0xff] %vm886_vm5, %v4164_v38  ;;  %1198 = vrot.lane.b32.xlu0 %v4042_v7, %s3326_s20  ;;  %1279 = vrot.lane.b32.xlu1 %v4042_v7, %s3327_s19  ;;  %s4953_s20 = smov 6  }
 0x212   :  { %1410 = vst.msk [vmem:[#allocation2 + $0x178] sm:$0xff] %vm911_vm6, %v4164_v38 }
 0x213   :  { %1321 = vst.msk [vmem:[#allocation2 + $0x120] sm:$0xff] %vm916_vm4, %v4094_v17  ;;  %v1344_v40 = vpop.permute.xlu0 %1343  ;;  %v895_v41 = vpop.permute.xlu1 %894 }
 0x214   :  { %1346 = vst.msk [vmem:[#allocation2 + $0x138] sm:$0xff] %vm903_vm3, %v1344_v40 }
 0x215   :  { %1355 = vst.msk [vmem:[#allocation2 + $0x138] sm:$0xff] %vm916_vm4, %v4103_v19  ;;  %1172 = vrot.lane.b32.xlu0 %v4042_v7, %s4937_s21  ;;  %1289 = vrot.lane.b32.xlu1 %v4042_v7, %s4952_s14  ;;  %s4955_s21 = smov 80   ;;  %s4958_s14 = smov 24  }
 0x217   :  { %v1396_v42 = vpop.permute.xlu0 %1395  ;;  %v938_v53 = vpop.permute.xlu1 %937 }
 0x218   :  { %1398 = vst.msk [vmem:[#allocation2 + $0x168] sm:$0xff] %vm880_vm1, %v1396_v42  ;;  %vm1875_vm1 = vcmask 647488  }
 0x219   :  { %940 = vst.msk [vmem:[#allocation2 + $0x20] sm:$0xff] %vm897_vm7, %v938_v53  ;;  %1206 = vrot.lane.b32.xlu0 %v4042_v7, %s4953_s20  ;;  %1313 = vrot.lane.b32.xlu1 %v4042_v7, %s4954_s16  ;;  %s4959_s20 = smov 102   ;;  %s4960_s16 = smov 14  }
 0x21a   :  { %1406 = vst.msk [vmem:[#allocation2 + $0x168] sm:$0xff] %vm892_vm2, %v1404_v21 }
 0x21b   :  { %1408 = vst.msk [vmem:[#allocation2 + $0x168] sm:$0xff] %vm903_vm3, %v3830_v25  ;;  %v1378_v54 = vpop.permute.xlu0 %1377  ;;  %v4195_v55 = vpop.permute.xlu1 %997 }
 0x21c   :  { %1414 = vst.msk [vmem:[#allocation2 + $0x168] sm:$0xff] %vm916_vm4, %v4044_v8 }
 0x21d   :  { %1380 = vst.msk [vmem:[#allocation2 + $0x150] sm:$0xff] %vm903_vm3, %v1378_v54  ;;  %1255 = vrot.lane.b32.xlu0 %v4042_v7, %s4955_s21  ;;  %1347 = vrot.lane.b32.xlu1 %v4042_v7, %s4956_s28  ;;  %s4961_s28 = smov 127  }
 0x21e   :  { %1448 = vst.msk [vmem:[#allocation2 + $0x1a8] sm:$0xff] %vm911_vm6, %v4195_v55 }
 0x21f   :  { %1000 = vst.msk [vmem:[#allocation2 + $0x50] sm:$0xff] %vm886_vm5, %v4195_v55  ;;  %v1439_v25 = vpop.permute.xlu0 %1438  ;;  %v972_v51 = vpop.permute.xlu1 %971 }
 0x220   :  { %1389 = vst.msk [vmem:[#allocation2 + $0x150] sm:$0xff] %vm916_vm4, %v4119_v23 }
 0x221   :  { %1451 = vst.msk [vmem:[#allocation2 + $0x1a8] sm:$0xff] %vm923_vm8, %v938_v53  ;;  %1323 = vrot.lane.b32.xlu0 %v4042_v7, %s4957_s1  ;;  %1399 = vrot.lane.b32.xlu1 %v4042_v7, %s4958_s14  ;;  %s4962_s1 = smov 54  }
 0x222   :  { %1441 = vst.msk [vmem:[#allocation2 + $0x198] sm:$0xff] %vm892_vm2, %v1439_v25 }
 0x223   :  { %1446 = vst.msk [vmem:[#allocation2 + $0x198] sm:$0xff] %vm903_vm3, %v3871_v35  ;;  %v1471_v57 = vpop.permute.xlu0 %1470  ;;  %v4218_v58 = vpop.permute.xlu1 %1005 }
 0x224   :  { %1449 = vst.msk [vmem:[#allocation2 + $0x198] sm:$0xff] %vm916_vm4, %v3849_v30 }
 0x225   :  { %1473 = vst.msk [vmem:[#allocation2 + $0x1c8] sm:$0xff] %vm892_vm2, %v1471_v57  ;;  %1381 = vrot.lane.b32.xlu0 %v4042_v7, %s4959_s20  ;;  %1357 = vrot.lane.b32.xlu1 %v4042_v7, %s4960_s16  ;;  %s4963_s20 = smov 63   ;;  %s4965_s16 = smov 62  }
 0x226   :  { %1008 = vst.msk [vmem:[#allocation2 + $0x50] sm:$0xff] %vm897_vm7, %v4218_v58 }
 0x227   :  { %1481 = vst.msk [vmem:[#allocation2 + $0x1c8] sm:$0xff] %vm903_vm3, %v4058_v9  ;;  %v1040_v35 = vpop.permute.xlu1 %1039  ;;  %v4231_v59 = vpop.permute.xlu0 %883 }
 0x228   :  { %1487 = vst.msk [vmem:[#allocation2 + $0x1c8] sm:$0xff] %vm916_vm4, %v3889_v39 }
 0x229   :  { %887 = vst.msk [vmem:[#allocation2 + $0x8] sm:$0xff] %vm886_vm5, %v4231_v59  ;;  %1442 = vrot.lane.b32.xlu0 %v4042_v7, %s4961_s28  ;;  %1391 = vrot.lane.b32.xlu1 %v4042_v7, %s4941_s26  ;;  %s4964_s26 = smov 126   ;;  %s4966_s28 = smov 119  }
 0x22a   :  { %1432 = vst.msk [vmem:[#allocation2 + $0x190] sm:$0xff] %vm911_vm6, %v4231_v59 }
 0x22b   :  { %1435 = vst.msk [vmem:[#allocation2 + $0x190] sm:$0xff] %vm923_vm8, %v972_v51  ;;  %v1123_v61 = vpop.permute.xlu1 %1122  ;;  %v4243_v63 = vpop.permute.xlu0 %963 }
 0x22c   :  { %898 = vst.msk [vmem:[#allocation2 + $0x8] sm:$0xff] %vm897_vm7, %v895_v41 }
 0x22d   :  { %1535 = vst.msk [vmem:[#allocation2 + $0x218] sm:$0xff] %vm886_vm5, %v1123_v61  ;;  %966 = vst.msk [vmem:[#allocation2 + $0x38] sm:$0xff] %vm886_vm5, %v4243_v63  ;;  %1556 = vrot.lane.b32.xlu0 %v3857_v31, %s4962_s1  ;;  %1426 = vrot.lane.b32.xlu1 %v4042_v7, %s4963_s20 }
 0x22e   :  { %1464 = vst.msk [vmem:[#allocation2 + $0x1c0] sm:$0xff] %vm911_vm6, %v4243_v63 }
 0x22f   :  { %1467 = vst.msk [vmem:[#allocation2 + $0x1c0] sm:$0xff] %vm923_vm8, %v1040_v35  ;;  %v1233_v1 = vpop.permute.xlu1 %1232  ;;  %v1032_v4 = vpop.permute.xlu0 %1031 }
 0x230   :  { %974 = vst.msk [vmem:[#allocation2 + $0x38] sm:$0xff] %vm897_vm7, %v972_v51 }
 0x231   :  { %1235 = vst.msk [vmem:[#allocation2 + $0xf8] sm:$0xff] %vm886_vm5, %v1233_v1  ;;  %1034 = vst.msk [vmem:[#allocation2 + $0x68] sm:$0xff] %vm886_vm5, %v1032_v4  ;;  %1474 = vrot.lane.b32.xlu0 %v4042_v7, %s4964_s26  ;;  %1458 = vrot.lane.b32.xlu1 %v4042_v7, %s4965_s16  ;;  %v1590_v1 = vld [vmem:[#allocation2] sm:$0xff] }
 0x232   :  { %1240 = vst.msk [vmem:[#allocation2 + $0xf8] sm:$0xff] %vm897_vm7, %v3857_v31  ;;  %1042 = vst.msk [vmem:[#allocation2 + $0x68] sm:$0xff] %vm897_vm7, %v1040_v35 }
 0x233   :  { %v1191_v5 = vpop.permute.xlu1 %1190  ;;  %v4265_v6 = vpop.permute.xlu0 %1078 }
 0x234   :  { %1567 = vst.msk [vmem:[#allocation2 + $0x248] sm:$0xff] %vm886_vm5, %v1191_v5 }
 0x235   :  { %1082 = vst.msk [vmem:[#allocation2 + $0x88] sm:$0xff] %vm911_vm6, %v4265_v6  ;;  %1552 = vrot.lane.b32.xlu0 %v3697_v10, %s3341_s17  ;;  %1540 = vrot.lane.b32.xlu1 %v3857_v31, %s4966_s28  ;;  %s4967_s17 = smov 118  }
 0x237   :  { %v1272_v9 = vpop.permute.xlu1 %1271  ;;  %v1089_v13 = vpop.permute.xlu0 %1088 }
 0x238   :  { %1091 = vst.msk [vmem:[#allocation2 + $0x88] sm:$0xff] %vm923_vm8, %v1089_v13 }
 0x239   :  { %1519 = vst.msk [vmem:[#allocation2 + $0x200] sm:$0xff] %vm886_vm5, %v1089_v13  ;;  %1514 = vrot.lane.b32.xlu0 %v4042_v7, %s4945_s22  ;;  %1536 = vrot.lane.b32.xlu1 %v3697_v10, %s3340_s18 }
 0x23b   :  { %v1332_v15 = vpop.permute.xlu1 %1331  ;;  %v4280_v18 = vpop.permute.xlu0 %1112 }
 0x23c   :  { %1334 = vst.msk [vmem:[#allocation2 + $0x140] sm:$0xff] %vm886_vm5, %v1332_v15 }
 0x23d   :  { %1116 = vst.msk [vmem:[#allocation2 + $0xa0] sm:$0xff] %vm911_vm6, %v4280_v18  ;;  %1572 = vrot.lane.b32.xlu0 %v3857_v31, %s4967_s17  ;;  %1568 = vrot.lane.b32.xlu1 %v3697_v10, %s3342_s24 }
 0x23e   :  { %1125 = vst.msk [vmem:[#allocation2 + $0xa0] sm:$0xff] %vm923_vm8, %v1123_v61 }
 0x23f   :  { %v1306_v20 = vpop.permute.xlu1 %1305  ;;  %v4290_v21 = vpop.permute.xlu0 %1146 }
 0x240   :  { %1150 = vst.msk [vmem:[#allocation2 + $0xb8] sm:$0xff] %vm911_vm6, %v4290_v21 }
 0x241   :  { %1580 = vrot.lane.b32.xlu0 %v4042_v7, %s4938_s29  ;;  %1576 = vrot.lane.b32.xlu1 %v3699_v11, %s4965_s16 }
 0x243   :  { %v1340_v10 = vpop.permute.xlu1 %1339  ;;  %v1157_v31 = vpop.permute.xlu0 %1156 }
 0x244   :  { %1342 = vst.msk [vmem:[#allocation2 + $0x140] sm:$0xff] %vm897_vm7, %v1340_v10 }
 0x245   :  { %1159 = vst.msk [vmem:[#allocation2 + $0xb8] sm:$0xff] %vm923_vm8, %v1157_v31 }
 0x246   :  { %1551 = vst.msk [vmem:[#allocation2 + $0x230] sm:$0xff] %vm886_vm5, %v1157_v31 }
 0x247   :  { %v1374_v26 = vpop.permute.xlu1 %1373  ;;  %v4306_v27 = vpop.permute.xlu0 %1180 }
 0x248   :  { %1184 = vst.msk [vmem:[#allocation2 + $0xd0] sm:$0xff] %vm911_vm6, %v4306_v27 }
 0x249   :  { %1193 = vst.msk [vmem:[#allocation2 + $0xd0] sm:$0xff] %vm923_vm8, %v1191_v5 }
 0x24b   :  { %v4311_v11 = vpop.permute.xlu1 %1482  ;;  %v4313_v29 = vpop.permute.xlu0 %1214 }
 0x24c   :  { %1486 = vst.msk [vmem:[#allocation2 + $0x1d8] sm:$0xff] %vm911_vm6, %v4311_v11  ;;  %1218 = vst.msk [vmem:[#allocation2 + $0xe8] sm:$0xff] %vm911_vm6, %v4313_v29 }
 0x24d   :  { %1489 = vst.msk [vmem:[#allocation2 + $0x1d8] sm:$0xff] %vm923_vm8, %v4218_v58  ;;  %v1593_v58 = vld [vmem:[#allocation2 + $0x18] sm:$0xff] }
 0x24e   :  { %v1665_v4 = vpack.c.bf16 %v1593_v58, %v1590_v1  ;;  %v1605_v58 = vld [vmem:[#allocation2 + $0x78] sm:$0xff] }
 0x24f   :  { %v1495_v32 = vpop.permute.xlu1 %1494  ;;  %v1264_v36 = vpop.permute.xlu0 %1263 }
 0x250   :  { %1497 = vst.msk [vmem:[#allocation2 + $0x1e8] sm:$0xff] %vm886_vm5, %v1495_v32  ;;  %1266 = vst.msk [vmem:[#allocation2 + $0x110] sm:$0xff] %vm886_vm5, %v1264_v36 }
 0x251   :  { %1274 = vst.msk [vmem:[#allocation2 + $0x110] sm:$0xff] %vm897_vm7, %v1272_v9 }
 0x253   :  { %v1503_v33 = vpop.permute.xlu1 %1502  ;;  %v1225_v40 = vpop.permute.xlu0 %1224 }
 0x254   :  { %1505 = vst.msk [vmem:[#allocation2 + $0x1e8] sm:$0xff] %vm897_vm7, %v1503_v33  ;;  %v1596_v33 = vld [vmem:[#allocation2 + $0x30] sm:$0xff] }
 0x255   :  { %1227 = vst.msk [vmem:[#allocation2 + $0xe8] sm:$0xff] %vm923_vm8, %v1225_v40 }
 0x257   :  { %v1298_v41 = vpop.permute.xlu0 %1297  ;;  %v907_v42 = vpop.permute.xlu1 %906 }
 0x258   :  { %1300 = vst.msk [vmem:[#allocation2 + $0x128] sm:$0xff] %vm886_vm5, %v1298_v41 }
 0x259   :  { %910 = vst.msk [vmem:[#allocation2 + $0x8] sm:$0xff] %vm909_vm10, %v907_v42 }
 0x25a   :  { %912 = vst.msk [vmem:[#allocation2 + $0x10] sm:$0xff] %vm911_vm6, %v907_v42 }
 0x25b   :  { %1308 = vst.msk [vmem:[#allocation2 + $0x128] sm:$0xff] %vm897_vm7, %v1306_v20  ;;  %v1366_v53 = vpop.permute.xlu0 %1365  ;;  %v946_v54 = vpop.permute.xlu1 %945 }
 0x25c   :  { %919 = vst.msk [vmem:[#allocation2 + $0x8] sm:$0xff] %vm918_vm11, %v3919_v45 }
 0x25d   :  { %1368 = vst.msk [vmem:[#allocation2 + $0x158] sm:$0xff] %vm886_vm5, %v1366_v53 }
 0x25e   :  { %948 = vst.msk [vmem:[#allocation2 + $0x20] sm:$0xff] %vm909_vm10, %v946_v54 }
 0x25f   :  { %949 = vst.msk [vmem:[#allocation2 + $0x28] sm:$0xff] %vm911_vm6, %v946_v54  ;;  %v1417_v25 = vpop.permute.xlu0 %1416  ;;  %v956_v51 = vpop.permute.xlu1 %955 }
 0x260   :  { %1376 = vst.msk [vmem:[#allocation2 + $0x158] sm:$0xff] %vm897_vm7, %v1374_v26 }
 0x261   :  { %954 = vst.msk [vmem:[#allocation2 + $0x20] sm:$0xff] %vm918_vm11, %v3931_v47 }
 0x262   :  { %1419 = vst.msk [vmem:[#allocation2 + $0x178] sm:$0xff] %vm923_vm8, %v1417_v25  ;;  %958 = vst.msk [vmem:[#allocation2 + $0x28] sm:$0xff] %vm923_vm8, %v956_v51 }
 0x263   :  { %1437 = vst.msk [vmem:[#allocation2 + $0x1a0] sm:$0xff] %vm886_vm5, %v956_v51  ;;  %v1525_v45 = vpop.permute.xlu0 %1524  ;;  %v980_v57 = vpop.permute.xlu1 %979  ;;  %v1591_v35 = vld [vmem:[#allocation2 + $0x8] sm:$0xff]  ;;  %v1602_v51 = vld [vmem:[#allocation2 + $0x60] sm:$0xff] }
 0x264   :  { %1527 = vst.msk [vmem:[#allocation2 + $0x200] sm:$0xff] %vm897_vm7, %v1525_v45 }
 0x265   :  { %982 = vst.msk [vmem:[#allocation2 + $0x38] sm:$0xff] %vm909_vm10, %v980_v57 }
 0x266   :  { %983 = vst.msk [vmem:[#allocation2 + $0x40] sm:$0xff] %vm911_vm6, %v980_v57 }
 0x267   :  { %988 = vst.msk [vmem:[#allocation2 + $0x38] sm:$0xff] %vm918_vm11, %v3943_v49  ;;  %v921_v5 = vpop.permute.xlu0 %920  ;;  %v1014_v9 = vpop.permute.xlu1 %1013 }
 0x268   :  { %v1594_v61 = vld [vmem:[#allocation2 + $0x20] sm:$0xff]  ;;  %924 = vst.msk [vmem:[#allocation2 + $0x10] sm:$0xff] %vm923_vm8, %v921_v5 }
 0x269   :  { %v1666_v47 = vpack.c.bf16 %v1594_v61, %v1591_v35  ;;  %1421 = vst.msk [vmem:[#allocation2 + $0x188] sm:$0xff] %vm886_vm5, %v921_v5  ;;  %v1595_v10 = vld [vmem:[#allocation2 + $0x28] sm:$0xff]  ;;  %v1671_v35 = vpack.c.bf16 %v1605_v58, %v1602_v51 }
 0x26a   :  { %1016 = vst.msk [vmem:[#allocation2 + $0x50] sm:$0xff] %vm909_vm10, %v1014_v9 }
 0x26b   :  { %1727 = vmatprep.subr.bf16.mxu0 %v1666_v47  ;;  %1017 = vst.msk [vmem:[#allocation2 + $0x58] sm:$0xff] %vm911_vm6, %v1014_v9  ;;  %v990_v13 = vpop.permute.xlu0 %989  ;;  %v1063_v49 = vpop.permute.xlu1 %1062 }
 0x26c   :  { %1728 = vmatpush1.bf16.msra.mxu0 %v1665_v4  ;;  %1022 = vst.msk [vmem:[#allocation2 + $0x50] sm:$0xff] %vm918_vm11, %v3955_v52  ;;  %v1599_v52 = vld [vmem:[#allocation2 + $0x48] sm:$0xff] }
 0x26d   :  { %992 = vst.msk [vmem:[#allocation2 + $0x40] sm:$0xff] %vm923_vm8, %v990_v13  ;;  %v1607_v4 = vld [vmem:[#allocation2 + $0x88] sm:$0xff] }
 0x26e   :  { %1453 = vst.msk [vmem:[#allocation2 + $0x1b8] sm:$0xff] %vm886_vm5, %v990_v13  ;;  %1065 = vst.msk [vmem:[#allocation2 + $0x80] sm:$0xff] %vm886_vm5, %v1063_v49  ;;  %v1597_v26 = vld [vmem:[#allocation2 + $0x38] sm:$0xff]  ;;  %v1610_v13 = vld [vmem:[#allocation2 + $0xa0] sm:$0xff] }
 0x26f   :  { %1529 = vst.msk [vmem:[#allocation2 + $0x200] sm:$0xff] %vm909_vm10, %v1063_v49  ;;  %v1071_v15 = vpop.permute.xlu0 %1070  ;;  %v1024_v20 = vpop.permute.xlu1 %1023  ;;  %v1592_v22 = vld [vmem:[#allocation2 + $0x10] sm:$0xff] }
 0x270   :  { %1530 = vst.msk [vmem:[#allocation2 + $0x208] sm:$0xff] %vm911_vm6, %v1063_v49  ;;  %v1667_v31 = vpack.c.bf16 %v1595_v10, %v1592_v22  ;;  %v1611_v22 = vld [vmem:[#allocation2 + $0xa8] sm:$0xff] }
 0x271   :  { %1532 = vst.msk [vmem:[#allocation2 + $0x200] sm:$0xff] %vm918_vm11, %v4010_v0  ;;  %v1668_v0 = vpack.c.bf16 %v1599_v52, %v1596_v33 }
 0x272   :  { %1073 = vst.msk [vmem:[#allocation2 + $0x80] sm:$0xff] %vm897_vm7, %v1071_v15  ;;  %1771 = vmatpush1.bf16.msra.mxu1 %v1667_v31  ;;  %v1616_v15 = vld [vmem:[#allocation2 + $0xd0] sm:$0xff] }
 0x273   :  { %1026 = vst.msk [vmem:[#allocation2 + $0x58] sm:$0xff] %vm923_vm8, %v1024_v20  ;;  %v1600_v32 = vld [vmem:[#allocation2 + $0x50] sm:$0xff]  ;;  %v1048_v40 = vpop.permute.xlu0 %1047  ;;  %v1097_v41 = vpop.permute.xlu1 %1096  ;;  %1772 = vmatprep.subr.bf16.mxu1 %v3295_v3 }
 0x274   :  { %1469 = vst.msk [vmem:[#allocation2 + $0x1d0] sm:$0xff] %vm886_vm5, %v1024_v20  ;;  %v1669_v36 = vpack.c.bf16 %v1600_v32, %v1597_v26  ;;  %1099 = vst.msk [vmem:[#allocation2 + $0x98] sm:$0xff] %vm886_vm5, %v1097_v41  ;;  %v1598_v42 = vld [vmem:[#allocation2 + $0x40] sm:$0xff]  ;;  %v1608_v31 = vld [vmem:[#allocation2 + $0x90] sm:$0xff] }
 0x275   :  { %1081 = vst.msk [vmem:[#allocation2 + $0x80] sm:$0xff] %vm909_vm10, %v4265_v6  ;;  %1050 = vst.msk [vmem:[#allocation2 + $0x68] sm:$0xff] %vm909_vm10, %v1048_v40 }
 0x276   :  { %1087 = vst.msk [vmem:[#allocation2 + $0x80] sm:$0xff] %vm918_vm11, %v3909_v43  ;;  %1729 = vmatprep.subr.bf16.mxu0 %v1669_v36  ;;  %1056 = vst.msk [vmem:[#allocation2 + $0x68] sm:$0xff] %vm918_vm11, %v4128_v28  ;;  %v1674_v36 = vpack.c.bf16 %v1611_v22, %v1608_v31  ;;  %v1643_v31 = vld [vmem:[#allocation2 + $0x1a8] sm:$0xff] }
 0x277   :  { %1051 = vst.msk [vmem:[#allocation2 + $0x70] sm:$0xff] %vm911_vm6, %v1048_v40  ;;  %1508 = vst.msk [vmem:[#allocation2 + $0x1f0] sm:$0xff] %vm911_vm6, %v1097_v41  ;;  %1730 = vmatpush1.bf16.msra.mxu0 %v1668_v0  ;;  %v4376_v43 = vpop.permute.xlu0 %1130  ;;  %v1058_v6 = vpop.permute.xlu1 %1057 }
 0x278   :  { %1507 = vst.msk [vmem:[#allocation2 + $0x1e8] sm:$0xff] %vm909_vm10, %v1097_v41 }
 0x279   :  { %1513 = vst.msk [vmem:[#allocation2 + $0x1e8] sm:$0xff] %vm918_vm11, %v4153_v34 }
 0x27a   :  { %v1601_v53 = vld [vmem:[#allocation2 + $0x58] sm:$0xff]  ;;  %1133 = vst.msk [vmem:[#allocation2 + $0xb0] sm:$0xff] %vm886_vm5, %v4376_v43 }
 0x27b   :  { %1562 = vst.msk [vmem:[#allocation2 + $0x238] sm:$0xff] %vm911_vm6, %v4376_v43  ;;  %v1670_v54 = vpack.c.bf16 %v1601_v53, %v1598_v42  ;;  %v1105_v25 = vpop.permute.xlu0 %1104  ;;  %v4383_v28 = vpop.permute.xlu1 %1164 }
 0x27c   :  { %1060 = vst.msk [vmem:[#allocation2 + $0x70] sm:$0xff] %vm923_vm8, %v1058_v6  ;;  %v1614_v6 = vld [vmem:[#allocation2 + $0xc0] sm:$0xff] }
 0x27d   :  { %1773 = vmatpush1.bf16.msra.mxu1 %v1670_v54  ;;  %1107 = vst.msk [vmem:[#allocation2 + $0x98] sm:$0xff] %vm897_vm7, %v1105_v25  ;;  %v1603_v34 = vld [vmem:[#allocation2 + $0x68] sm:$0xff]  ;;  %v1606_v45 = vld [vmem:[#allocation2 + $0x80] sm:$0xff] }
 0x27e   :  { %1774 = vmatprep.subr.bf16.mxu1 %v3295_v3  ;;  %1167 = vst.msk [vmem:[#allocation2 + $0xc8] sm:$0xff] %vm886_vm5, %v4383_v28  ;;  %v1672_v57 = vpack.c.bf16 %v1606_v45, %v1603_v34  ;;  %v1623_v34 = vld [vmem:[#allocation2 + $0x108] sm:$0xff]  ;;  %v1620_v45 = vld [vmem:[#allocation2 + $0xf0] sm:$0xff] }
 0x27f   :  { %1546 = vst.msk [vmem:[#allocation2 + $0x220] sm:$0xff] %vm911_vm6, %v4383_v28  ;;  %v1139_v61 = vpop.permute.xlu0 %1138  ;;  %v1246_v47 = vpop.permute.xlu1 %1245 }
 0x280   :  { %1115 = vst.msk [vmem:[#allocation2 + $0x98] sm:$0xff] %vm909_vm10, %v4280_v18  ;;  %1731 = vmatprep.subr.bf16.mxu0 %v1672_v57  ;;  %1248 = vst.msk [vmem:[#allocation2 + $0xf8] sm:$0xff] %vm909_vm10, %v1246_v47 }
 0x281   :  { %1549 = vst.msk [vmem:[#allocation2 + $0x220] sm:$0xff] %vm923_vm8, %v1105_v25  ;;  %1533 = vst.msk [vmem:[#allocation2 + $0x208] sm:$0xff] %vm923_vm8, %v1139_v61  ;;  %1732 = vmatpush1.bf16.msra.mxu0 %v1671_v35  ;;  %v1680_v35 = vpack.c.bf16 %v1623_v34, %v1620_v45 }
 0x282   :  { %1121 = vst.msk [vmem:[#allocation2 + $0x98] sm:$0xff] %vm918_vm11, %v3917_v44  ;;  %1254 = vst.msk [vmem:[#allocation2 + $0xf8] sm:$0xff] %vm918_vm11, %v4072_v14  ;;  %v1613_v44 = vld [vmem:[#allocation2 + $0xb8] sm:$0xff]  ;;  %v1619_v14 = vld [vmem:[#allocation2 + $0xe8] sm:$0xff] }
 0x283   :  { %v1604_v1 = vld [vmem:[#allocation2 + $0x70] sm:$0xff]  ;;  %1141 = vst.msk [vmem:[#allocation2 + $0xb0] sm:$0xff] %vm897_vm7, %v1139_v61  ;;  %v1199_v5 = vpop.permute.xlu0 %1198  ;;  %v1280_v9 = vpop.permute.xlu1 %1279  ;;  %v1679_v20 = vpack.c.bf16 %v1619_v14, %v1616_v15 }
 0x284   :  { %1249 = vst.msk [vmem:[#allocation2 + $0x100] sm:$0xff] %vm911_vm6, %v1246_v47  ;;  %v1673_v18 = vpack.c.bf16 %v1607_v4, %v1604_v1  ;;  %1283 = vst.msk [vmem:[#allocation2 + $0x118] sm:$0xff] %vm911_vm6, %v1280_v9  ;;  %v1629_v1 = vld [vmem:[#allocation2 + $0x138] sm:$0xff] }
 0x285   :  { %1149 = vst.msk [vmem:[#allocation2 + $0xb0] sm:$0xff] %vm909_vm10, %v4290_v21  ;;  %1282 = vst.msk [vmem:[#allocation2 + $0x110] sm:$0xff] %vm909_vm10, %v1280_v9  ;;  %v1676_v21 = vpack.c.bf16 %v1613_v44, %v1610_v13 }
 0x286   :  { %1155 = vst.msk [vmem:[#allocation2 + $0xb0] sm:$0xff] %vm918_vm11, %v3929_v46  ;;  %1775 = vmatpush1.bf16.msra.mxu1 %v1673_v18  ;;  %1288 = vst.msk [vmem:[#allocation2 + $0x110] sm:$0xff] %vm918_vm11, %v4083_v16 }
 0x287   :  { %1776 = vmatprep.subr.bf16.mxu1 %v3295_v3  ;;  %1201 = vst.msk [vmem:[#allocation2 + $0xe0] sm:$0xff] %vm886_vm5, %v1199_v5  ;;  %v4412_v49 = vpop.permute.xlu0 %1172  ;;  %v1290_v46 = vpop.permute.xlu1 %1289 }
 0x288   :  { %1175 = vst.msk [vmem:[#allocation2 + $0xc8] sm:$0xff] %vm897_vm7, %v4412_v49 }
 0x289   :  { %1292 = vst.msk [vmem:[#allocation2 + $0x118] sm:$0xff] %vm923_vm8, %v1290_v46  ;;  %v1609_v10 = vld [vmem:[#allocation2 + $0x98] sm:$0xff]  ;;  %v1632_v46 = vld [vmem:[#allocation2 + $0x150] sm:$0xff] }
 0x28a   :  { %1777 = vmatpush1.bf16.msra.mxu1 %v1676_v21  ;;  %1183 = vst.msk [vmem:[#allocation2 + $0xc8] sm:$0xff] %vm909_vm10, %v4306_v27  ;;  %v1621_v54 = vld [vmem:[#allocation2 + $0xf8] sm:$0xff] }
 0x28b   :  { %1778 = vmatprep.subr.bf16.mxu1 %v3295_v3  ;;  %1189 = vst.msk [vmem:[#allocation2 + $0xc8] sm:$0xff] %vm918_vm11, %v3941_v48  ;;  %v1207_v26 = vpop.permute.xlu0 %1206  ;;  %v1314_v32 = vpop.permute.xlu1 %1313 }
 0x28c   :  { %1209 = vst.msk [vmem:[#allocation2 + $0xe0] sm:$0xff] %vm897_vm7, %v1207_v26 }
 0x28d   :  { %v1612_v16 = vld [vmem:[#allocation2 + $0xb0] sm:$0xff]  ;;  %1565 = vst.msk [vmem:[#allocation2 + $0x238] sm:$0xff] %vm923_vm8, %v1207_v26  ;;  %v1649_v26 = vld [vmem:[#allocation2 + $0x1d8] sm:$0xff] }
 0x28e   :  { %1779 = vmatpush1.bf16.msra.mxu1 %v1679_v20  ;;  %v1675_v52 = vpack.c.bf16 %v1612_v16, %v1609_v10  ;;  %1316 = vst.msk [vmem:[#allocation2 + $0x128] sm:$0xff] %vm909_vm10, %v1314_v32  ;;  %1217 = vst.msk [vmem:[#allocation2 + $0xe0] sm:$0xff] %vm909_vm10, %v4313_v29  ;;  %v1624_v40 = vld [vmem:[#allocation2 + $0x110] sm:$0xff]  ;;  %v1637_v10 = vld [vmem:[#allocation2 + $0x178] sm:$0xff] }
 0x28f   :  { %1780 = vmatprep.subr.bf16.mxu1 %v3295_v3  ;;  %1317 = vst.msk [vmem:[#allocation2 + $0x130] sm:$0xff] %vm911_vm6, %v1314_v32  ;;  %v1256_v48 = vpop.permute.xlu0 %1255  ;;  %v1348_v27 = vpop.permute.xlu1 %1347 }
 0x290   :  { %1733 = vmatprep.subr.bf16.mxu0 %v1675_v52  ;;  %1322 = vst.msk [vmem:[#allocation2 + $0x128] sm:$0xff] %vm918_vm11, %v4094_v17  ;;  %1223 = vst.msk [vmem:[#allocation2 + $0xe0] sm:$0xff] %vm918_vm11, %v3953_v50  ;;  %v1617_v17 = vld [vmem:[#allocation2 + $0xd8] sm:$0xff] }
 0x291   :  { %1734 = vmatpush1.bf16.msra.mxu0 %v1674_v36  ;;  %1258 = vst.msk [vmem:[#allocation2 + $0x100] sm:$0xff] %vm923_vm8, %v1256_v48  ;;  %v1677_v53 = vpack.c.bf16 %v1617_v17, %v1614_v6  ;;  %v1625_v51 = vld [vmem:[#allocation2 + $0x118] sm:$0xff]  ;;  %v1638_v36 = vld [vmem:[#allocation2 + $0x180] sm:$0xff] }
 0x292   :  { %1350 = vst.msk [vmem:[#allocation2 + $0x140] sm:$0xff] %vm909_vm10, %v1348_v27  ;;  %v1615_v50 = vld [vmem:[#allocation2 + $0xc8] sm:$0xff] }
 0x293   :  { %1351 = vst.msk [vmem:[#allocation2 + $0x148] sm:$0xff] %vm911_vm6, %v1348_v27  ;;  %v1324_v33 = vpop.permute.xlu0 %1323  ;;  %v1400_v29 = vpop.permute.xlu1 %1399 }
 0x294   :  { %1356 = vst.msk [vmem:[#allocation2 + $0x140] sm:$0xff] %vm918_vm11, %v4103_v19 }
 0x295   :  { %1326 = vst.msk [vmem:[#allocation2 + $0x130] sm:$0xff] %vm923_vm8, %v1324_v33 }
 0x296   :  { %1402 = vst.msk [vmem:[#allocation2 + $0x170] sm:$0xff] %vm886_vm5, %v1400_v29  ;;  %v1647_v29 = vld [vmem:[#allocation2 + $0x1c8] sm:$0xff] }
 0x297   :  { %1407 = vst.msk [vmem:[#allocation2 + $0x170] sm:$0xff] %vm897_vm7, %v4042_v7  ;;  %v1618_v0 = vld [vmem:[#allocation2 + $0xe0] sm:$0xff]  ;;  %v1382_v19 = vpop.permute.xlu0 %1381  ;;  %v1358_v42 = vpop.permute.xlu1 %1357  ;;  %v1681_v7 = vpack.c.bf16 %v1624_v40, %v1621_v54  ;;  %v1627_v61 = vld [vmem:[#allocation2 + $0x128] sm:$0xff]  ;;  %v1644_v40 = vld [vmem:[#allocation2 + $0x1b0] sm:$0xff] }
 0x298   :  { %1409 = vst.msk [vmem:[#allocation2 + $0x170] sm:$0xff] %vm909_vm10, %v4164_v38  ;;  %v1678_v41 = vpack.c.bf16 %v1618_v0, %v1615_v50  ;;  %v1622_v25 = vld [vmem:[#allocation2 + $0x100] sm:$0xff]  ;;  %1384 = vst.msk [vmem:[#allocation2 + $0x158] sm:$0xff] %vm909_vm10, %v1382_v19  ;;  %v1651_v50 = vld [vmem:[#allocation2 + $0x1e8] sm:$0xff] }
 0x299   :  { %1415 = vst.msk [vmem:[#allocation2 + $0x170] sm:$0xff] %vm918_vm11, %v4044_v8  ;;  %v1682_v38 = vpack.c.bf16 %v1625_v51, %v1622_v25  ;;  %1390 = vst.msk [vmem:[#allocation2 + $0x158] sm:$0xff] %vm918_vm11, %v4119_v23  ;;  %v1626_v23 = vld [vmem:[#allocation2 + $0x120] sm:$0xff] }
 0x29a   :  { %1385 = vst.msk [vmem:[#allocation2 + $0x160] sm:$0xff] %vm911_vm6, %v1382_v19  ;;  %1735 = vmatprep.subr.bf16.mxu0 %v1678_v41  ;;  %v1683_v44 = vpack.c.bf16 %v1629_v1, %v1626_v23  ;;  %v1692_v19 = vpack.c.bf16 %v1647_v29, %v1644_v40  ;;  %v1658_v1 = vld [vmem:[#allocation2 + $0x220] sm:$0xff]  ;;  %v1866_v40 = vlaneseq }
 0x29b   :  { %1360 = vst.msk [vmem:[#allocation2 + $0x148] sm:$0xff] %vm923_vm8, %v1358_v42  ;;  %1736 = vmatpush1.bf16.msra.mxu0 %v1677_v53  ;;  %v1630_v8 = vld [vmem:[#allocation2 + $0x140] sm:$0xff]  ;;  %1781 = vmatpush1.bf16.msra.mxu1 %v1682_v38  ;;  %v1443_v57 = vpop.permute.xlu0 %1442  ;;  %v1392_v58 = vpop.permute.xlu1 %1391 }
 0x29c   :  { %1737 = vmatprep.subr.bf16.mxu0 %v1681_v7  ;;  %1782 = vmatprep.subr.bf16.mxu1 %v3295_v3  ;;  %1445 = vst.msk [vmem:[#allocation2 + $0x1a0] sm:$0xff] %vm897_vm7, %v1443_v57  ;;  %v1684_v47 = vpack.c.bf16 %v1630_v8, %v1627_v61  ;;  %v1628_v5 = vld [vmem:[#allocation2 + $0x130] sm:$0xff]  ;;  %v1654_v42 = vld [vmem:[#allocation2 + $0x200] sm:$0xff]  ;;  %v1655_v8 = vld [vmem:[#allocation2 + $0x208] sm:$0xff] }
 0x29d   :  { %1394 = vst.msk [vmem:[#allocation2 + $0x160] sm:$0xff] %vm923_vm8, %v1392_v58  ;;  %v1650_v53 = vld [vmem:[#allocation2 + $0x1e0] sm:$0xff]  ;;  %v1661_v61 = vld [vmem:[#allocation2 + $0x238] sm:$0xff] }
 0x29e   :  { %1447 = vst.msk [vmem:[#allocation2 + $0x1a0] sm:$0xff] %vm909_vm10, %v4195_v55  ;;  %v1635_v55 = vld [vmem:[#allocation2 + $0x168] sm:$0xff]  ;;  %v1700_v23 = vpack.c.bf16 %v1661_v61, %v1658_v1 }
 0x29f   :  { %1738 = vmatpush1.bf16.msra.mxu0 %v1680_v35  ;;  %1450 = vst.msk [vmem:[#allocation2 + $0x1a0] sm:$0xff] %vm918_vm11, %v3849_v30  ;;  %v1557_v4 = vpop.permute.xlu0 %1556  ;;  %v1427_v18 = vpop.permute.xlu1 %1426  ;;  %v1686_v22 = vpack.c.bf16 %v1635_v55, %v1632_v46 }
 0x2a0   :  { %1739 = vmatprep.subr.bf16.mxu0 %v1684_v47  ;;  %1559 = vst.msk [vmem:[#allocation2 + $0x230] sm:$0xff] %vm897_vm7, %v1557_v4  ;;  %1429 = vst.msk [vmem:[#allocation2 + $0x188] sm:$0xff] %vm897_vm7, %v1427_v18  ;;  %v1633_v21 = vld [vmem:[#allocation2 + $0x158] sm:$0xff]  ;;  %v1636_v14 = vld [vmem:[#allocation2 + $0x170] sm:$0xff] }
 0x2a1   :  { %1561 = vst.msk [vmem:[#allocation2 + $0x230] sm:$0xff] %vm909_vm10, %v4376_v43  ;;  %1431 = vst.msk [vmem:[#allocation2 + $0x188] sm:$0xff] %vm909_vm10, %v4231_v59  ;;  %v1687_v30 = vpack.c.bf16 %v1636_v14, %v1633_v21  ;;  %v3239_v21 = vld [vmem:[%s4868_s3] ss:$8 sps:$4 sm:$0xff]  }
 0x2a2   :  { %v1631_v9 = vld [vmem:[#allocation2 + $0x148] sm:$0xff]  ;;  %1564 = vst.msk [vmem:[#allocation2 + $0x230] sm:$0xff] %vm918_vm11, %v4060_v12  ;;  %1434 = vst.msk [vmem:[#allocation2 + $0x188] sm:$0xff] %vm918_vm11, %v3881_v37  ;;  %v1640_v37 = vld [vmem:[#allocation2 + $0x190] sm:$0xff] }
 0x2a3   :  { %v1685_v13 = vpack.c.bf16 %v1631_v9, %v1628_v5  ;;  %1740 = vmatpush1.bf16.msra.mxu0 %v1683_v44  ;;  %v1475_v15 = vpop.permute.xlu0 %1474  ;;  %v1459_v20 = vpop.permute.xlu1 %1458 }
 0x2a4   :  { %1741 = vmatprep.subr.bf16.mxu0 %v1687_v30  ;;  %v1634_v43 = vld [vmem:[#allocation2 + $0x160] sm:$0xff]  ;;  %1477 = vst.msk [vmem:[#allocation2 + $0x1d0] sm:$0xff] %vm897_vm7, %v1475_v15  ;;  %1461 = vst.msk [vmem:[#allocation2 + $0x1b8] sm:$0xff] %vm897_vm7, %v1459_v20 }
 0x2a5   :  { %1783 = vmatpush1.bf16.msra.mxu1 %v1685_v13  ;;  %v1688_v59 = vpack.c.bf16 %v1637_v10, %v1634_v43  ;;  %1485 = vst.msk [vmem:[#allocation2 + $0x1d0] sm:$0xff] %vm909_vm10, %v4311_v11  ;;  %1463 = vst.msk [vmem:[#allocation2 + $0x1b8] sm:$0xff] %vm909_vm10, %v4243_v63  ;;  %v1691_v11 = vpack.c.bf16 %v1643_v31, %v1640_v37  ;;  %v1641_v63 = vld [vmem:[#allocation2 + $0x198] sm:$0xff]  ;;  %v2044_v43 = vld [vmem:[%s4869_s4] sm:$0xff] }
 0x2a6   :  { %1784 = vmatprep.subr.bf16.mxu1 %v3295_v3  ;;  %1488 = vst.msk [vmem:[#allocation2 + $0x1d0] sm:$0xff] %vm918_vm11, %v3889_v39  ;;  %1466 = vst.msk [vmem:[#allocation2 + $0x1b8] sm:$0xff] %vm918_vm11, %v3828_v24  ;;  %v1642_v24 = vld [vmem:[#allocation2 + $0x1a0] sm:$0xff]  ;;  %v1689_v33 = vpack.c.bf16 %v1641_v63, %v1638_v36 }
 0x2a7   :  { %1742 = vmatpush1.bf16.msra.mxu0 %v1686_v22  ;;  %v1553_v16 = vpop.permute.xlu0 %1552  ;;  %v1541_v52 = vpop.permute.xlu1 %1540 }
 0x2a8   :  { %1555 = vst.msk [vmem:[#allocation2 + $0x228] sm:$0xff] %vm892_vm2, %v1553_v16 }
 0x2a9   :  { %1785 = vmatpush1.bf16.msra.mxu1 %v1688_v59  ;;  %1543 = vst.msk [vmem:[#allocation2 + $0x218] sm:$0xff] %vm897_vm7, %v1541_v52  ;;  %v1639_v39 = vld [vmem:[#allocation2 + $0x188] sm:$0xff]  ;;  %v1660_v38 = vld [vmem:[#allocation2 + $0x230] sm:$0xff] }
 0x2aa   :  { %1786 = vmatprep.subr.bf16.mxu1 %v3295_v3  ;;  %1560 = vst.msk [vmem:[#allocation2 + $0x228] sm:$0xff] %vm903_vm3, %v3988_v60  ;;  %v1690_v32 = vpack.c.bf16 %v1642_v24, %v1639_v39  ;;  %v1646_v60 = vld [vmem:[#allocation2 + $0x1c0] sm:$0xff] }
 0x2ab   :  { %1545 = vst.msk [vmem:[#allocation2 + $0x218] sm:$0xff] %vm909_vm10, %v4383_v28  ;;  %v1515_v48 = vpop.permute.xlu0 %1514  ;;  %v1537_v27 = vpop.permute.xlu1 %1536  ;;  %v1694_v28 = vpack.c.bf16 %v1649_v26, %v1646_v60 }
 0x2ac   :  { %1563 = vst.msk [vmem:[#allocation2 + $0x228] sm:$0xff] %vm916_vm4, %v4060_v12  ;;  %1743 = vmatprep.subr.bf16.mxu0 %v1690_v32  ;;  %v1845_v32 = vld [vmem:[%s4869_s4 + $0x8] sm:$0xff]  ;;  %s4968_s4 = smov 64  }
 0x2ad   :  { %1548 = vst.msk [vmem:[#allocation2 + $0x218] sm:$0xff] %vm918_vm11, %v3997_v62  ;;  %1787 = vmatpush1.bf16.msra.mxu1 %v1691_v11  ;;  %1744 = vmatpush1.bf16.msra.mxu0 %v1689_v33  ;;  %v1645_v12 = vld [vmem:[#allocation2 + $0x1b8] sm:$0xff]  ;;  %v1648_v17 = vld [vmem:[#allocation2 + $0x1d0] sm:$0xff] }
 0x2ae   :  { %1788 = vmatprep.subr.bf16.mxu1 %v3295_v3  ;;  %1517 = vst.msk [vmem:[#allocation2 + $0x1f0] sm:$0xff] %vm923_vm8, %v1515_v48  ;;  %v1693_v0 = vpack.c.bf16 %v1648_v17, %v1645_v12 }
 0x2af   :  { %1539 = vst.msk [vmem:[#allocation2 + $0x210] sm:$0xff] %vm892_vm2, %v1537_v27  ;;  %v1573_v41 = vpop.permute.xlu0 %1572  ;;  %v1569_v6 = vpop.permute.xlu1 %1568 }
 0x2b0   :  { %1544 = vst.msk [vmem:[#allocation2 + $0x210] sm:$0xff] %vm903_vm3, %v4023_v2  ;;  %1745 = vmatprep.subr.bf16.mxu0 %v1693_v0  ;;  %v1696_v2 = vpack.c.bf16 %v1654_v42, %v1651_v50  ;;  %v3343_v50 = vmov 1983009808  }
 0x2b1   :  { %1547 = vst.msk [vmem:[#allocation2 + $0x210] sm:$0xff] %vm916_vm4, %v3997_v62  ;;  %1789 = vmatpush1.bf16.msra.mxu1 %v1694_v28  ;;  %1746 = vmatpush1.bf16.msra.mxu0 %v1692_v19  ;;  %v1653_v62 = vld [vmem:[#allocation2 + $0x1f8] sm:$0xff]  ;;  %v1864_v0 = vunpack.c.l.s4 %v3343_v50  ;;  %v1867_v19 = vshrl.u32 %v1866_v40, 7  ;;  %v3252_v40 = vld [vmem:[%s4870_s5 + $0x90] sm:$0xff]  }
 0x2b2   :  { %1790 = vmatprep.subr.bf16.mxu1 %v3295_v3  ;;  %1575 = vst.msk [vmem:[#allocation2 + $0x248] sm:$0xff] %vm897_vm7, %v1573_v41  ;;  %1747 = vmatprep.subr.bf16.mxu0 %v1696_v2  ;;  %v1695_v7 = vpack.c.bf16 %v1653_v62, %v1650_v53  ;;  %v3251_v50 = vld [vmem:[%s4870_s5 + $0x58] sm:$0xff]   ;;  %vm1922_vm7 = vcmask 1041280  }
 0x2b3   :  { %1571 = vst.msk [vmem:[#allocation2 + $0x240] sm:$0xff] %vm892_vm2, %v1569_v6  ;;  %v1581_v25 = vpop.permute.xlu0 %1580  ;;  %v1577_v51 = vpop.permute.xlu1 %1576  ;;  %v1659_v35 = vld [vmem:[#allocation2 + $0x228] sm:$0xff]  ;;  %v1865_v6 = vunpack.c.0.s8 %v1864_v0  ;;  %vm1881_vm2 = vcmask 975488  }
 0x2b4   :  { %v1657_v54 = vld [vmem:[#allocation2 + $0x218] sm:$0xff]  ;;  %1583 = vst.msk [vmem:[#allocation2 + $0x248] sm:$0xff] %vm909_vm10, %v1581_v25  ;;  %vm1913_vm10 = vcmask 909888  }
 0x2b5   :  { %v1652_v34 = vld [vmem:[#allocation2 + $0x1f0] sm:$0xff]  ;;  %1584 = vst.msk [vmem:[#allocation2 + $0x250] sm:$0xff] %vm911_vm6, %v1581_v25  ;;  %v1699_v45 = vpack.c.bf16 %v1660_v38, %v1657_v54  ;;  %1748 = vmatpush1.bf16.msra.mxu0 %v1695_v7  ;;  %v4548_v54 = vsub.s32 %v1865_v6, %v1867_v19  ;;  %v3254_v6 = vld [vmem:[%s4870_s5 + $0xd8] sm:$0xff]   ;;  %vm1906_vm6 = vcmask 581888  }
 0x2b6   :  { %1579 = vst.msk [vmem:[#allocation2 + $0x240] sm:$0xff] %vm903_vm3, %v1577_v51  ;;  %v1697_v57 = vpack.c.bf16 %v1655_v8, %v1652_v34  ;;  %vm1891_vm3 = vcmask 1041344  }
 0x2b7   :  { %1586 = vst.msk [vmem:[#allocation2 + $0x248] sm:$0xff] %vm918_vm11, %v4046_v56  ;;  %1749 = vmatprep.subr.bf16.mxu0 %v1699_v45 }
 0x2b8   :  { %1587 = vst.msk [vmem:[#allocation2 + $0x250] sm:$0xff] %vm923_vm8, %v4412_v49  ;;  %v1656_v58 = vld [vmem:[#allocation2 + $0x210] sm:$0xff]  ;;  %1791 = vmatpush1.bf16.msra.mxu1 %v1697_v57  ;;  %vm1923_vm8 = vcmask 190466  }
 0x2b9   :  { %1585 = vst.msk [vmem:[#allocation2 + $0x240] sm:$0xff] %vm916_vm4, %v4046_v56  ;;  %v1698_v47 = vpack.c.bf16 %v1659_v35, %v1656_v58  ;;  %1792 = vmatprep.subr.bf16.mxu1 %v3295_v3  ;;  %vm1892_vm4 = vcmask 256002   ;;  %vm4721_vm11 = vmor %vm1923_vm8, %vm1922_vm7  ;;  %vm1986_vm7 = vcmask 59394   ;;  %vm1982_vm8 = vcmask 785408  }
 0x2ba   :  { %vm4712_vm5 = vmor %vm1892_vm4, %vm1891_vm3  ;;  %vm1962_vm4 = vcmask 450688  }
 0x2bb   :  { %1750 = vmatpush1.bf16.msra.mxu0 %v1698_v47 }
 0x2bc   :  { %1793 = vmatpush1.bf16.msra.mxu1 %v1700_v23 }
 0x2bd   :  { %1794 = vmatprep.subr.bf16.mxu1 %v3295_v3 }
 0x2be   :  { %v1663_v4 = vld [vmem:[#allocation2 + $0x248] sm:$0xff] }
 0x2bf   :  { %v1664_v18 = vld [vmem:[#allocation2 + $0x250] sm:$0xff]  ;;  %v1702_v56 = vpack.c.bf16 %v1663_v4, %v1663_v4 }
 0x2c0   :  { %v1662_v49 = vld [vmem:[#allocation2 + $0x240] sm:$0xff]  ;;  %v1703_v5 = vpack.c.bf16 %v1664_v18, %v1664_v18 }
 0x2c1   :  { %v1701_v44 = vpack.c.bf16 %v1662_v49, %v1662_v49  ;;  %2980 = vmatprep.subr.msk.bf16.mxu0 %vm1717_vm12, %v1702_v56 }
 0x2c2   :  { %v1725_v13 = vsel %vm1717_vm12, %v1703_v5, 0 }
 0x2c3   :  { %v1719_v9 = vsel %vm1717_vm12, %v1701_v44, 0  ;;  %1795 = vmatpush1.bf16.msra.mxu1 %v1725_v13 }
 0x2c4   :  { %1752 = vmatpush1.bf16.msra.mxu0 %v1719_v9 }
 0x2c6   :  { %1803 = vmatmul.mubr.bf16.vlgmr.msra.gmra.mrb[20].mxu1 %v3239_v21 }
 0x2c7   :  { %1760 = vmatmul.mubr.bf16.vlgmr.msra.gmra.mrb[12].mxu0 %v3239_v21 }
 0x399   :  { %v1804_v14 = vpop.f32.mrb[20].mxu1 }
 0x39a   :  { %v1761_v3 = vpop.f32.mrb[12].mxu0  ;;  %v1806_v30 = vpop.f32.mrb[21].mxu1 }
 0x39b   :  { %1813 = vrot.lane.b32.xlu1 %v1761_v3, %s4940_s13  ;;  %v1763_v46 = vpop.f32.mrb[13].mxu0  ;;  %v1807_v15 = vpop.f32.mrb[22].mxu1 }
 0x39c   :  { %1823 = vrot.lane.b32.xlu0 %v1763_v46, %s4940_s13  ;;  %v4519_v55 = vpop.f32.mrb[14].mxu0  ;;  %v1809_v22 = vpop.f32.mrb[23].mxu1 }
 0x39d   :  { %v4521_v20 = vpop.f32.mrb[15].mxu0 }
 0x39f   :  { %2015 = vrot.lane.b32.xlu1 %v1804_v14, %s4940_s13 }
 0x3a0   :  { %1815 = vrot.lane.b32.xlu0 %v4519_v55, %s4940_s13 }
 0x3a3   :  { %1825 = vrot.lane.b32.xlu1 %v4521_v20, %s4940_s13 }
 0x3a4   :  { %2017 = vrot.lane.b32.xlu0 %v1807_v15, %s4940_s13 }
 0x3a7   :  { %1848 = vperm.xlu1 %3236, %v2044_v43  }
 0x3a8   :  { %2048 = vperm.xlu0 %3235, %v2044_v43  }
 0x40d   :  { %v1814_v10 = vpop.permute.xlu1 %1813 }
 0x40e   :  { %v1819_v59 = vmax.f32 %v1761_v3, %v1814_v10  ;;  %v1824_v37 = vpop.permute.xlu0 %1823 }
 0x40f   :  { %v2011_v16 = vmax.f32 %v1763_v46, %v1824_v37  ;;  %v1828_v39 = vsel %vm1827_vm13, %v1814_v10, %v1824_v37 }
 0x410   :  { %v1832_v36 = vmax.f32 %v1761_v3, %v1828_v39  ;;  %v3242_v39 = vld [vmem:[%s4870_s5 + $0xc0] sm:$0xff]  }
 0x411   :  { %v2016_v52 = vpop.permute.xlu1 %2015  ;;  %3081 = vmatprep.subr.bf16.mxu1 %v3242_v39 }
 0x412   :  { %v2021_v31 = vmax.f32 %v1763_v46, %v2016_v52  ;;  %v2022_v11 = vmax.f32 %v1804_v14, %v2016_v52  ;;  %v1816_v63 = vpop.permute.xlu0 %1815 }
 0x413   :  { %v1820_v24 = vmax.f32 %v4519_v55, %v1816_v63 }
 0x414   :  { %2029 = vrot.lane.b32.xlu1 %v2021_v31, %s4944_s15  ;;  %2031 = vrot.lane.b32.xlu0 %v2022_v11, %s4944_s15  ;;  %v3241_v11 = vld [vmem:[%s4870_s5] sm:$0xff]  }
 0x415   :  { %v1826_v26 = vpop.permute.xlu1 %1825 }
 0x416   :  { %v2012_v48 = vmax.f32 %v4521_v20, %v1826_v26  ;;  %v2018_v27 = vpop.permute.xlu0 %2017  ;;  %v1829_v60 = vsel %vm1827_vm13, %v1816_v63, %v1826_v26  ;;  %v3244_v26 = vld [vmem:[%s4870_s5 + $0x80] sm:$0xff]  }
 0x417   :  { %v2023_v33 = vmax.f32 %v4521_v20, %v2018_v27  ;;  %v1833_v28 = vmax.f32 %v4519_v55, %v1829_v60  ;;  %v2024_v29 = vmax.f32 %v1807_v15, %v2018_v27  ;;  %3082 = vmatpush3.bf16.msra.mxu1 %v3244_v26  ;;  %v3246_v27 = vld [vmem:[%s4870_s5 + $0xc8] sm:$0xff]  }
 0x418   :  { %1836 = vrot.lane.b32.xlu1 %v1832_v36, %s4944_s15  ;;  %1853 = vperm.xlu0 %3235, %v1845_v32  }
 0x419   :  { %3083 = vmatprep.subr.bf16.mxu1 %v3246_v27 }
 0x41c   :  { %2053 = vperm.xlu1 %3236, %v1845_v32   ;;  %2033 = vrot.lane.b32.xlu0 %v2023_v33, %s4944_s15  ;;  %v3247_v33 = vld [vmem:[%s4870_s5 + $0x50] sm:$0xff]  }
 0x420   :  { %2035 = vrot.lane.b32.xlu1 %v2024_v29, %s4944_s15  ;;  %1838 = vrot.lane.b32.xlu0 %v1833_v28, %s4944_s15  ;;  %v3248_v29 = vld [vmem:[%s4870_s5 + $0x88] sm:$0xff]  }
 0x421   :  { %3084 = vmatpush3.bf16.msra.mxu1 %v3248_v29 }
 0x426   :  { %v1849_v12 = vpop.permute.xlu1 %1848 }
 0x427   :  { %v2049_v17 = vpop.permute.xlu0 %2048 }
 0x486   :  { %v2030_v41 = vpop.permute.xlu1 %2029  ;;  %v2032_v42 = vpop.permute.xlu0 %2031 }
 0x487   :  { %v2038_v2 = vsel %vm2037_vm14, %v2030_v41, %v2032_v42  ;;  %v3253_v41 = vld [vmem:[%s4870_s5 + $0x18] sm:$0xff]   ;;  %v3255_v42 = vld [vmem:[%s4870_s5 + $0x60] sm:$0xff]  }
 0x488   :  { %v2042_v53 = vmax.f32 %v2011_v16, %v2038_v2  ;;  %v3240_v16 = vld [vmem:[%s4870_s5 + $0x40] sm:$0xff]  }
 0x489   :  { %3059 = vmatprep.subr.bf16.mxu0 %v3240_v16 }
 0x48a   :  { %v2056_v62 = vadd.f32 %v2049_v17, %v2042_v53  ;;  %v1837_v25 = vpop.permute.xlu1 %1836  ;;  %3060 = vmatpush3.bf16.msra.mxu0 %v3241_v11  ;;  %v3250_v17 = vld [vmem:[%s4870_s5 + $0xd0] sm:$0xff]   ;;  %v3256_v53 = vld [vmem:[%s4870_s5 + $0x98] sm:$0xff]  }
 0x48b   :  { %v1842_v51 = vmax.f32 %v1819_v59, %v1837_v25  ;;  %3085 = vmatprep.subr.bf16.mxu1 %v3250_v17  ;;  %v3258_v25 = vld [vmem:[%s4870_s5 + $0xe0] sm:$0xff]  }
 0x48c   :  { %v2058_v7 = vmax.f32 %v2056_v62, 0.0  ;;  %3086 = vmatpush3.bf16.msra.mxu1 %v3252_v40  ;;  %v3257_v62 = vld [vmem:[%s4870_s5 + $0x20] sm:$0xff]  }
 0x48d   :  { %v1856_v38 = vadd.f32 %v1849_v12, %v1842_v51  ;;  %v3249_v12 = vld [vmem:[%s4870_s5 + $0x10] sm:$0xff]   ;;  %3087 = vmatprep.subr.bf16.mxu1 %v3254_v6 }
 0x48e   :  { %v2067_v34 = vrot.slane %v2058_v7, %v4548_v54  ;;  %v2091_v57 = vcombine.high %v2058_v7, %v2058_v7  ;;  %v3259_v7 = vld [vmem:[%s4870_s5 + $0x68] sm:$0xff]  }
 0x48f   :  { %v1858_v8 = vmax.f32 %v1856_v38, 0.0  ;;  %v3260_v38 = vld [vmem:[%s4870_s5 + $0xa0] sm:$0xff]  }
 0x490   :  { %2068 = vrot.lane.b32.xlu0 %v2067_v34, %s4950_s30  ;;  %v2991_v45 = vrot.slane %v2067_v34, 9  ;;  %v2078_v58 = vcombine.high %v2067_v34, %v2067_v34  ;;  %v4556_v61 = vrot.slane %v2091_v57, %v4548_v54  ;;  %3088 = vmatpush3.bf16.msra.mxu1 %v3256_v53  ;;  %v3261_v34 = vld [vmem:[%s4870_s5 + $0x28] sm:$0xff]   ;;  %v3263_v57 = vld [vmem:[%s4870_s5 + $0x70] sm:$0xff]  }
 0x491   :  { %1861 = vst.msk [vmem:[#allocation3] sm:$0x1] %vm1860_vm15, %v1858_v8  ;;  %v1869_v9 = vrot.slane %v1858_v8, %v4548_v54  ;;  %v1895_v46 = vcombine.high %v1858_v8, %v1858_v8  ;;  %3089 = vmatprep.subr.bf16.mxu1 %v3258_v25  ;;  %v3262_v8 = vld [vmem:[%s4870_s5 + $0xe8] sm:$0xff]  }
 0x492   :  { %2074 = vrot.lane.b32.xlu1 %v2991_v45, %s4933_s27  ;;  %v2992_v47 = vrot.slane %v2078_v58, 9  ;;  %v4561_v4 = vcombine.high %v4556_v61, %v4556_v61  ;;  %v2993_v43 = vrot.slane %v4556_v61, 9 }
 0x493   :  { %v1877_v55 = vcombine.high %v1869_v9, %v1869_v9  ;;  %v1902_v20 = vrot.slane %v1895_v46, %v4548_v54  ;;  %v2983_v36 = vrot.slane %v1869_v9, 9 }
 0x494   :  { %v2994_v2 = vrot.slane %v4561_v4, 9  ;;  %3090 = vmatpush3.bf16.msra.mxu1 %v3260_v38 }
 0x495   :  { %v2984_v22 = vrot.slane %v1877_v55, 9  ;;  %v2985_v10 = vrot.slane %v1902_v20, 9  ;;  %v1915_v28 = vcombine.high %v1902_v20, %v1902_v20  ;;  %3091 = vmatprep.subr.bf16.mxu1 %v3262_v8 }
 0x496   :  { %2079 = vrot.lane.b32.xlu1 %v2078_v58, %s4944_s15 }
 0x497   :  { %v1854_v35 = vpop.permute.xlu0 %1853  ;;  %v2986_v0 = vrot.slane %v1915_v28, 9 }
 0x49a   :  { %2085 = vrot.lane.b32.xlu1 %v2992_v47, %s4940_s13  ;;  %v3265_v47 = vld [vmem:[%s4870_s5 + $0x30] sm:$0xff]  }
 0x49b   :  { %v2054_v1 = vpop.permute.xlu1 %2053  ;;  %v2034_v23 = vpop.permute.xlu0 %2033 }
 0x49e   :  { %2108 = vrot.lane.b32.xlu1 %v4561_v4, %s4955_s21  ;;  %v3267_v4 = vld [vmem:[%s4870_s5 + $0x78] sm:$0xff]  }
 0x49f   :  { %v2036_v49 = vpop.permute.xlu1 %2035  ;;  %v1839_v18 = vpop.permute.xlu0 %1838 }
 0x4a0   :  { %v2039_v56 = vsel %vm2037_vm14, %v2034_v23, %v2036_v49  ;;  %v1843_v44 = vmax.f32 %v1820_v24, %v1839_v18  ;;  %v3243_v24 = vld [vmem:[%s4870_s5 + $0x48] sm:$0xff]   ;;  %v3268_v18 = vld [vmem:[%s4870_s5 + $0xb0] sm:$0xff]   ;;  %vm1955_vm14 = vcmask 124930  }
 0x4a1   :  { %v2043_v5 = vmax.f32 %v2012_v48, %v2039_v56  ;;  %3061 = vmatprep.subr.bf16.mxu0 %v3243_v24  ;;  %v3245_v48 = vld [vmem:[%s4870_s5 + $0x8] sm:$0xff]   ;;  %v3269_v56 = vld [vmem:[%s4870_s5 + $0x38] sm:$0xff]  }
 0x4a2   :  { %v1857_v13 = vadd.f32 %v1854_v35, %v1843_v44  ;;  %3062 = vmatpush3.bf16.msra.mxu0 %v3245_v48  ;;  %v3264_v35 = vld [vmem:[%s4870_s5 + $0xa8] sm:$0xff]   ;;  %v3270_v44 = vld [vmem:[%s4870_s5 + $0xf8] sm:$0xff]  }
 0x4a3   :  { %v2057_v21 = vadd.f32 %v2054_v1, %v2043_v5  ;;  %3063 = vmatprep.subr.bf16.mxu0 %v3247_v33  ;;  %3092 = vmatpush3.bf16.msra.mxu1 %v3264_v35  ;;  %v3266_v1 = vld [vmem:[%s4870_s5 + $0xf0] sm:$0xff]   ;;  %v3271_v5 = vld [vmem:[%s4870_s5 + $0xb8] sm:$0xff]  }
 0x4a4   :  { %v1859_v3 = vmax.f32 %v1857_v13, 0.0  ;;  %3093 = vmatprep.subr.bf16.mxu1 %v3266_v1  ;;  %v3344_v13 = vmov 0.0  }
 0x4a5   :  { %v2059_v14 = vmax.f32 %v2057_v21, 0.0 }
 0x4a6   :  { %v1940_v30 = vrot.slane %v1859_v3, %v4548_v54  ;;  %v1971_v52 = vcombine.high %v1859_v3, %v1859_v3  ;;  %3064 = vmatpush3.bf16.msra.mxu0 %v3249_v12 }
 0x4a7   :  { %v4569_v15 = vrot.slane %v2059_v14, %v4548_v54  ;;  %v2151_v59 = vcombine.high %v2059_v14, %v2059_v14  ;;  %3065 = vmatprep.subr.bf16.mxu0 %v3251_v50  ;;  %3094 = vmatpush3.bf16.msra.mxu1 %v3268_v18  ;;  %v3272_v18 = vld [vmem:[%s4870_s5 + $0x100] sm:$0xff]  }
 0x4a8   :  { %1941 = vrot.lane.b32.xlu1 %v1940_v30, %s4968_s4  ;;  %v2987_v31 = vrot.slane %v1940_v30, 9  ;;  %v1978_v32 = vrot.slane %v1971_v52, %v4548_v54  ;;  %v1958_v60 = vcombine.high %v1940_v30, %v1940_v30  ;;  %3095 = vmatprep.subr.bf16.mxu1 %v3270_v44  ;;  %v3287_v52 = vld [vmem:[%s4871_s7 + $0x30] sm:$0xff]  }
 0x4a9   :  { %2128 = vrot.lane.b32.xlu0 %v4569_v15, %s3337_s23  ;;  %v2995_v37 = vrot.slane %v4569_v15, 9  ;;  %v4588_v63 = vrot.slane %v2151_v59, %v4548_v54  ;;  %v2140_v58 = vcombine.high %v4569_v15, %v4569_v15 }
 0x4aa   :  { %3066 = vmatpush3.bf16.msra.mxu0 %v3253_v41  ;;  %v2988_v19 = vrot.slane %v1958_v60, 9  ;;  %v2989_v51 = vrot.slane %v1978_v32, 9  ;;  %v1996_v45 = vcombine.high %v1978_v32, %v1978_v32 }
 0x4ab   :  { %3067 = vmatprep.subr.bf16.mxu0 %v3255_v42  ;;  %v2996_v49 = vrot.slane %v2140_v58, 9  ;;  %v2997_v9 = vrot.slane %v4588_v63, 9  ;;  %3096 = vmatpush3.bf16.msra.mxu1 %v3271_v5  ;;  %v2172_v21 = vcombine.high %v4588_v63, %v4588_v63 }
 0x4ac   :  { %1885 = vrot.lane.b32.xlu1 %v2984_v22, %s4936_s25  ;;  %v2990_v23 = vrot.slane %v1996_v45, 9  ;;  %3148 = vmatprep.subr.bf16.mxu1 %v3344_v13 }
 0x4ad   :  { %2103 = vrot.lane.b32.xlu0 %v2993_v43, %s3327_s19  ;;  %v2998_v3 = vrot.slane %v2172_v21, 9 }
 0x4ae   :  { %3068 = vmatpush3.bf16.msra.mxu0 %v3257_v62 }
 0x4af   :  { %3069 = vmatprep.subr.bf16.mxu0 %v3259_v7 }
 0x4b0   :  { %1910 = vrot.lane.b32.xlu1 %v2985_v10, %s4945_s22 }
 0x4b1   :  { %2134 = vrot.lane.b32.xlu0 %v2995_v37, %s4945_s22  ;;  %s4969_s22 = smov 56  }
 0x4b2   :  { %3070 = vmatpush3.bf16.msra.mxu0 %v3261_v34 }
 0x4b3   :  { %3071 = vmatprep.subr.bf16.mxu0 %v3263_v57 }
 0x4b4   :  { %1948 = vrot.lane.b32.xlu1 %v2987_v31, %s3299_s2 }
 0x4b5   :  { %2159 = vrot.lane.b32.xlu0 %v4588_v63, %s4968_s4 }
 0x4b6   :  { %3072 = vmatpush3.bf16.msra.mxu0 %v3265_v47 }
 0x4b7   :  { %3073 = vmatprep.subr.bf16.mxu0 %v3267_v4 }
 0x4b8   :  { %1979 = vrot.lane.b32.xlu1 %v1978_v32, %s4950_s30 }
 0x4b9   :  { %1872 = vrot.lane.b32.xlu0 %v2983_v36, %s3327_s19 }
 0x4ba   :  { %3074 = vmatpush3.bf16.msra.mxu0 %v3269_v56 }
 0x4bb   :  { %3128 = vmatprep.subr.bf16.mxu0 %v3344_v13 }
 0x4bc   :  { %1959 = vrot.lane.b32.xlu1 %v1958_v60, %s4939_s12 }
 0x4bd   :  { %1878 = vrot.lane.b32.xlu0 %v1877_v55, %s4955_s21 }
 0x4c0   :  { %1928 = vrot.lane.b32.xlu1 %v2986_v0, %s4958_s14 }
 0x4c1   :  { %1903 = vrot.lane.b32.xlu0 %v1902_v20, %s3337_s23 }
 0x4c4   :  { %1966 = vrot.lane.b32.xlu1 %v2988_v19, %s4969_s22 }
 0x4c5   :  { %2116 = vrot.lane.b32.xlu0 %v2994_v2, %s4936_s25 }
 0x4c8   :  { %1991 = vrot.lane.b32.xlu1 %v2989_v51, %s4933_s27 }
 0x4c9   :  { %1916 = vrot.lane.b32.xlu0 %v1915_v28, %s4943_s0 }
 0x4cc   :  { %1997 = vrot.lane.b32.xlu1 %v1996_v45, %s4944_s15 }
 0x4cd   :  { %2141 = vrot.lane.b32.xlu0 %v2140_v58, %s4943_s0 }
 0x4d0   :  { %2004 = vrot.lane.b32.xlu1 %v2990_v23, %s4940_s13 }
 0x4d1   :  { %2147 = vrot.lane.b32.xlu0 %v2996_v49, %s4958_s14 }
 0x4d5   :  { %2168 = vrot.lane.b32.xlu0 %v2997_v9, %s3299_s2 }
 0x4d9   :  { %2173 = vrot.lane.b32.xlu0 %v2172_v21, %s4939_s12  ;;  %v3274_v21 = vld [vmem:[%s4870_s5 + $0x108] sm:$0xff]  }
 0x4dd   :  { %2179 = vrot.lane.b32.xlu0 %v2998_v3, %s4969_s22  ;;  %v3276_v3 = vld [vmem:[%s4870_s5 + $0x118] sm:$0xff]  }
 0x502   :  { %v2069_v14 = vpop.permute.xlu0 %2068 }
 0x503   :  { %2071 = vst.msk [vmem:[#allocation3 + $0x1] sm:$0x1] %vm1860_vm15, %v2069_v14  ;;  %vm1931_vm15 = vcmask 516288   ;;  %v3277_v14 = vld [vmem:[%s4870_s5 + $0x120] sm:$0xff]  }
 0x504   :  { %v2075_v46 = vpop.permute.xlu1 %2074 }
 0x505   :  { %2077 = vst.msk [vmem:[#allocation3 + $0x1] sm:$0x1] %vm1875_vm1, %v2075_v46  ;;  %v3278_v46 = vld [vmem:[%s4870_s5 + $0x128] sm:$0xff]  }
 0x508   :  { %v2080_v30 = vpop.permute.xlu1 %2079 }
 0x509   :  { %2082 = vst.msk [vmem:[#allocation3 + $0x1] sm:$0x1] %vm1881_vm2, %v2080_v30  ;;  %v3279_v30 = vld [vmem:[%s4870_s5 + $0x130] sm:$0xff]  }
 0x50c   :  { %v2086_v55 = vpop.permute.xlu1 %2085 }
 0x50d   :  { %v2087_v20 = vrot.slane %v2086_v55, 6 }
 0x50f   :  { %v2088_v22 = vsel %vm1827_vm13, %v2087_v20, %v2086_v55  ;;  %vm1888_vm13 = vcmask 982016   ;;  %v3280_v55 = vld [vmem:[%s4870_s5 + $0x138] sm:$0xff]  }
 0x510   :  { %2090 = vst.msk [vmem:[#allocation3 + $0x1] sm:$0x5] %vm4712_vm5, %v2088_v22  ;;  %v2109_v43 = vpop.permute.xlu1 %2108  ;;  %v3281_v22 = vld [vmem:[%s4871_s7] sm:$0xff]  }
 0x511   :  { %2100 = vst.msk [vmem:[#allocation3 + $0x3] sm:$0x1] %vm1906_vm6, %v4556_v61  ;;  %v2110_v37 = vrot.slane %v2109_v43, 6 }
 0x513   :  { %v2111_v11 = vsel %vm522_vm0, %v2110_v37, %v2109_v43  ;;  %vm1954_vm0 = vcmask 1041216   ;;  %v3282_v43 = vld [vmem:[%s4871_s7 + $0x8] sm:$0xff]   ;;  %v3285_v37 = vld [vmem:[%s4871_s7 + $0x20] sm:$0xff]  }
 0x514   :  { %vm4736_vm3 = vmor %vm1955_vm14, %vm1954_vm0  ;;  %vm2000_vm14 = vcmask 713088  }
 0x51a   :  { %v1942_v10 = vpop.permute.xlu1 %1941 }
 0x51b   :  { %v2129_v59 = vpop.permute.xlu0 %2128 }
 0x51e   :  { %v1886_v16 = vpop.permute.xlu1 %1885 }
 0x51f   :  { %v2104_v31 = vpop.permute.xlu0 %2103  ;;  %v1887_v36 = vrot.slane %v1886_v16, 6 }
 0x520   :  { %2106 = vst.msk [vmem:[#allocation3 + $0x3] sm:$0x1] %vm1913_vm10, %v2104_v31  ;;  %v3288_v31 = vld [vmem:[%s4871_s7 + $0x38] ss:$0 sps:$4 sm:$0xff]  }
 0x521   :  { %2113 = vst.msk [vmem:[#allocation3 + $0x3] sm:$0x5] %vm4721_vm11, %v2111_v11  ;;  %v1889_v33 = vsel %vm1888_vm13, %v1887_v36, %v1886_v16  ;;  %v3286_v16 = vld [vmem:[%s4871_s7 + $0x28] sm:$0xff]   ;;  %v2741_v11 = vsel %vm1717_vm12, %v3288_v31, 0  ;;  %vm2840_vm12 = vcmask 1041408  }
 0x522   :  { %v1911_v61 = vpop.permute.xlu1 %1910 }
 0x523   :  { %v2135_v63 = vpop.permute.xlu0 %2134 }
 0x524   :  { %v2136_v29 = vrot.slane %v2135_v63, 6 }
 0x526   :  { %v1949_v39 = vpop.permute.xlu1 %1948  ;;  %v2137_v0 = vsel %vm1713_vm9, %v2136_v29, %v2135_v63  ;;  %vm2162_vm9 = vcmask 523264   ;;  %v3290_v63 = vld [vmem:[%s4872_s9 + $0x8] sm:$0xff]  }
 0x527   :  { %v2160_v24 = vpop.permute.xlu0 %2159  ;;  %v1950_v19 = vrot.slane %v1949_v39, 6 }
 0x528   :  { %v2161_v53 = vrot.slane %v2160_v24, 6 }
 0x52a   :  { %v1980_v26 = vpop.permute.xlu1 %1979  ;;  %v2163_v38 = vsel %vm2162_vm9, %v2161_v53, %v2160_v24  ;;  %v3292_v24 = vld [vmem:[%s4872_s9 + $0x18] sm:$0xff]  }
 0x52b   :  { %v1873_v32 = vpop.permute.xlu0 %1872  ;;  %v1981_v62 = vrot.slane %v1980_v26, 6 }
 0x52c   :  { %1876 = vst.msk [vmem:[#allocation3] sm:$0x1] %vm1875_vm1, %v1873_v32  ;;  %vm1944_vm1 = vcmask 844288   ;;  %v3000_v32 = vld [vmem:[%s4873_s6] ss:$0 sm:$0xff] }
 0x52d   :  { %v1983_v34 = vsel %vm1982_vm8, %v1981_v62, %v1980_v26  ;;  %v3293_v62 = vld [vmem:[%s4872_s9 + $0x20] sm:$0xff]  }
 0x52e   :  { %v1960_v48 = vpop.permute.xlu1 %1959 }
 0x52f   :  { %v1879_v27 = vpop.permute.xlu0 %1878 }
 0x530   :  { %1882 = vst.msk [vmem:[#allocation3] sm:$0x1] %vm1881_vm2, %v1879_v27  ;;  %vm1919_vm2 = vcmask 916480  }
 0x531   :  { %1894 = vst.msk [vmem:[#allocation3] sm:$0x5] %vm4712_vm5, %v1889_v33  ;;  %vm1951_vm5 = vcmask 850944  }
 0x532   :  { %v1929_v60 = vpop.permute.xlu1 %1928  ;;  %v1952_v25 = vsel %vm1951_vm5, %v1950_v19, %v1949_v39  ;;  %v3291_v39 = vld [vmem:[%s4872_s9 + $0x10] sm:$0xff]  }
 0x533   :  { %v1904_v28 = vpop.permute.xlu0 %1903 }
 0x534   :  { %1907 = vst.msk [vmem:[#allocation3 + $0x2] sm:$0x1] %vm1906_vm6, %v1904_v28  ;;  %vm1985_vm6 = vcmask 1041152  }
 0x535   :  { %1914 = vst.msk [vmem:[#allocation3 + $0x2] sm:$0x1] %vm1913_vm10, %v1911_v61  ;;  %vm1969_vm10 = vcmask 778688   ;;  %vm1987_vm0 = vmor %vm1986_vm7, %vm1985_vm6  ;;  %v3289_v61 = vld [vmem:[%s4872_s9] sm:$0xff]  }
 0x536   :  { %v1967_v12 = vpop.permute.xlu1 %1966 }
 0x537   :  { %v2117_v17 = vpop.permute.xlu0 %2116 }
 0x538   :  { %2119 = vst.msk [vmem:[#allocation3 + $0x5] sm:$0x1] %vm1931_vm15, %v2117_v17 }
 0x539   :  { %2131 = vst.msk [vmem:[#allocation3 + $0x5] sm:$0x1] %vm1944_vm1, %v2129_v59  ;;  %v3284_v59 = vld [vmem:[%s4871_s7 + $0x18] sm:$0xff]  }
 0x53a   :  { %2139 = vst.msk [vmem:[#allocation3 + $0x5] sm:$0x5] %vm4736_vm3, %v2137_v0  ;;  %v1992_v40 = vpop.permute.xlu1 %1991 }
 0x53b   :  { %v1917_v41 = vpop.permute.xlu0 %1916 }
 0x53c   :  { %v1918_v6 = vrot.slane %v1917_v41, 6 }
 0x53e   :  { %v1920_v42 = vsel %vm1919_vm2, %v1918_v6, %v1917_v41  ;;  %v1998_v51 = vpop.permute.xlu1 %1997 }
 0x53f   :  { %1925 = vst.msk [vmem:[#allocation3 + $0x2] sm:$0x5] %vm4721_vm11, %v1920_v42  ;;  %v2142_v2 = vpop.permute.xlu0 %2141  ;;  %vm1994_vm11 = vcmask 385088  }
 0x540   :  { %1932 = vst.msk [vmem:[#allocation3 + $0x4] sm:$0x1] %vm1931_vm15, %v1929_v60  ;;  %vm2007_vm15 = vcmask 1041088  }
 0x541   :  { %2144 = vst.msk [vmem:[#allocation3 + $0x7] sm:$0x1] %vm1962_vm4, %v2142_v2 }
 0x542   :  { %1945 = vst.msk [vmem:[#allocation3 + $0x4] sm:$0x1] %vm1944_vm1, %v1942_v10  ;;  %v2005_v8 = vpop.permute.xlu1 %2004  ;;  %vm3345_vm1 = vmmov 0   ;;  %v3283_v10 = vld [vmem:[%s4871_s7 + $0x10] sm:$0xff]  }
 0x543   :  { %1957 = vst.msk [vmem:[#allocation3 + $0x4] sm:$0x5] %vm4736_vm3, %v1952_v25  ;;  %v2148_v7 = vpop.permute.xlu0 %2147  ;;  %v3294_v25 = vld [vmem:[%s4872_s9 + $0x28] ss:$0 sps:$4 sm:$0x33]   ;;  %vm2884_vm3 = vcmask 1024  }
 0x544   :  { %1963 = vst.msk [vmem:[#allocation3 + $0x6] sm:$0x1] %vm1962_vm4, %v1960_v48 }
 0x545   :  { %1970 = vst.msk [vmem:[#allocation3 + $0x6] sm:$0x1] %vm1969_vm10, %v1967_v12  ;;  %2150 = vst.msk [vmem:[#allocation3 + $0x7] sm:$0x1] %vm1969_vm10, %v2148_v7  ;;  %v16_v7 = vstv %s4874_s10 }
 0x546   :  { %1988 = vst.msk [vmem:[#allocation3 + $0x6] sm:$0x5] %vm1987_vm0, %v1983_v34  ;;  %2165 = vst.msk [vmem:[#allocation3 + $0x7] sm:$0x5] %vm1987_vm0, %v2163_v38  ;;  %v3041_v38 = vld [vmem:[%s4875_s8] ss:$0 sm:$0xff] }
 0x547   :  { %1995 = vst.msk [vmem:[#allocation3 + $0x8] sm:$0x1] %vm1994_vm11, %v1992_v40  ;;  %v2169_v45 = vpop.permute.xlu0 %2168  ;;  %17 = vst [vmem:[#allocation4] sm:$0x1] %v16_v7 }
 0x548   :  { %2001 = vst.msk [vmem:[#allocation3 + $0x8] sm:$0x1] %vm2000_vm14, %v1998_v51  ;;  %v2842_v51 = vsel %vm2840_vm12, %v3294_v25, 0 }
 0x549   :  { %2008 = vst.msk [vmem:[#allocation3 + $0x8] sm:$0x1] %vm2007_vm15, %v2005_v8 }
 0x54a   :  { %2171 = vst.msk [vmem:[#allocation3 + $0x9] sm:$0x1] %vm1994_vm11, %v2169_v45 }
 0x54b   :  { %v2174_v57 = vpop.permute.xlu0 %2173 }
 0x54c   :  { %2176 = vst.msk [vmem:[#allocation3 + $0x9] sm:$0x1] %vm2000_vm14, %v2174_v57 }
 0x54d   :  { %v2183_v58 = vld [vmem:[#allocation3] sm:$0xff] }
 0x54e   :  { %v2194_v35 = vrot.slane %v2183_v58, %v4548_v54  ;;  %v2187_v47 = vcombine.high %v2183_v58, %v2183_v58 }
 0x54f   :  { %v2180_v1 = vpop.permute.xlu0 %2179 }
 0x550   :  { %v2202_v23 = vcombine.high %v2194_v35, %v2194_v35  ;;  %v2201_v4 = vrot.slane %v2187_v47, %v4548_v54  ;;  %2182 = vst.msk [vmem:[#allocation3 + $0x9] sm:$0x1] %vm2007_vm15, %v2180_v1  ;;  %v2216_v44 = vpack.c.bf16 %v2194_v35, %v2194_v35  ;;  %v3275_v54 = vld [vmem:[%s4870_s5 + $0x110] sm:$0xff]   ;;  %v3051_v47 = vld [vmem:[#allocation4] ss:$0 sm:$0xff] }
 0x552   :  { %v2217_v49 = vpack.c.bf16 %v2202_v23, %v2202_v23  ;;  %v2203_v56 = vcombine.high %v2201_v4, %v2201_v4  ;;  %v2218_v9 = vpack.c.bf16 %v2201_v4, %v2201_v4 }
 0x554   :  { %2580 = vmatprep.mubr.bf16.mxu0 %v2217_v49  ;;  %v2219_v5 = vpack.c.bf16 %v2203_v56, %v2203_v56 }
 0x555   :  { %2581 = vmatmul.mubr.bf16.vlgmr.msra.gmra.mrb[16].mxu0 %v2216_v44 }
 0x556   :  { %3129 = vmatpush3.bf16.msra.mxu0 %v3272_v18  ;;  %2620 = vmatprep.mubr.bf16.mxu1 %v2219_v5 }
 0x557   :  { %2621 = vmatmul.mubr.bf16.vlgmr.msra.gmra.mrb[24].mxu1 %v2218_v9  ;;  %3130 = vmatprep.subr.bf16.mxu0 %v3344_v13  ;;  %v2999_v15 = vld.sshfl [vmem:[#allocation3 + $0x8] sm:$0x3 pattern:$0x76325410] }
 0x558   :  { %3144 = vmatprep.mubr.msk.bf16.mxu0 %vm3345_vm1, %v3344_v13  ;;  %3164 = vmatprep.mubr.msk.bf16.mxu1 %vm3345_vm1, %v3344_v13  ;;  %v2220_v20 = vpack.c.bf16 %v2999_v15, %v2999_v15 }
 0x559   :  { %3149 = vmatpush3.bf16.msra.mxu1 %v3281_v22 }
 0x55a   :  { %3131 = vmatpush3.bf16.msra.mxu0 %v3274_v21  ;;  %3150 = vmatprep.subr.bf16.mxu1 %v3344_v13 }
 0x55b   :  { %3132 = vmatprep.subr.bf16.mxu0 %v3344_v13 }
 0x55d   :  { %3151 = vmatpush3.bf16.msra.mxu1 %v3282_v43 }
 0x55e   :  { %3133 = vmatpush3.bf16.msra.mxu0 %v3275_v54  ;;  %3152 = vmatprep.subr.bf16.mxu1 %v3344_v13 }
 0x55f   :  { %3134 = vmatprep.subr.bf16.mxu0 %v3344_v13 }
 0x561   :  { %3153 = vmatpush3.bf16.msra.mxu1 %v3283_v10 }
 0x562   :  { %3135 = vmatpush3.bf16.msra.mxu0 %v3276_v3  ;;  %3154 = vmatprep.subr.bf16.mxu1 %v3344_v13 }
 0x563   :  { %3136 = vmatprep.subr.bf16.mxu0 %v3344_v13 }
 0x565   :  { %3155 = vmatpush3.bf16.msra.mxu1 %v3284_v59 }
 0x566   :  { %3137 = vmatpush3.bf16.msra.mxu0 %v3277_v14  ;;  %3156 = vmatprep.subr.bf16.mxu1 %v3344_v13 }
 0x567   :  { %3138 = vmatprep.subr.bf16.mxu0 %v3344_v13 }
 0x569   :  { %3157 = vmatpush3.bf16.msra.mxu1 %v3285_v37 }
 0x56a   :  { %3139 = vmatpush3.bf16.msra.mxu0 %v3278_v46  ;;  %3158 = vmatprep.subr.bf16.mxu1 %v3344_v13 }
 0x56b   :  { %3140 = vmatprep.subr.bf16.mxu0 %v3344_v13 }
 0x56d   :  { %3159 = vmatpush3.bf16.msra.mxu1 %v3286_v16 }
 0x56e   :  { %3141 = vmatpush3.bf16.msra.mxu0 %v3279_v30  ;;  %3160 = vmatprep.subr.bf16.mxu1 %v3344_v13 }
 0x56f   :  { %3142 = vmatprep.subr.bf16.mxu0 %v3344_v13 }
 0x571   :  { %3161 = vmatpush3.bf16.msra.mxu1 %v3287_v52 }
 0x572   :  { %3143 = vmatpush3.bf16.msra.mxu0 %v3280_v55  ;;  %3162 = vmatprep.subr.bf16.mxu1 %v3344_v13 }
 0x573   :  { %3168 = vmatprep.subr.bf16.mxu0 %v3344_v13 }
 0x575   :  { %3145 = vmatmul.mubr.bf16.vlgmr.msra.gmra.mrb[20].mxu0 %v2220_v20  ;;  %3163 = vmatpush3.bf16.msra.mxu1 %v2741_v11 }
 0x576   :  { %3180 = vmatprep.mubr.msk.bf16.mxu0 %vm3345_vm1, %v3344_v13  ;;  %3169 = vmatpush3.bf16.msra.mxu0 %v3289_v61 }
 0x577   :  { %3170 = vmatprep.subr.bf16.mxu0 %v3344_v13 }
 0x57a   :  { %3171 = vmatpush3.bf16.msra.mxu0 %v3290_v63 }
 0x57b   :  { %3172 = vmatprep.subr.bf16.mxu0 %v3344_v13 }
 0x57e   :  { %3173 = vmatpush3.bf16.msra.mxu0 %v3291_v39 }
 0x57f   :  { %3174 = vmatprep.subr.bf16.mxu0 %v3344_v13 }
 0x582   :  { %3175 = vmatpush3.bf16.msra.mxu0 %v3292_v24 }
 0x583   :  { %3176 = vmatprep.subr.bf16.mxu0 %v3344_v13 }
 0x586   :  { %3177 = vmatpush3.bf16.msra.mxu0 %v3293_v62 }
 0x587   :  { %3178 = vmatprep.subr.bf16.mxu0 %v3344_v13 }
 0x58a   :  { %3179 = vmatpush3.bf16.msra.mxu0 %v2842_v51 }
 0x628   :  { %v3075_v26 = vpop.f32.mrb[16].mxu0 }
 0x629   :  { %v3076_v36 = vpop.f32.mrb[17].mxu0 }
 0x62a   :  { %v3077_v48 = vadd.f32 %v3076_v36, %v3075_v26  ;;  %v3078_v27 = vpop.f32.mrb[18].mxu0  ;;  %v3097_v33 = vpop.f32.mrb[24].mxu1 }
 0x62b   :  { %v3079_v60 = vpop.f32.mrb[19].mxu0  ;;  %v3098_v28 = vpop.f32.mrb[25].mxu1 }
 0x62c   :  { %v2583_v29 = vadd.f32 %v3077_v48, %v3000_v32  ;;  %v3099_v12 = vadd.f32 %v3098_v28, %v3097_v33  ;;  %v3100_v17 = vpop.f32.mrb[26].mxu1 }
 0x62d   :  { %v3101_v50 = vpop.f32.mrb[27].mxu1 }
 0x62e   :  { %v2623_v0 = vadd.f32 %v3099_v12, %v2583_v29 }
 0x648   :  { %v2662_v40 = vpop.f32.mrb[20].mxu0 }
 0x649   :  { %v2663_v41 = vadd.f32 %v2662_v40, %v2623_v0  ;;  %v3146_v6 = vpop.f32.mrb[21].mxu0 }
 0x64a   :  { %v2665_v19 = vpop.f32.mrb[22].mxu0 }
 0x64b   :  { %v2668_v42 = vmax.f32 %v2663_v41, 0.0  ;;  %v3147_v2 = vpop.f32.mrb[23].mxu0 }
 0x64d   :  { %v2669_v53 = vpack.c.bf16 %v2668_v42, %v2668_v42 }
 0x64f   :  { %3165 = vmatmul.mubr.msk.bf16.vlgmr.msra.gmra.mrb[28].mxu1 %vm1888_vm13, %v2669_v53  ;;  %vm2836_vm13 = vcmask 687104  }
 0x722   :  { %v2777_v34 = vpop.f32.mrb[28].mxu1 }
 0x723   :  { %v2778_v8 = vadd.f32 %v3041_v38, %v2777_v34  ;;  %v3166_v45 = vpop.f32.mrb[29].mxu1 }
 0x724   :  { %v2780_v13 = vpop.f32.mrb[30].mxu1 }
 0x725   :  { %v2783_v57 = vmax.f32 %v2778_v8, 0.0  ;;  %v3167_v58 = vpop.f32.mrb[31].mxu1 }
 0x727   :  { %v2784_v35 = vpack.c.bf16 %v2783_v57, %v2783_v57 }
 0x729   :  { %3181 = vmatmul.mubr.msk.bf16.vlgmr.msra.gmra.mrb[24].mxu0 %vm2836_vm13, %v2784_v35 }
 0x7fc   :  { %v2878_v1 = vpop.f32.mrb[24].mxu0 }
 0x7fd   :  { %v2879_v23 = vadd.f32 %v3051_v47, %v2878_v1  ;;  %v3182_v4 = vpop.f32.mrb[25].mxu0 }
 0x7fe   :  { %v2881_v49 = vpop.f32.mrb[26].mxu0 }
 0x7ff   :  { %2885 = vst.msk [vmem:[%s4876_s11] sm:$0x3] %vm2884_vm3, %v2879_v23  ;;  %v3183_v18 = vpop.f32.mrb[27].mxu0 }

</bundles_post_ra>
